<compile_context>
chip_gen: v6e
topology: v6e:2x2x1
jax: 0.10.0
libtpu: 0.0.40
codegen_flags: <defaults>
</compile_context>

<pallas_src>
import numpy as np
import jax
import jax.numpy as jnp
from jax.experimental import pallas as pl
from jax.experimental.pallas import tpu as pltpu

VOCAB = 256
EMBED = 128
HIDDEN = 128
NUM_LAYERS = 2
BATCH = 4
SEQ = 8
SUBLANES = 8  # f32 sublane count -> batch padding target


# ----------------------------- Pallas kernel -------------------------------

def fused_rnn_kernel(tok_ref, h0_ref, c0_ref, proj0_ref, whh0_ref, b0_ref,
                     *refs):
    """Fused Embedding + stacked-LSTM + Linear forward (single call, no grid).

    tok_ref       : (T*Bp, 1) int32  token ids, t-major / b-minor row order
    h0_ref/c0_ref : (L, Bp, H) f32   initial hidden / cell state (batch padded)
    proj0_ref     : (VOCAB, 4H) bf16 embed_w @ W_ih0^T  (gate cols i,f,o,g)
    whh0_ref      : (H, 4H) bf16     layer-0 recurrent weight
    b0_ref        : (1, 4H) f32      layer-0 fused bias row
    refs[:3(L-1)] : per layer l>=1  (w_ih^T (H,4H) bf16, w_hh^T (H,4H) bf16,
                                     bias row (1,4H) f32)
    refs[3(L-1):] : lin_w (H,V) bf16, lin_b (1,V) f32,
                    outputs logits (Bp,T*V), hN (L,Bp,H), cN (L,Bp,H),
                    scratch gx0 (T*Bp,4H) f32, hs (T*Bp,H) f32
    """
    L, Bp, H = h0_ref.shape
    TB = tok_ref.shape[0]
    T = TB // Bp
    NV = proj0_ref.shape[0]

    nl = 3 * (L - 1)
    layer_refs = refs[:nl]
    linw_ref, linb_ref = refs[nl], refs[nl + 1]
    logits_ref, hN_ref, cN_ref = refs[nl + 2], refs[nl + 3], refs[nl + 4]
    gx0_ref, hs_ref = refs[nl + 5], refs[nl + 6]
    V = linw_ref.shape[1]

    # ---- fused embedding + layer-0 input projection: one M=T*Bp matmul ------
    tok = tok_ref[...]                                              # (T*Bp, 1)
    onehot = jnp.where(
        tok == jax.lax.broadcasted_iota(jnp.int32, (TB, NV), 1),
        1.0, 0.0).astype(jnp.bfloat16)                              # (T*Bp, NV)
    gx0_ref[...] = (jnp.dot(onehot, proj0_ref[...],
                            preferred_element_type=jnp.float32)
                    + b0_ref[...])                                  # (T*Bp, 4H)

    def lstm_gates_to_state(gates, c_prev):
        # gate columns pre-ordered (i, f, o, g); sigmoid via one EUP tanh push
        s = 0.5 * jnp.tanh(0.5 * gates[:, :3 * H]) + 0.5
        g = jnp.tanh(gates[:, 3 * H:])
        i_g, f_g, o_g = s[:, :H], s[:, H:2 * H], s[:, 2 * H:]
        c_new = f_g * c_prev + i_g * g
        h_new = o_g * jnp.tanh(c_new)
        return h_new, c_new

    h = [h0_ref[l] for l in range(L)]
    c = [c0_ref[l] for l in range(L)]

    # T and L are small & static: fully unrolled recurrence.
    for t in range(T):
        # layer 0: precomputed input projection + one recurrent K=128 dot
        g0 = gx0_ref[t * Bp:(t + 1) * Bp, :] + jnp.dot(
            h[0].astype(jnp.bfloat16), whh0_ref[...],
            preferred_element_type=jnp.float32)
        h[0], c[0] = lstm_gates_to_state(g0, c[0])
        # layers >= 1: two K=128 dots (no concat), f32 accumulate
        for l in range(1, L):
            wih_ref, whh_ref, b_ref = layer_refs[3 * (l - 1):3 * l]
            gl = (jnp.dot(h[l - 1].astype(jnp.bfloat16), wih_ref[...],
                          preferred_element_type=jnp.float32)
                  + jnp.dot(h[l].astype(jnp.bfloat16), whh_ref[...],
                            preferred_element_type=jnp.float32)
                  + b_ref[...])
            h[l], c[l] = lstm_gates_to_state(gl, c[l])
        hs_ref[t * Bp:(t + 1) * Bp, :] = h[L - 1]

    # ---- batched output Linear: single (T*Bp, H) x (H, V) matmul ------------
    logits_all = (jnp.dot(hs_ref[...].astype(jnp.bfloat16), linw_ref[...],
                          preferred_element_type=jnp.float32)
                  + linb_ref[...])                                  # (T*Bp, V)
    for t in range(T):  # 128-aligned, lane-dense column-block stores
        logits_ref[:, t * V:(t + 1) * V] = logits_all[t * Bp:(t + 1) * Bp, :]

    for l in range(L):
        hN_ref[l] = h[l]
        cN_ref[l] = c[l]


# ----------------------------- wrapper --------------------------------------

def rnn_forward(params, x_tokens, h):
    # TODO(synk): if called per decode step, keep bf16 weights VMEM-resident
    # across calls via the cross-call prefetch pattern (P10).
    h0, c0 = h
    B, T = x_tokens.shape
    Bp = ((B + SUBLANES - 1) // SUBLANES) * SUBLANES
    pad = Bp - B
    kern = params["kern"]

    # Only token ids enter the kernel (embedding is fused in-kernel).
    tok_flat = jnp.pad(x_tokens, ((0, pad), (0, 0))).T.reshape(T * Bp, 1)
    tok_flat = tok_flat.astype(jnp.int32)
    h0_p = jnp.pad(h0, ((0, 0), (0, pad), (0, 0)))                  # (L, Bp, H)
    c0_p = jnp.pad(c0, ((0, 0), (0, pad), (0, 0)))

    args = [tok_flat, h0_p, c0_p, kern["proj0"], kern["whh0"], kern["b0"]]
    for lyr in kern["layers"]:
        args += list(lyr)
    args += [kern["lin_w_t"], kern["lin_b_row"]]

    vmem = pl.BlockSpec(memory_space=pltpu.MemorySpace.VMEM)
    H, V, L = HIDDEN, VOCAB, NUM_LAYERS
    flops = (2 * T * Bp * V * 4 * H                    # fused embed + proj0
             + 2 * T * Bp * H * 4 * H * (2 * L - 1)    # recurrent dots
             + 2 * T * Bp * H * V)                     # batched output linear
    cost = pl.CostEstimate(flops=flops,
                           transcendentals=T * L * Bp * 5 * H,
                           bytes_accessed=2 * 1024 * 1024)

    logits_slab, hN_p, cN_p = pl.pallas_call(
        fused_rnn_kernel,
        out_shape=(jax.ShapeDtypeStruct((Bp, T * V), jnp.float32),
                   jax.ShapeDtypeStruct((L, Bp, H), jnp.float32),
                   jax.ShapeDtypeStruct((L, Bp, H), jnp.float32)),
        in_specs=[vmem] * len(args),
        out_specs=(vmem, vmem, vmem),
        scratch_shapes=[pltpu.VMEM((T * Bp, 4 * H), jnp.float32),   # gates_x0
                        pltpu.VMEM((T * Bp, H), jnp.float32)],      # h[L-1] stage
        cost_estimate=cost,
    )(*args)

    # (Bp, T*V) -> (Bp, T, V) -> slice real batch -> (B*T, V); reshapes are
    # free (contiguous), only the tiny leading-dim slice moves data.
    logits = logits_slab.reshape(Bp, T, V)[:B].reshape(B * T, V)
    return logits, (hN_p[:, :B], cN_p[:, :B])


# ----------------------------- reference ------------------------------------

def lstm_cell_ref(x, h, c, w_ih, w_hh, b_ih, b_hh):
    gates = x @ w_ih.T + b_ih + h @ w_hh.T + b_hh
    i, f, g, o = jnp.split(gates, 4, axis=-1)
    i, f, o = jax.nn.sigmoid(i), jax.nn.sigmoid(f), jax.nn.sigmoid(o)
    g = jnp.tanh(g)
    c = f * c + i * g
    return o * jnp.tanh(c), c


def rnn_forward_ref(params, x_tokens, h):
    h0, c0 = h
    inp = params["embed_w"][x_tokens]
    hNs, cNs = [], []
    for layer in range(NUM_LAYERS):
        w_ih, w_hh, b_ih, b_hh = params["lstm"][layer]
        hh, cc = h0[layer], c0[layer]
        outs = []
        for t in range(inp.shape[1]):
            hh, cc = lstm_cell_ref(inp[:, t], hh, cc, w_ih, w_hh, b_ih, b_hh)
            outs.append(hh)
        inp = jnp.stack(outs, axis=1)
        hNs.append(hh)
        cNs.append(cc)
    out = inp.reshape(-1, inp.shape[-1]) @ params["lin_w"].T + params["lin_b"]
    return out, (jnp.stack(hNs), jnp.stack(cNs))


# ----------------------------- init ------------------------------------------

def init_params(key):
    keys = jax.random.split(key, 2 + 4 * NUM_LAYERS)
    k = 1.0 / np.sqrt(HIDDEN)
    params = {
        "embed_w": jax.random.uniform(keys[0], (VOCAB, EMBED),
                                      jnp.float32, -0.1, 0.1),
        "lin_w": jax.random.uniform(keys[1], (VOCAB, HIDDEN),
                                    jnp.float32, -0.1, 0.1),
        "lin_b": jnp.zeros((VOCAB,), jnp.float32),
        "lstm": [],
    }

    def reorder_gates(a):
        # column blocks (i, f, g, o) -> (i, f, o, g): one sigmoid covers 3H
        H = HIDDEN
        return jnp.concatenate(
            [a[..., :2 * H], a[..., 3 * H:], a[..., 2 * H:3 * H]], axis=-1)

    kern = {"layers": []}
    for layer in range(NUM_LAYERS):
        in_size = EMBED if layer == 0 else HIDDEN
        kk = keys[2 + 4 * layer: 2 + 4 * (layer + 1)]
        w_ih = jax.random.uniform(kk[0], (4 * HIDDEN, in_size), jnp.float32, -k, k)
        w_hh = jax.random.uniform(kk[1], (4 * HIDDEN, HIDDEN), jnp.float32, -k, k)
        b_ih = jax.random.uniform(kk[2], (4 * HIDDEN,), jnp.float32, -k, k)
        b_hh = jax.random.uniform(kk[3], (4 * HIDDEN,), jnp.float32, -k, k)
        params["lstm"].append((w_ih, w_hh, b_ih, b_hh))

        wih_t = reorder_gates(w_ih.T)                       # (in, 4H)
        whh_t = reorder_gates(w_hh.T)                       # (H, 4H)
        b_row = reorder_gates((b_ih + b_hh)[None, :])       # (1, 4H) f32
        if layer == 0:
            # fold Embedding into the layer-0 input projection: (VOCAB, 4H)
            kern["proj0"] = jnp.dot(
                params["embed_w"], wih_t,
                precision=jax.lax.Precision.HIGHEST).astype(jnp.bfloat16)
            kern["whh0"] = whh_t.astype(jnp.bfloat16)
            kern["b0"] = b_row
        else:
            kern["layers"].append((wih_t.astype(jnp.bfloat16),
                                   whh_t.astype(jnp.bfloat16),
                                   b_row))

    kern["lin_w_t"] = params["lin_w"].T.astype(jnp.bfloat16)   # (H, V) bf16
    kern["lin_b_row"] = params["lin_b"][None, :]               # (1, V) f32
    params["kern"] = kern
    return params


# ----------------------------- main ------------------------------------------

if __name__ == "__main__":
    key = jax.random.PRNGKey(0)
    kp, kx, kh, kc = jax.random.split(key, 4)

    params = init_params(kp)
    x = jax.random.randint(kx, (BATCH, SEQ), 0, VOCAB, dtype=jnp.int32)
    h0 = 0.1 * jax.random.normal(kh, (NUM_LAYERS, BATCH, HIDDEN), jnp.float32)
    c0 = 0.1 * jax.random.normal(kc, (NUM_LAYERS, BATCH, HIDDEN), jnp.float32)

    logits, (hN, cN) = jax.jit(rnn_forward)(params, x, (h0, c0))
    jax.block_until_ready(logits)

    ref_logits, (ref_hN, ref_cN) = rnn_forward_ref(params, x, (h0, c0))
    np.testing.assert_allclose(np.asarray(logits), np.asarray(ref_logits),
                               rtol=2e-3, atol=2e-3)
    np.testing.assert_allclose(np.asarray(hN), np.asarray(ref_hN),
                               rtol=2e-3, atol=2e-3)
    np.testing.assert_allclose(np.asarray(cN), np.asarray(ref_cN),
                               rtol=2e-3, atol=2e-3)

    assert logits.shape == (BATCH * SEQ, VOCAB)
    assert hN.shape == (NUM_LAYERS, BATCH, HIDDEN)
    assert cN.shape == (NUM_LAYERS, BATCH, HIDDEN)
    print("KERNEL_OK")
</pallas_src>

<mosaic_0001>
module attributes {stable_mosaic.version = 11 : i64} {
  func.func @fused_rnn_kernel(%arg0: memref<64x1xi32, #tpu.memory_space<vmem>>, %arg1: memref<2x8x128xf32, #tpu.memory_space<vmem>>, %arg2: memref<2x8x128xf32, #tpu.memory_space<vmem>>, %arg3: memref<256x512xbf16, #tpu.memory_space<vmem>>, %arg4: memref<128x512xbf16, #tpu.memory_space<vmem>>, %arg5: memref<1x512xf32, #tpu.memory_space<vmem>>, %arg6: memref<128x512xbf16, #tpu.memory_space<vmem>>, %arg7: memref<128x512xbf16, #tpu.memory_space<vmem>>, %arg8: memref<1x512xf32, #tpu.memory_space<vmem>>, %arg9: memref<128x256xbf16, #tpu.memory_space<vmem>>, %arg10: memref<1x256xf32, #tpu.memory_space<vmem>>, %arg11: memref<8x2048xf32, #tpu.memory_space<vmem>>, %arg12: memref<2x8x128xf32, #tpu.memory_space<vmem>>, %arg13: memref<2x8x128xf32, #tpu.memory_space<vmem>>, %arg14: memref<64x512xf32, #tpu.memory_space<vmem>>, %arg15: memref<64x128xf32, #tpu.memory_space<vmem>>) attributes {dimension_semantics = [], scalar_prefetch = 0 : i64, scratch_operands = 2 : i64, tpu.core_type = #tpu.core_type<tc>} {
    %c0 = arith.constant 0 : index
    %c0_0 = arith.constant 0 : index
    %0 = vector.load %arg0[%c0, %c0_0] : memref<64x1xi32, #tpu.memory_space<vmem>>, vector<64x1xi32>
    %1 = tpu.iota {dimensions = array<i32: 1>} : vector<64x256xi32>
    %2 = vector.broadcast %0 : vector<64x1xi32> to vector<64x256xi32>
    %3 = arith.cmpi eq, %2, %1 : vector<64x256xi32>
    %cst = arith.constant 1.000000e+00 : f32
    %cst_1 = arith.constant 0.000000e+00 : f32
    %4 = vector.broadcast %cst : f32 to vector<64x256xf32>
    %5 = vector.broadcast %cst_1 : f32 to vector<64x256xf32>
    %6 = arith.select %3, %4, %5 : vector<64x256xi1>, vector<64x256xf32>
    %7 = arith.truncf %6 : vector<64x256xf32> to vector<64x256xbf16>
    %c0_2 = arith.constant 0 : index
    %c0_3 = arith.constant 0 : index
    %8 = vector.load %arg3[%c0_2, %c0_3] : memref<256x512xbf16, #tpu.memory_space<vmem>>, vector<256x512xbf16>
    %cst_4 = arith.constant dense<0.000000e+00> : vector<64x512xf32>
    %9 = tpu.matmul %7, %8, %cst_4 {dimension_numbers = #tpu.dot_dimension_numbers<[1], [0], [0], [1], [0, 0, 1, 1], [], []>} : vector<64x256xbf16>, vector<256x512xbf16>, vector<64x512xf32> -> vector<64x512xf32>
    %c0_5 = arith.constant 0 : index
    %c0_6 = arith.constant 0 : index
    %10 = vector.load %arg5[%c0_5, %c0_6] : memref<1x512xf32, #tpu.memory_space<vmem>>, vector<1x512xf32>
    %11 = vector.broadcast %10 : vector<1x512xf32> to vector<64x512xf32>
    %12 = arith.addf %9, %11 : vector<64x512xf32>
    %c0_7 = arith.constant 0 : index
    %c0_8 = arith.constant 0 : index
    %13 = vector.load %arg14[%c0_7, %c0_8] : memref<64x512xf32, #tpu.memory_space<vmem>>, vector<64x512xf32>
    tpu.vector_store %arg14[%c0_7, %c0_8], %12 {strides = array<i32>} : memref<64x512xf32, #tpu.memory_space<vmem>>, vector<64x512xf32>,
    %c0_9 = arith.constant 0 : index
    %c0_10 = arith.constant 0 : index
    %c0_11 = arith.constant 0 : index
    %14 = vector.load %arg1[%c0_9, %c0_10, %c0_11] : memref<2x8x128xf32, #tpu.memory_space<vmem>>, vector<1x8x128xf32>
    %15 = vector.shape_cast %14 : vector<1x8x128xf32> to vector<8x128xf32>
    %c1 = arith.constant 1 : index
    %c0_12 = arith.constant 0 : index
    %c0_13 = arith.constant 0 : index
    %16 = vector.load %arg1[%c1, %c0_12, %c0_13] : memref<2x8x128xf32, #tpu.memory_space<vmem>>, vector<1x8x128xf32>
    %17 = vector.shape_cast %16 : vector<1x8x128xf32> to vector<8x128xf32>
    %c0_14 = arith.constant 0 : index
    %c0_15 = arith.constant 0 : index
    %c0_16 = arith.constant 0 : index
    %18 = vector.load %arg2[%c0_14, %c0_15, %c0_16] : memref<2x8x128xf32, #tpu.memory_space<vmem>>, vector<1x8x128xf32>
    %19 = vector.shape_cast %18 : vector<1x8x128xf32> to vector<8x128xf32>
    %c1_17 = arith.constant 1 : index
    %c0_18 = arith.constant 0 : index
    %c0_19 = arith.constant 0 : index
    %20 = vector.load %arg2[%c1_17, %c0_18, %c0_19] : memref<2x8x128xf32, #tpu.memory_space<vmem>>, vector<1x8x128xf32>
    %21 = vector.shape_cast %20 : vector<1x8x128xf32> to vector<8x128xf32>
    %c0_20 = arith.constant 0 : index
    %c0_21 = arith.constant 0 : index
    %22 = vector.load %arg14[%c0_20, %c0_21] : memref<64x512xf32, #tpu.memory_space<vmem>>, vector<8x512xf32>
    %23 = arith.truncf %15 : vector<8x128xf32> to vector<8x128xbf16>
    %c0_22 = arith.constant 0 : index
    %c0_23 = arith.constant 0 : index
    %24 = vector.load %arg4[%c0_22, %c0_23] : memref<128x512xbf16, #tpu.memory_space<vmem>>, vector<128x512xbf16>
    %cst_24 = arith.constant dense<0.000000e+00> : vector<8x512xf32>
    %25 = tpu.matmul %23, %24, %cst_24 {dimension_numbers = #tpu.dot_dimension_numbers<[1], [0], [0], [1], [0, 0, 1, 1], [], []>} : vector<8x128xbf16>, vector<128x512xbf16>, vector<8x512xf32> -> vector<8x512xf32>
    %26 = arith.addf %22, %25 : vector<8x512xf32>
    %27 = vector.extract_strided_slice %26 {offsets = [0, 0], sizes = [8, 384], strides = [1, 1]} : vector<8x512xf32> to vector<8x384xf32>
    %cst_25 = arith.constant 5.000000e-01 : f32
    %28 = vector.broadcast %cst_25 : f32 to vector<8x384xf32>
    %29 = arith.mulf %28, %27 : vector<8x384xf32>
    %30 = math.tanh %29 : vector<8x384xf32>
    %cst_26 = arith.constant 5.000000e-01 : f32
    %31 = vector.broadcast %cst_26 : f32 to vector<8x384xf32>
    %32 = arith.mulf %31, %30 : vector<8x384xf32>
    %cst_27 = arith.constant 5.000000e-01 : f32
    %33 = vector.broadcast %cst_27 : f32 to vector<8x384xf32>
    %34 = arith.addf %32, %33 : vector<8x384xf32>
    %35 = vector.extract_strided_slice %26 {offsets = [0, 384], sizes = [8, 128], strides = [1, 1]} : vector<8x512xf32> to vector<8x128xf32>
    %36 = math.tanh %35 : vector<8x128xf32>
    %37 = vector.extract_strided_slice %34 {offsets = [0, 0], sizes = [8, 128], strides = [1, 1]} : vector<8x384xf32> to vector<8x128xf32>
    %38 = vector.extract_strided_slice %34 {offsets = [0, 128], sizes = [8, 128], strides = [1, 1]} : vector<8x384xf32> to vector<8x128xf32>
    %39 = vector.extract_strided_slice %34 {offsets = [0, 256], sizes = [8, 128], strides = [1, 1]} : vector<8x384xf32> to vector<8x128xf32>
    %40 = arith.mulf %38, %19 : vector<8x128xf32>
    %41 = arith.mulf %37, %36 : vector<8x128xf32>
    %42 = arith.addf %40, %41 : vector<8x128xf32>
    %43 = math.tanh %42 : vector<8x128xf32>
    %44 = arith.mulf %39, %43 : vector<8x128xf32>
    %45 = arith.truncf %44 : vector<8x128xf32> to vector<8x128xbf16>
    %c0_28 = arith.constant 0 : index
    %c0_29 = arith.constant 0 : index
    %46 = vector.load %arg6[%c0_28, %c0_29] : memref<128x512xbf16, #tpu.memory_space<vmem>>, vector<128x512xbf16>
    %cst_30 = arith.constant dense<0.000000e+00> : vector<8x512xf32>
    %47 = tpu.matmul %45, %46, %cst_30 {dimension_numbers = #tpu.dot_dimension_numbers<[1], [0], [0], [1], [0, 0, 1, 1], [], []>} : vector<8x128xbf16>, vector<128x512xbf16>, vector<8x512xf32> -> vector<8x512xf32>
    %48 = arith.truncf %17 : vector<8x128xf32> to vector<8x128xbf16>
    %c0_31 = arith.constant 0 : index
    %c0_32 = arith.constant 0 : index
    %49 = vector.load %arg7[%c0_31, %c0_32] : memref<128x512xbf16, #tpu.memory_space<vmem>>, vector<128x512xbf16>
    %cst_33 = arith.constant dense<0.000000e+00> : vector<8x512xf32>
    %50 = tpu.matmul %48, %49, %cst_33 {dimension_numbers = #tpu.dot_dimension_numbers<[1], [0], [0], [1], [0, 0, 1, 1], [], []>} : vector<8x128xbf16>, vector<128x512xbf16>, vector<8x512xf32> -> vector<8x512xf32>
    %51 = arith.addf %47, %50 : vector<8x512xf32>
    %c0_34 = arith.constant 0 : index
    %c0_35 = arith.constant 0 : index
    %52 = vector.load %arg8[%c0_34, %c0_35] : memref<1x512xf32, #tpu.memory_space<vmem>>, vector<1x512xf32>
    %53 = vector.broadcast %52 : vector<1x512xf32> to vector<8x512xf32>
    %54 = arith.addf %51, %53 : vector<8x512xf32>
    %55 = vector.extract_strided_slice %54 {offsets = [0, 0], sizes = [8, 384], strides = [1, 1]} : vector<8x512xf32> to vector<8x384xf32>
    %cst_36 = arith.constant 5.000000e-01 : f32
    %56 = vector.broadcast %cst_36 : f32 to vector<8x384xf32>
    %57 = arith.mulf %56, %55 : vector<8x384xf32>
    %58 = math.tanh %57 : vector<8x384xf32>
    %cst_37 = arith.constant 5.000000e-01 : f32
    %59 = vector.broadcast %cst_37 : f32 to vector<8x384xf32>
    %60 = arith.mulf %59, %58 : vector<8x384xf32>
    %cst_38 = arith.constant 5.000000e-01 : f32
    %61 = vector.broadcast %cst_38 : f32 to vector<8x384xf32>
    %62 = arith.addf %60, %61 : vector<8x384xf32>
    %63 = vector.extract_strided_slice %54 {offsets = [0, 384], sizes = [8, 128], strides = [1, 1]} : vector<8x512xf32> to vector<8x128xf32>
    %64 = math.tanh %63 : vector<8x128xf32>
    %65 = vector.extract_strided_slice %62 {offsets = [0, 0], sizes = [8, 128], strides = [1, 1]} : vector<8x384xf32> to vector<8x128xf32>
    %66 = vector.extract_strided_slice %62 {offsets = [0, 128], sizes = [8, 128], strides = [1, 1]} : vector<8x384xf32> to vector<8x128xf32>
    %67 = vector.extract_strided_slice %62 {offsets = [0, 256], sizes = [8, 128], strides = [1, 1]} : vector<8x384xf32> to vector<8x128xf32>
    %68 = arith.mulf %66, %21 : vector<8x128xf32>
    %69 = arith.mulf %65, %64 : vector<8x128xf32>
    %70 = arith.addf %68, %69 : vector<8x128xf32>
    %71 = math.tanh %70 : vector<8x128xf32>
    %72 = arith.mulf %67, %71 : vector<8x128xf32>
    %c0_39 = arith.constant 0 : index
    %c0_40 = arith.constant 0 : index
    %73 = vector.load %arg15[%c0_39, %c0_40] : memref<64x128xf32, #tpu.memory_space<vmem>>, vector<8x128xf32>
    tpu.vector_store %arg15[%c0_39, %c0_40], %72 {strides = array<i32>} : memref<64x128xf32, #tpu.memory_space<vmem>>, vector<8x128xf32>,
    %c8 = arith.constant 8 : index
    %c0_41 = arith.constant 0 : index
    %74 = vector.load %arg14[%c8, %c0_41] : memref<64x512xf32, #tpu.memory_space<vmem>>, vector<8x512xf32>
    %75 = arith.truncf %44 : vector<8x128xf32> to vector<8x128xbf16>
    %c0_42 = arith.constant 0 : index
    %c0_43 = arith.constant 0 : index
    %76 = vector.load %arg4[%c0_42, %c0_43] : memref<128x512xbf16, #tpu.memory_space<vmem>>, vector<128x512xbf16>
    %cst_44 = arith.constant dense<0.000000e+00> : vector<8x512xf32>
    %77 = tpu.matmul %75, %76, %cst_44 {dimension_numbers = #tpu.dot_dimension_numbers<[1], [0], [0], [1], [0, 0, 1, 1], [], []>} : vector<8x128xbf16>, vector<128x512xbf16>, vector<8x512xf32> -> vector<8x512xf32>
    %78 = arith.addf %74, %77 : vector<8x512xf32>
    %79 = vector.extract_strided_slice %78 {offsets = [0, 0], sizes = [8, 384], strides = [1, 1]} : vector<8x512xf32> to vector<8x384xf32>
    %cst_45 = arith.constant 5.000000e-01 : f32
    %80 = vector.broadcast %cst_45 : f32 to vector<8x384xf32>
    %81 = arith.mulf %80, %79 : vector<8x384xf32>
    %82 = math.tanh %81 : vector<8x384xf32>
    %cst_46 = arith.constant 5.000000e-01 : f32
    %83 = vector.broadcast %cst_46 : f32 to vector<8x384xf32>
    %84 = arith.mulf %83, %82 : vector<8x384xf32>
    %cst_47 = arith.constant 5.000000e-01 : f32
    %85 = vector.broadcast %cst_47 : f32 to vector<8x384xf32>
    %86 = arith.addf %84, %85 : vector<8x384xf32>
    %87 = vector.extract_strided_slice %78 {offsets = [0, 384], sizes = [8, 128], strides = [1, 1]} : vector<8x512xf32> to vector<8x128xf32>
    %88 = math.tanh %87 : vector<8x128xf32>
    %89 = vector.extract_strided_slice %86 {offsets = [0, 0], sizes = [8, 128], strides = [1, 1]} : vector<8x384xf32> to vector<8x128xf32>
    %90 = vector.extract_strided_slice %86 {offsets = [0, 128], sizes = [8, 128], strides = [1, 1]} : vector<8x384xf32> to vector<8x128xf32>
    %91 = vector.extract_strided_slice %86 {offsets = [0, 256], sizes = [8, 128], strides = [1, 1]} : vector<8x384xf32> to vector<8x128xf32>
    %92 = arith.mulf %90, %42 : vector<8x128xf32>
    %93 = arith.mulf %89, %88 : vector<8x128xf32>
    %94 = arith.addf %92, %93 : vector<8x128xf32>
    %95 = math.tanh %94 : vector<8x128xf32>
    %96 = arith.mulf %91, %95 : vector<8x128xf32>
    %97 = arith.truncf %96 : vector<8x128xf32> to vector<8x128xbf16>
    %c0_48 = arith.constant 0 : index
    %c0_49 = arith.constant 0 : index
    %98 = vector.load %arg6[%c0_48, %c0_49] : memref<128x512xbf16, #tpu.memory_space<vmem>>, vector<128x512xbf16>
    %cst_50 = arith.constant dense<0.000000e+00> : vector<8x512xf32>
    %99 = tpu.matmul %97, %98, %cst_50 {dimension_numbers = #tpu.dot_dimension_numbers<[1], [0], [0], [1], [0, 0, 1, 1], [], []>} : vector<8x128xbf16>, vector<128x512xbf16>, vector<8x512xf32> -> vector<8x512xf32>
    %100 = arith.truncf %72 : vector<8x128xf32> to vector<8x128xbf16>
    %c0_51 = arith.constant 0 : index
    %c0_52 = arith.constant 0 : index
    %101 = vector.load %arg7[%c0_51, %c0_52] : memref<128x512xbf16, #tpu.memory_space<vmem>>, vector<128x512xbf16>
    %cst_53 = arith.constant dense<0.000000e+00> : vector<8x512xf32>
    %102 = tpu.matmul %100, %101, %cst_53 {dimension_numbers = #tpu.dot_dimension_numbers<[1], [0], [0], [1], [0, 0, 1, 1], [], []>} : vector<8x128xbf16>, vector<128x512xbf16>, vector<8x512xf32> -> vector<8x512xf32>
    %103 = arith.addf %99, %102 : vector<8x512xf32>
    %c0_54 = arith.constant 0 : index
    %c0_55 = arith.constant 0 : index
    %104 = vector.load %arg8[%c0_54, %c0_55] : memref<1x512xf32, #tpu.memory_space<vmem>>, vector<1x512xf32>
    %105 = vector.broadcast %104 : vector<1x512xf32> to vector<8x512xf32>
    %106 = arith.addf %103, %105 : vector<8x512xf32>
    %107 = vector.extract_strided_slice %106 {offsets = [0, 0], sizes = [8, 384], strides = [1, 1]} : vector<8x512xf32> to vector<8x384xf32>
    %cst_56 = arith.constant 5.000000e-01 : f32
    %108 = vector.broadcast %cst_56 : f32 to vector<8x384xf32>
    %109 = arith.mulf %108, %107 : vector<8x384xf32>
    %110 = math.tanh %109 : vector<8x384xf32>
    %cst_57 = arith.constant 5.000000e-01 : f32
    %111 = vector.broadcast %cst_57 : f32 to vector<8x384xf32>
    %112 = arith.mulf %111, %110 : vector<8x384xf32>
    %cst_58 = arith.constant 5.000000e-01 : f32
    %113 = vector.broadcast %cst_58 : f32 to vector<8x384xf32>
    %114 = arith.addf %112, %113 : vector<8x384xf32>
    %115 = vector.extract_strided_slice %106 {offsets = [0, 384], sizes = [8, 128], strides = [1, 1]} : vector<8x512xf32> to vector<8x128xf32>
    %116 = math.tanh %115 : vector<8x128xf32>
    %117 = vector.extract_strided_slice %114 {offsets = [0, 0], sizes = [8, 128], strides = [1, 1]} : vector<8x384xf32> to vector<8x128xf32>
    %118 = vector.extract_strided_slice %114 {offsets = [0, 128], sizes = [8, 128], strides = [1, 1]} : vector<8x384xf32> to vector<8x128xf32>
    %119 = vector.extract_strided_slice %114 {offsets = [0, 256], sizes = [8, 128], strides = [1, 1]} : vector<8x384xf32> to vector<8x128xf32>
    %120 = arith.mulf %118, %70 : vector<8x128xf32>
    %121 = arith.mulf %117, %116 : vector<8x128xf32>
    %122 = arith.addf %120, %121 : vector<8x128xf32>
    %123 = math.tanh %122 : vector<8x128xf32>
    %124 = arith.mulf %119, %123 : vector<8x128xf32>
    %c8_59 = arith.constant 8 : index
    %c0_60 = arith.constant 0 : index
    %125 = vector.load %arg15[%c8_59, %c0_60] : memref<64x128xf32, #tpu.memory_space<vmem>>, vector<8x128xf32>
    tpu.vector_store %arg15[%c8_59, %c0_60], %124 {strides = array<i32>} : memref<64x128xf32, #tpu.memory_space<vmem>>, vector<8x128xf32>,
    %c16 = arith.constant 16 : index
    %c0_61 = arith.constant 0 : index
    %126 = vector.load %arg14[%c16, %c0_61] : memref<64x512xf32, #tpu.memory_space<vmem>>, vector<8x512xf32>
    %127 = arith.truncf %96 : vector<8x128xf32> to vector<8x128xbf16>
    %c0_62 = arith.constant 0 : index
    %c0_63 = arith.constant 0 : index
    %128 = vector.load %arg4[%c0_62, %c0_63] : memref<128x512xbf16, #tpu.memory_space<vmem>>, vector<128x512xbf16>
    %cst_64 = arith.constant dense<0.000000e+00> : vector<8x512xf32>
    %129 = tpu.matmul %127, %128, %cst_64 {dimension_numbers = #tpu.dot_dimension_numbers<[1], [0], [0], [1], [0, 0, 1, 1], [], []>} : vector<8x128xbf16>, vector<128x512xbf16>, vector<8x512xf32> -> vector<8x512xf32>
    %130 = arith.addf %126, %129 : vector<8x512xf32>
    %131 = vector.extract_strided_slice %130 {offsets = [0, 0], sizes = [8, 384], strides = [1, 1]} : vector<8x512xf32> to vector<8x384xf32>
    %cst_65 = arith.constant 5.000000e-01 : f32
    %132 = vector.broadcast %cst_65 : f32 to vector<8x384xf32>
    %133 = arith.mulf %132, %131 : vector<8x384xf32>
    %134 = math.tanh %133 : vector<8x384xf32>
    %cst_66 = arith.constant 5.000000e-01 : f32
    %135 = vector.broadcast %cst_66 : f32 to vector<8x384xf32>
    %136 = arith.mulf %135, %134 : vector<8x384xf32>
    %cst_67 = arith.constant 5.000000e-01 : f32
    %137 = vector.broadcast %cst_67 : f32 to vector<8x384xf32>
    %138 = arith.addf %136, %137 : vector<8x384xf32>
    %139 = vector.extract_strided_slice %130 {offsets = [0, 384], sizes = [8, 128], strides = [1, 1]} : vector<8x512xf32> to vector<8x128xf32>
    %140 = math.tanh %139 : vector<8x128xf32>
    %141 = vector.extract_strided_slice %138 {offsets = [0, 0], sizes = [8, 128], strides = [1, 1]} : vector<8x384xf32> to vector<8x128xf32>
    %142 = vector.extract_strided_slice %138 {offsets = [0, 128], sizes = [8, 128], strides = [1, 1]} : vector<8x384xf32> to vector<8x128xf32>
    %143 = vector.extract_strided_slice %138 {offsets = [0, 256], sizes = [8, 128], strides = [1, 1]} : vector<8x384xf32> to vector<8x128xf32>
    %144 = arith.mulf %142, %94 : vector<8x128xf32>
    %145 = arith.mulf %141, %140 : vector<8x128xf32>
    %146 = arith.addf %144, %145 : vector<8x128xf32>
    %147 = math.tanh %146 : vector<8x128xf32>
    %148 = arith.mulf %143, %147 : vector<8x128xf32>
    %149 = arith.truncf %148 : vector<8x128xf32> to vector<8x128xbf16>
    %c0_68 = arith.constant 0 : index
    %c0_69 = arith.constant 0 : index
    %150 = vector.load %arg6[%c0_68, %c0_69] : memref<128x512xbf16, #tpu.memory_space<vmem>>, vector<128x512xbf16>
    %cst_70 = arith.constant dense<0.000000e+00> : vector<8x512xf32>
    %151 = tpu.matmul %149, %150, %cst_70 {dimension_numbers = #tpu.dot_dimension_numbers<[1], [0], [0], [1], [0, 0, 1, 1], [], []>} : vector<8x128xbf16>, vector<128x512xbf16>, vector<8x512xf32> -> vector<8x512xf32>
    %152 = arith.truncf %124 : vector<8x128xf32> to vector<8x128xbf16>
    %c0_71 = arith.constant 0 : index
    %c0_72 = arith.constant 0 : index
    %153 = vector.load %arg7[%c0_71, %c0_72] : memref<128x512xbf16, #tpu.memory_space<vmem>>, vector<128x512xbf16>
    %cst_73 = arith.constant dense<0.000000e+00> : vector<8x512xf32>
    %154 = tpu.matmul %152, %153, %cst_73 {dimension_numbers = #tpu.dot_dimension_numbers<[1], [0], [0], [1], [0, 0, 1, 1], [], []>} : vector<8x128xbf16>, vector<128x512xbf16>, vector<8x512xf32> -> vector<8x512xf32>
    %155 = arith.addf %151, %154 : vector<8x512xf32>
    %c0_74 = arith.constant 0 : index
    %c0_75 = arith.constant 0 : index
    %156 = vector.load %arg8[%c0_74, %c0_75] : memref<1x512xf32, #tpu.memory_space<vmem>>, vector<1x512xf32>
    %157 = vector.broadcast %156 : vector<1x512xf32> to vector<8x512xf32>
    %158 = arith.addf %155, %157 : vector<8x512xf32>
    %159 = vector.extract_strided_slice %158 {offsets = [0, 0], sizes = [8, 384], strides = [1, 1]} : vector<8x512xf32> to vector<8x384xf32>
    %cst_76 = arith.constant 5.000000e-01 : f32
    %160 = vector.broadcast %cst_76 : f32 to vector<8x384xf32>
    %161 = arith.mulf %160, %159 : vector<8x384xf32>
    %162 = math.tanh %161 : vector<8x384xf32>
    %cst_77 = arith.constant 5.000000e-01 : f32
    %163 = vector.broadcast %cst_77 : f32 to vector<8x384xf32>
    %164 = arith.mulf %163, %162 : vector<8x384xf32>
    %cst_78 = arith.constant 5.000000e-01 : f32
    %165 = vector.broadcast %cst_78 : f32 to vector<8x384xf32>
    %166 = arith.addf %164, %165 : vector<8x384xf32>
    %167 = vector.extract_strided_slice %158 {offsets = [0, 384], sizes = [8, 128], strides = [1, 1]} : vector<8x512xf32> to vector<8x128xf32>
    %168 = math.tanh %167 : vector<8x128xf32>
    %169 = vector.extract_strided_slice %166 {offsets = [0, 0], sizes = [8, 128], strides = [1, 1]} : vector<8x384xf32> to vector<8x128xf32>
    %170 = vector.extract_strided_slice %166 {offsets = [0, 128], sizes = [8, 128], strides = [1, 1]} : vector<8x384xf32> to vector<8x128xf32>
    %171 = vector.extract_strided_slice %166 {offsets = [0, 256], sizes = [8, 128], strides = [1, 1]} : vector<8x384xf32> to vector<8x128xf32>
    %172 = arith.mulf %170, %122 : vector<8x128xf32>
    %173 = arith.mulf %169, %168 : vector<8x128xf32>
    %174 = arith.addf %172, %173 : vector<8x128xf32>
    %175 = math.tanh %174 : vector<8x128xf32>
    %176 = arith.mulf %171, %175 : vector<8x128xf32>
    %c16_79 = arith.constant 16 : index
    %c0_80 = arith.constant 0 : index
    %177 = vector.load %arg15[%c16_79, %c0_80] : memref<64x128xf32, #tpu.memory_space<vmem>>, vector<8x128xf32>
    tpu.vector_store %arg15[%c16_79, %c0_80], %176 {strides = array<i32>} : memref<64x128xf32, #tpu.memory_space<vmem>>, vector<8x128xf32>,
    %c24 = arith.constant 24 : index
    %c0_81 = arith.constant 0 : index
    %178 = vector.load %arg14[%c24, %c0_81] : memref<64x512xf32, #tpu.memory_space<vmem>>, vector<8x512xf32>
    %179 = arith.truncf %148 : vector<8x128xf32> to vector<8x128xbf16>
    %c0_82 = arith.constant 0 : index
    %c0_83 = arith.constant 0 : index
    %180 = vector.load %arg4[%c0_82, %c0_83] : memref<128x512xbf16, #tpu.memory_space<vmem>>, vector<128x512xbf16>
    %cst_84 = arith.constant dense<0.000000e+00> : vector<8x512xf32>
    %181 = tpu.matmul %179, %180, %cst_84 {dimension_numbers = #tpu.dot_dimension_numbers<[1], [0], [0], [1], [0, 0, 1, 1], [], []>} : vector<8x128xbf16>, vector<128x512xbf16>, vector<8x512xf32> -> vector<8x512xf32>
    %182 = arith.addf %178, %181 : vector<8x512xf32>
    %183 = vector.extract_strided_slice %182 {offsets = [0, 0], sizes = [8, 384], strides = [1, 1]} : vector<8x512xf32> to vector<8x384xf32>
    %cst_85 = arith.constant 5.000000e-01 : f32
    %184 = vector.broadcast %cst_85 : f32 to vector<8x384xf32>
    %185 = arith.mulf %184, %183 : vector<8x384xf32>
    %186 = math.tanh %185 : vector<8x384xf32>
    %cst_86 = arith.constant 5.000000e-01 : f32
    %187 = vector.broadcast %cst_86 : f32 to vector<8x384xf32>
    %188 = arith.mulf %187, %186 : vector<8x384xf32>
    %cst_87 = arith.constant 5.000000e-01 : f32
    %189 = vector.broadcast %cst_87 : f32 to vector<8x384xf32>
    %190 = arith.addf %188, %189 : vector<8x384xf32>
    %191 = vector.extract_strided_slice %182 {offsets = [0, 384], sizes = [8, 128], strides = [1, 1]} : vector<8x512xf32> to vector<8x128xf32>
    %192 = math.tanh %191 : vector<8x128xf32>
    %193 = vector.extract_strided_slice %190 {offsets = [0, 0], sizes = [8, 128], strides = [1, 1]} : vector<8x384xf32> to vector<8x128xf32>
    %194 = vector.extract_strided_slice %190 {offsets = [0, 128], sizes = [8, 128], strides = [1, 1]} : vector<8x384xf32> to vector<8x128xf32>
    %195 = vector.extract_strided_slice %190 {offsets = [0, 256], sizes = [8, 128], strides = [1, 1]} : vector<8x384xf32> to vector<8x128xf32>
    %196 = arith.mulf %194, %146 : vector<8x128xf32>
    %197 = arith.mulf %193, %192 : vector<8x128xf32>
    %198 = arith.addf %196, %197 : vector<8x128xf32>
    %199 = math.tanh %198 : vector<8x128xf32>
    %200 = arith.mulf %195, %199 : vector<8x128xf32>
    %201 = arith.truncf %200 : vector<8x128xf32> to vector<8x128xbf16>
    %c0_88 = arith.constant 0 : index
    %c0_89 = arith.constant 0 : index
    %202 = vector.load %arg6[%c0_88, %c0_89] : memref<128x512xbf16, #tpu.memory_space<vmem>>, vector<128x512xbf16>
    %cst_90 = arith.constant dense<0.000000e+00> : vector<8x512xf32>
    %203 = tpu.matmul %201, %202, %cst_90 {dimension_numbers = #tpu.dot_dimension_numbers<[1], [0], [0], [1], [0, 0, 1, 1], [], []>} : vector<8x128xbf16>, vector<128x512xbf16>, vector<8x512xf32> -> vector<8x512xf32>
    %204 = arith.truncf %176 : vector<8x128xf32> to vector<8x128xbf16>
    %c0_91 = arith.constant 0 : index
    %c0_92 = arith.constant 0 : index
    %205 = vector.load %arg7[%c0_91, %c0_92] : memref<128x512xbf16, #tpu.memory_space<vmem>>, vector<128x512xbf16>
    %cst_93 = arith.constant dense<0.000000e+00> : vector<8x512xf32>
    %206 = tpu.matmul %204, %205, %cst_93 {dimension_numbers = #tpu.dot_dimension_numbers<[1], [0], [0], [1], [0, 0, 1, 1], [], []>} : vector<8x128xbf16>, vector<128x512xbf16>, vector<8x512xf32> -> vector<8x512xf32>
    %207 = arith.addf %203, %206 : vector<8x512xf32>
    %c0_94 = arith.constant 0 : index
    %c0_95 = arith.constant 0 : index
    %208 = vector.load %arg8[%c0_94, %c0_95] : memref<1x512xf32, #tpu.memory_space<vmem>>, vector<1x512xf32>
    %209 = vector.broadcast %208 : vector<1x512xf32> to vector<8x512xf32>
    %210 = arith.addf %207, %209 : vector<8x512xf32>
    %211 = vector.extract_strided_slice %210 {offsets = [0, 0], sizes = [8, 384], strides = [1, 1]} : vector<8x512xf32> to vector<8x384xf32>
    %cst_96 = arith.constant 5.000000e-01 : f32
    %212 = vector.broadcast %cst_96 : f32 to vector<8x384xf32>
    %213 = arith.mulf %212, %211 : vector<8x384xf32>
    %214 = math.tanh %213 : vector<8x384xf32>
    %cst_97 = arith.constant 5.000000e-01 : f32
    %215 = vector.broadcast %cst_97 : f32 to vector<8x384xf32>
    %216 = arith.mulf %215, %214 : vector<8x384xf32>
    %cst_98 = arith.constant 5.000000e-01 : f32
    %217 = vector.broadcast %cst_98 : f32 to vector<8x384xf32>
    %218 = arith.addf %216, %217 : vector<8x384xf32>
    %219 = vector.extract_strided_slice %210 {offsets = [0, 384], sizes = [8, 128], strides = [1, 1]} : vector<8x512xf32> to vector<8x128xf32>
    %220 = math.tanh %219 : vector<8x128xf32>
    %221 = vector.extract_strided_slice %218 {offsets = [0, 0], sizes = [8, 128], strides = [1, 1]} : vector<8x384xf32> to vector<8x128xf32>
    %222 = vector.extract_strided_slice %218 {offsets = [0, 128], sizes = [8, 128], strides = [1, 1]} : vector<8x384xf32> to vector<8x128xf32>
    %223 = vector.extract_strided_slice %218 {offsets = [0, 256], sizes = [8, 128], strides = [1, 1]} : vector<8x384xf32> to vector<8x128xf32>
    %224 = arith.mulf %222, %174 : vector<8x128xf32>
    %225 = arith.mulf %221, %220 : vector<8x128xf32>
    %226 = arith.addf %224, %225 : vector<8x128xf32>
    %227 = math.tanh %226 : vector<8x128xf32>
    %228 = arith.mulf %223, %227 : vector<8x128xf32>
    %c24_99 = arith.constant 24 : index
    %c0_100 = arith.constant 0 : index
    %229 = vector.load %arg15[%c24_99, %c0_100] : memref<64x128xf32, #tpu.memory_space<vmem>>, vector<8x128xf32>
    tpu.vector_store %arg15[%c24_99, %c0_100], %228 {strides = array<i32>} : memref<64x128xf32, #tpu.memory_space<vmem>>, vector<8x128xf32>,
    %c32 = arith.constant 32 : index
    %c0_101 = arith.constant 0 : index
    %230 = vector.load %arg14[%c32, %c0_101] : memref<64x512xf32, #tpu.memory_space<vmem>>, vector<8x512xf32>
    %231 = arith.truncf %200 : vector<8x128xf32> to vector<8x128xbf16>
    %c0_102 = arith.constant 0 : index
    %c0_103 = arith.constant 0 : index
    %232 = vector.load %arg4[%c0_102, %c0_103] : memref<128x512xbf16, #tpu.memory_space<vmem>>, vector<128x512xbf16>
    %cst_104 = arith.constant dense<0.000000e+00> : vector<8x512xf32>
    %233 = tpu.matmul %231, %232, %cst_104 {dimension_numbers = #tpu.dot_dimension_numbers<[1], [0], [0], [1], [0, 0, 1, 1], [], []>} : vector<8x128xbf16>, vector<128x512xbf16>, vector<8x512xf32> -> vector<8x512xf32>
    %234 = arith.addf %230, %233 : vector<8x512xf32>
    %235 = vector.extract_strided_slice %234 {offsets = [0, 0], sizes = [8, 384], strides = [1, 1]} : vector<8x512xf32> to vector<8x384xf32>
    %cst_105 = arith.constant 5.000000e-01 : f32
    %236 = vector.broadcast %cst_105 : f32 to vector<8x384xf32>
    %237 = arith.mulf %236, %235 : vector<8x384xf32>
    %238 = math.tanh %237 : vector<8x384xf32>
    %cst_106 = arith.constant 5.000000e-01 : f32
    %239 = vector.broadcast %cst_106 : f32 to vector<8x384xf32>
    %240 = arith.mulf %239, %238 : vector<8x384xf32>
    %cst_107 = arith.constant 5.000000e-01 : f32
    %241 = vector.broadcast %cst_107 : f32 to vector<8x384xf32>
    %242 = arith.addf %240, %241 : vector<8x384xf32>
    %243 = vector.extract_strided_slice %234 {offsets = [0, 384], sizes = [8, 128], strides = [1, 1]} : vector<8x512xf32> to vector<8x128xf32>
    %244 = math.tanh %243 : vector<8x128xf32>
    %245 = vector.extract_strided_slice %242 {offsets = [0, 0], sizes = [8, 128], strides = [1, 1]} : vector<8x384xf32> to vector<8x128xf32>
    %246 = vector.extract_strided_slice %242 {offsets = [0, 128], sizes = [8, 128], strides = [1, 1]} : vector<8x384xf32> to vector<8x128xf32>
    %247 = vector.extract_strided_slice %242 {offsets = [0, 256], sizes = [8, 128], strides = [1, 1]} : vector<8x384xf32> to vector<8x128xf32>
    %248 = arith.mulf %246, %198 : vector<8x128xf32>
    %249 = arith.mulf %245, %244 : vector<8x128xf32>
    %250 = arith.addf %248, %249 : vector<8x128xf32>
    %251 = math.tanh %250 : vector<8x128xf32>
    %252 = arith.mulf %247, %251 : vector<8x128xf32>
    %253 = arith.truncf %252 : vector<8x128xf32> to vector<8x128xbf16>
    %c0_108 = arith.constant 0 : index
    %c0_109 = arith.constant 0 : index
    %254 = vector.load %arg6[%c0_108, %c0_109] : memref<128x512xbf16, #tpu.memory_space<vmem>>, vector<128x512xbf16>
    %cst_110 = arith.constant dense<0.000000e+00> : vector<8x512xf32>
    %255 = tpu.matmul %253, %254, %cst_110 {dimension_numbers = #tpu.dot_dimension_numbers<[1], [0], [0], [1], [0, 0, 1, 1], [], []>} : vector<8x128xbf16>, vector<128x512xbf16>, vector<8x512xf32> -> vector<8x512xf32>
    %256 = arith.truncf %228 : vector<8x128xf32> to vector<8x128xbf16>
    %c0_111 = arith.constant 0 : index
    %c0_112 = arith.constant 0 : index
    %257 = vector.load %arg7[%c0_111, %c0_112] : memref<128x512xbf16, #tpu.memory_space<vmem>>, vector<128x512xbf16>
    %cst_113 = arith.constant dense<0.000000e+00> : vector<8x512xf32>
    %258 = tpu.matmul %256, %257, %cst_113 {dimension_numbers = #tpu.dot_dimension_numbers<[1], [0], [0], [1], [0, 0, 1, 1], [], []>} : vector<8x128xbf16>, vector<128x512xbf16>, vector<8x512xf32> -> vector<8x512xf32>
    %259 = arith.addf %255, %258 : vector<8x512xf32>
    %c0_114 = arith.constant 0 : index
    %c0_115 = arith.constant 0 : index
    %260 = vector.load %arg8[%c0_114, %c0_115] : memref<1x512xf32, #tpu.memory_space<vmem>>, vector<1x512xf32>
    %261 = vector.broadcast %260 : vector<1x512xf32> to vector<8x512xf32>
    %262 = arith.addf %259, %261 : vector<8x512xf32>
    %263 = vector.extract_strided_slice %262 {offsets = [0, 0], sizes = [8, 384], strides = [1, 1]} : vector<8x512xf32> to vector<8x384xf32>
    %cst_116 = arith.constant 5.000000e-01 : f32
    %264 = vector.broadcast %cst_116 : f32 to vector<8x384xf32>
    %265 = arith.mulf %264, %263 : vector<8x384xf32>
    %266 = math.tanh %265 : vector<8x384xf32>
    %cst_117 = arith.constant 5.000000e-01 : f32
    %267 = vector.broadcast %cst_117 : f32 to vector<8x384xf32>
    %268 = arith.mulf %267, %266 : vector<8x384xf32>
    %cst_118 = arith.constant 5.000000e-01 : f32
    %269 = vector.broadcast %cst_118 : f32 to vector<8x384xf32>
    %270 = arith.addf %268, %269 : vector<8x384xf32>
    %271 = vector.extract_strided_slice %262 {offsets = [0, 384], sizes = [8, 128], strides = [1, 1]} : vector<8x512xf32> to vector<8x128xf32>
    %272 = math.tanh %271 : vector<8x128xf32>
    %273 = vector.extract_strided_slice %270 {offsets = [0, 0], sizes = [8, 128], strides = [1, 1]} : vector<8x384xf32> to vector<8x128xf32>
    %274 = vector.extract_strided_slice %270 {offsets = [0, 128], sizes = [8, 128], strides = [1, 1]} : vector<8x384xf32> to vector<8x128xf32>
    %275 = vector.extract_strided_slice %270 {offsets = [0, 256], sizes = [8, 128], strides = [1, 1]} : vector<8x384xf32> to vector<8x128xf32>
    %276 = arith.mulf %274, %226 : vector<8x128xf32>
    %277 = arith.mulf %273, %272 : vector<8x128xf32>
    %278 = arith.addf %276, %277 : vector<8x128xf32>
    %279 = math.tanh %278 : vector<8x128xf32>
    %280 = arith.mulf %275, %279 : vector<8x128xf32>
    %c32_119 = arith.constant 32 : index
    %c0_120 = arith.constant 0 : index
    %281 = vector.load %arg15[%c32_119, %c0_120] : memref<64x128xf32, #tpu.memory_space<vmem>>, vector<8x128xf32>
    tpu.vector_store %arg15[%c32_119, %c0_120], %280 {strides = array<i32>} : memref<64x128xf32, #tpu.memory_space<vmem>>, vector<8x128xf32>,
    %c40 = arith.constant 40 : index
    %c0_121 = arith.constant 0 : index
    %282 = vector.load %arg14[%c40, %c0_121] : memref<64x512xf32, #tpu.memory_space<vmem>>, vector<8x512xf32>
    %283 = arith.truncf %252 : vector<8x128xf32> to vector<8x128xbf16>
    %c0_122 = arith.constant 0 : index
    %c0_123 = arith.constant 0 : index
    %284 = vector.load %arg4[%c0_122, %c0_123] : memref<128x512xbf16, #tpu.memory_space<vmem>>, vector<128x512xbf16>
    %cst_124 = arith.constant dense<0.000000e+00> : vector<8x512xf32>
    %285 = tpu.matmul %283, %284, %cst_124 {dimension_numbers = #tpu.dot_dimension_numbers<[1], [0], [0], [1], [0, 0, 1, 1], [], []>} : vector<8x128xbf16>, vector<128x512xbf16>, vector<8x512xf32> -> vector<8x512xf32>
    %286 = arith.addf %282, %285 : vector<8x512xf32>
    %287 = vector.extract_strided_slice %286 {offsets = [0, 0], sizes = [8, 384], strides = [1, 1]} : vector<8x512xf32> to vector<8x384xf32>
    %cst_125 = arith.constant 5.000000e-01 : f32
    %288 = vector.broadcast %cst_125 : f32 to vector<8x384xf32>
    %289 = arith.mulf %288, %287 : vector<8x384xf32>
    %290 = math.tanh %289 : vector<8x384xf32>
    %cst_126 = arith.constant 5.000000e-01 : f32
    %291 = vector.broadcast %cst_126 : f32 to vector<8x384xf32>
    %292 = arith.mulf %291, %290 : vector<8x384xf32>
    %cst_127 = arith.constant 5.000000e-01 : f32
    %293 = vector.broadcast %cst_127 : f32 to vector<8x384xf32>
    %294 = arith.addf %292, %293 : vector<8x384xf32>
    %295 = vector.extract_strided_slice %286 {offsets = [0, 384], sizes = [8, 128], strides = [1, 1]} : vector<8x512xf32> to vector<8x128xf32>
    %296 = math.tanh %295 : vector<8x128xf32>
    %297 = vector.extract_strided_slice %294 {offsets = [0, 0], sizes = [8, 128], strides = [1, 1]} : vector<8x384xf32> to vector<8x128xf32>
    %298 = vector.extract_strided_slice %294 {offsets = [0, 128], sizes = [8, 128], strides = [1, 1]} : vector<8x384xf32> to vector<8x128xf32>
    %299 = vector.extract_strided_slice %294 {offsets = [0, 256], sizes = [8, 128], strides = [1, 1]} : vector<8x384xf32> to vector<8x128xf32>
    %300 = arith.mulf %298, %250 : vector<8x128xf32>
    %301 = arith.mulf %297, %296 : vector<8x128xf32>
    %302 = arith.addf %300, %301 : vector<8x128xf32>
    %303 = math.tanh %302 : vector<8x128xf32>
    %304 = arith.mulf %299, %303 : vector<8x128xf32>
    %305 = arith.truncf %304 : vector<8x128xf32> to vector<8x128xbf16>
    %c0_128 = arith.constant 0 : index
    %c0_129 = arith.constant 0 : index
    %306 = vector.load %arg6[%c0_128, %c0_129] : memref<128x512xbf16, #tpu.memory_space<vmem>>, vector<128x512xbf16>
    %cst_130 = arith.constant dense<0.000000e+00> : vector<8x512xf32>
    %307 = tpu.matmul %305, %306, %cst_130 {dimension_numbers = #tpu.dot_dimension_numbers<[1], [0], [0], [1], [0, 0, 1, 1], [], []>} : vector<8x128xbf16>, vector<128x512xbf16>, vector<8x512xf32> -> vector<8x512xf32>
    %308 = arith.truncf %280 : vector<8x128xf32> to vector<8x128xbf16>
    %c0_131 = arith.constant 0 : index
    %c0_132 = arith.constant 0 : index
    %309 = vector.load %arg7[%c0_131, %c0_132] : memref<128x512xbf16, #tpu.memory_space<vmem>>, vector<128x512xbf16>
    %cst_133 = arith.constant dense<0.000000e+00> : vector<8x512xf32>
    %310 = tpu.matmul %308, %309, %cst_133 {dimension_numbers = #tpu.dot_dimension_numbers<[1], [0], [0], [1], [0, 0, 1, 1], [], []>} : vector<8x128xbf16>, vector<128x512xbf16>, vector<8x512xf32> -> vector<8x512xf32>
    %311 = arith.addf %307, %310 : vector<8x512xf32>
    %c0_134 = arith.constant 0 : index
    %c0_135 = arith.constant 0 : index
    %312 = vector.load %arg8[%c0_134, %c0_135] : memref<1x512xf32, #tpu.memory_space<vmem>>, vector<1x512xf32>
    %313 = vector.broadcast %312 : vector<1x512xf32> to vector<8x512xf32>
    %314 = arith.addf %311, %313 : vector<8x512xf32>
    %315 = vector.extract_strided_slice %314 {offsets = [0, 0], sizes = [8, 384], strides = [1, 1]} : vector<8x512xf32> to vector<8x384xf32>
    %cst_136 = arith.constant 5.000000e-01 : f32
    %316 = vector.broadcast %cst_136 : f32 to vector<8x384xf32>
    %317 = arith.mulf %316, %315 : vector<8x384xf32>
    %318 = math.tanh %317 : vector<8x384xf32>
    %cst_137 = arith.constant 5.000000e-01 : f32
    %319 = vector.broadcast %cst_137 : f32 to vector<8x384xf32>
    %320 = arith.mulf %319, %318 : vector<8x384xf32>
    %cst_138 = arith.constant 5.000000e-01 : f32
    %321 = vector.broadcast %cst_138 : f32 to vector<8x384xf32>
    %322 = arith.addf %320, %321 : vector<8x384xf32>
    %323 = vector.extract_strided_slice %314 {offsets = [0, 384], sizes = [8, 128], strides = [1, 1]} : vector<8x512xf32> to vector<8x128xf32>
    %324 = math.tanh %323 : vector<8x128xf32>
    %325 = vector.extract_strided_slice %322 {offsets = [0, 0], sizes = [8, 128], strides = [1, 1]} : vector<8x384xf32> to vector<8x128xf32>
    %326 = vector.extract_strided_slice %322 {offsets = [0, 128], sizes = [8, 128], strides = [1, 1]} : vector<8x384xf32> to vector<8x128xf32>
    %327 = vector.extract_strided_slice %322 {offsets = [0, 256], sizes = [8, 128], strides = [1, 1]} : vector<8x384xf32> to vector<8x128xf32>
    %328 = arith.mulf %326, %278 : vector<8x128xf32>
    %329 = arith.mulf %325, %324 : vector<8x128xf32>
    %330 = arith.addf %328, %329 : vector<8x128xf32>
    %331 = math.tanh %330 : vector<8x128xf32>
    %332 = arith.mulf %327, %331 : vector<8x128xf32>
    %c40_139 = arith.constant 40 : index
    %c0_140 = arith.constant 0 : index
    %333 = vector.load %arg15[%c40_139, %c0_140] : memref<64x128xf32, #tpu.memory_space<vmem>>, vector<8x128xf32>
    tpu.vector_store %arg15[%c40_139, %c0_140], %332 {strides = array<i32>} : memref<64x128xf32, #tpu.memory_space<vmem>>, vector<8x128xf32>,
    %c48 = arith.constant 48 : index
    %c0_141 = arith.constant 0 : index
    %334 = vector.load %arg14[%c48, %c0_141] : memref<64x512xf32, #tpu.memory_space<vmem>>, vector<8x512xf32>
    %335 = arith.truncf %304 : vector<8x128xf32> to vector<8x128xbf16>
    %c0_142 = arith.constant 0 : index
    %c0_143 = arith.constant 0 : index
    %336 = vector.load %arg4[%c0_142, %c0_143] : memref<128x512xbf16, #tpu.memory_space<vmem>>, vector<128x512xbf16>
    %cst_144 = arith.constant dense<0.000000e+00> : vector<8x512xf32>
    %337 = tpu.matmul %335, %336, %cst_144 {dimension_numbers = #tpu.dot_dimension_numbers<[1], [0], [0], [1], [0, 0, 1, 1], [], []>} : vector<8x128xbf16>, vector<128x512xbf16>, vector<8x512xf32> -> vector<8x512xf32>
    %338 = arith.addf %334, %337 : vector<8x512xf32>
    %339 = vector.extract_strided_slice %338 {offsets = [0, 0], sizes = [8, 384], strides = [1, 1]} : vector<8x512xf32> to vector<8x384xf32>
    %cst_145 = arith.constant 5.000000e-01 : f32
    %340 = vector.broadcast %cst_145 : f32 to vector<8x384xf32>
    %341 = arith.mulf %340, %339 : vector<8x384xf32>
    %342 = math.tanh %341 : vector<8x384xf32>
    %cst_146 = arith.constant 5.000000e-01 : f32
    %343 = vector.broadcast %cst_146 : f32 to vector<8x384xf32>
    %344 = arith.mulf %343, %342 : vector<8x384xf32>
    %cst_147 = arith.constant 5.000000e-01 : f32
    %345 = vector.broadcast %cst_147 : f32 to vector<8x384xf32>
    %346 = arith.addf %344, %345 : vector<8x384xf32>
    %347 = vector.extract_strided_slice %338 {offsets = [0, 384], sizes = [8, 128], strides = [1, 1]} : vector<8x512xf32> to vector<8x128xf32>
    %348 = math.tanh %347 : vector<8x128xf32>
    %349 = vector.extract_strided_slice %346 {offsets = [0, 0], sizes = [8, 128], strides = [1, 1]} : vector<8x384xf32> to vector<8x128xf32>
    %350 = vector.extract_strided_slice %346 {offsets = [0, 128], sizes = [8, 128], strides = [1, 1]} : vector<8x384xf32> to vector<8x128xf32>
    %351 = vector.extract_strided_slice %346 {offsets = [0, 256], sizes = [8, 128], strides = [1, 1]} : vector<8x384xf32> to vector<8x128xf32>
    %352 = arith.mulf %350, %302 : vector<8x128xf32>
    %353 = arith.mulf %349, %348 : vector<8x128xf32>
    %354 = arith.addf %352, %353 : vector<8x128xf32>
    %355 = math.tanh %354 : vector<8x128xf32>
    %356 = arith.mulf %351, %355 : vector<8x128xf32>
    %357 = arith.truncf %356 : vector<8x128xf32> to vector<8x128xbf16>
    %c0_148 = arith.constant 0 : index
    %c0_149 = arith.constant 0 : index
    %358 = vector.load %arg6[%c0_148, %c0_149] : memref<128x512xbf16, #tpu.memory_space<vmem>>, vector<128x512xbf16>
    %cst_150 = arith.constant dense<0.000000e+00> : vector<8x512xf32>
    %359 = tpu.matmul %357, %358, %cst_150 {dimension_numbers = #tpu.dot_dimension_numbers<[1], [0], [0], [1], [0, 0, 1, 1], [], []>} : vector<8x128xbf16>, vector<128x512xbf16>, vector<8x512xf32> -> vector<8x512xf32>
    %360 = arith.truncf %332 : vector<8x128xf32> to vector<8x128xbf16>
    %c0_151 = arith.constant 0 : index
    %c0_152 = arith.constant 0 : index
    %361 = vector.load %arg7[%c0_151, %c0_152] : memref<128x512xbf16, #tpu.memory_space<vmem>>, vector<128x512xbf16>
    %cst_153 = arith.constant dense<0.000000e+00> : vector<8x512xf32>
    %362 = tpu.matmul %360, %361, %cst_153 {dimension_numbers = #tpu.dot_dimension_numbers<[1], [0], [0], [1], [0, 0, 1, 1], [], []>} : vector<8x128xbf16>, vector<128x512xbf16>, vector<8x512xf32> -> vector<8x512xf32>
    %363 = arith.addf %359, %362 : vector<8x512xf32>
    %c0_154 = arith.constant 0 : index
    %c0_155 = arith.constant 0 : index
    %364 = vector.load %arg8[%c0_154, %c0_155] : memref<1x512xf32, #tpu.memory_space<vmem>>, vector<1x512xf32>
    %365 = vector.broadcast %364 : vector<1x512xf32> to vector<8x512xf32>
    %366 = arith.addf %363, %365 : vector<8x512xf32>
    %367 = vector.extract_strided_slice %366 {offsets = [0, 0], sizes = [8, 384], strides = [1, 1]} : vector<8x512xf32> to vector<8x384xf32>
    %cst_156 = arith.constant 5.000000e-01 : f32
    %368 = vector.broadcast %cst_156 : f32 to vector<8x384xf32>
    %369 = arith.mulf %368, %367 : vector<8x384xf32>
    %370 = math.tanh %369 : vector<8x384xf32>
    %cst_157 = arith.constant 5.000000e-01 : f32
    %371 = vector.broadcast %cst_157 : f32 to vector<8x384xf32>
    %372 = arith.mulf %371, %370 : vector<8x384xf32>
    %cst_158 = arith.constant 5.000000e-01 : f32
    %373 = vector.broadcast %cst_158 : f32 to vector<8x384xf32>
    %374 = arith.addf %372, %373 : vector<8x384xf32>
    %375 = vector.extract_strided_slice %366 {offsets = [0, 384], sizes = [8, 128], strides = [1, 1]} : vector<8x512xf32> to vector<8x128xf32>
    %376 = math.tanh %375 : vector<8x128xf32>
    %377 = vector.extract_strided_slice %374 {offsets = [0, 0], sizes = [8, 128], strides = [1, 1]} : vector<8x384xf32> to vector<8x128xf32>
    %378 = vector.extract_strided_slice %374 {offsets = [0, 128], sizes = [8, 128], strides = [1, 1]} : vector<8x384xf32> to vector<8x128xf32>
    %379 = vector.extract_strided_slice %374 {offsets = [0, 256], sizes = [8, 128], strides = [1, 1]} : vector<8x384xf32> to vector<8x128xf32>
    %380 = arith.mulf %378, %330 : vector<8x128xf32>
    %381 = arith.mulf %377, %376 : vector<8x128xf32>
    %382 = arith.addf %380, %381 : vector<8x128xf32>
    %383 = math.tanh %382 : vector<8x128xf32>
    %384 = arith.mulf %379, %383 : vector<8x128xf32>
    %c48_159 = arith.constant 48 : index
    %c0_160 = arith.constant 0 : index
    %385 = vector.load %arg15[%c48_159, %c0_160] : memref<64x128xf32, #tpu.memory_space<vmem>>, vector<8x128xf32>
    tpu.vector_store %arg15[%c48_159, %c0_160], %384 {strides = array<i32>} : memref<64x128xf32, #tpu.memory_space<vmem>>, vector<8x128xf32>,
    %c56 = arith.constant 56 : index
    %c0_161 = arith.constant 0 : index
    %386 = vector.load %arg14[%c56, %c0_161] : memref<64x512xf32, #tpu.memory_space<vmem>>, vector<8x512xf32>
    %387 = arith.truncf %356 : vector<8x128xf32> to vector<8x128xbf16>
    %c0_162 = arith.constant 0 : index
    %c0_163 = arith.constant 0 : index
    %388 = vector.load %arg4[%c0_162, %c0_163] : memref<128x512xbf16, #tpu.memory_space<vmem>>, vector<128x512xbf16>
    %cst_164 = arith.constant dense<0.000000e+00> : vector<8x512xf32>
    %389 = tpu.matmul %387, %388, %cst_164 {dimension_numbers = #tpu.dot_dimension_numbers<[1], [0], [0], [1], [0, 0, 1, 1], [], []>} : vector<8x128xbf16>, vector<128x512xbf16>, vector<8x512xf32> -> vector<8x512xf32>
    %390 = arith.addf %386, %389 : vector<8x512xf32>
    %391 = vector.extract_strided_slice %390 {offsets = [0, 0], sizes = [8, 384], strides = [1, 1]} : vector<8x512xf32> to vector<8x384xf32>
    %cst_165 = arith.constant 5.000000e-01 : f32
    %392 = vector.broadcast %cst_165 : f32 to vector<8x384xf32>
    %393 = arith.mulf %392, %391 : vector<8x384xf32>
    %394 = math.tanh %393 : vector<8x384xf32>
    %cst_166 = arith.constant 5.000000e-01 : f32
    %395 = vector.broadcast %cst_166 : f32 to vector<8x384xf32>
    %396 = arith.mulf %395, %394 : vector<8x384xf32>
    %cst_167 = arith.constant 5.000000e-01 : f32
    %397 = vector.broadcast %cst_167 : f32 to vector<8x384xf32>
    %398 = arith.addf %396, %397 : vector<8x384xf32>
    %399 = vector.extract_strided_slice %390 {offsets = [0, 384], sizes = [8, 128], strides = [1, 1]} : vector<8x512xf32> to vector<8x128xf32>
    %400 = math.tanh %399 : vector<8x128xf32>
    %401 = vector.extract_strided_slice %398 {offsets = [0, 0], sizes = [8, 128], strides = [1, 1]} : vector<8x384xf32> to vector<8x128xf32>
    %402 = vector.extract_strided_slice %398 {offsets = [0, 128], sizes = [8, 128], strides = [1, 1]} : vector<8x384xf32> to vector<8x128xf32>
    %403 = vector.extract_strided_slice %398 {offsets = [0, 256], sizes = [8, 128], strides = [1, 1]} : vector<8x384xf32> to vector<8x128xf32>
    %404 = arith.mulf %402, %354 : vector<8x128xf32>
    %405 = arith.mulf %401, %400 : vector<8x128xf32>
    %406 = arith.addf %404, %405 : vector<8x128xf32>
    %407 = math.tanh %406 : vector<8x128xf32>
    %408 = arith.mulf %403, %407 : vector<8x128xf32>
    %409 = arith.truncf %408 : vector<8x128xf32> to vector<8x128xbf16>
    %c0_168 = arith.constant 0 : index
    %c0_169 = arith.constant 0 : index
    %410 = vector.load %arg6[%c0_168, %c0_169] : memref<128x512xbf16, #tpu.memory_space<vmem>>, vector<128x512xbf16>
    %cst_170 = arith.constant dense<0.000000e+00> : vector<8x512xf32>
    %411 = tpu.matmul %409, %410, %cst_170 {dimension_numbers = #tpu.dot_dimension_numbers<[1], [0], [0], [1], [0, 0, 1, 1], [], []>} : vector<8x128xbf16>, vector<128x512xbf16>, vector<8x512xf32> -> vector<8x512xf32>
    %412 = arith.truncf %384 : vector<8x128xf32> to vector<8x128xbf16>
    %c0_171 = arith.constant 0 : index
    %c0_172 = arith.constant 0 : index
    %413 = vector.load %arg7[%c0_171, %c0_172] : memref<128x512xbf16, #tpu.memory_space<vmem>>, vector<128x512xbf16>
    %cst_173 = arith.constant dense<0.000000e+00> : vector<8x512xf32>
    %414 = tpu.matmul %412, %413, %cst_173 {dimension_numbers = #tpu.dot_dimension_numbers<[1], [0], [0], [1], [0, 0, 1, 1], [], []>} : vector<8x128xbf16>, vector<128x512xbf16>, vector<8x512xf32> -> vector<8x512xf32>
    %415 = arith.addf %411, %414 : vector<8x512xf32>
    %c0_174 = arith.constant 0 : index
    %c0_175 = arith.constant 0 : index
    %416 = vector.load %arg8[%c0_174, %c0_175] : memref<1x512xf32, #tpu.memory_space<vmem>>, vector<1x512xf32>
    %417 = vector.broadcast %416 : vector<1x512xf32> to vector<8x512xf32>
    %418 = arith.addf %415, %417 : vector<8x512xf32>
    %419 = vector.extract_strided_slice %418 {offsets = [0, 0], sizes = [8, 384], strides = [1, 1]} : vector<8x512xf32> to vector<8x384xf32>
    %cst_176 = arith.constant 5.000000e-01 : f32
    %420 = vector.broadcast %cst_176 : f32 to vector<8x384xf32>
    %421 = arith.mulf %420, %419 : vector<8x384xf32>
    %422 = math.tanh %421 : vector<8x384xf32>
    %cst_177 = arith.constant 5.000000e-01 : f32
    %423 = vector.broadcast %cst_177 : f32 to vector<8x384xf32>
    %424 = arith.mulf %423, %422 : vector<8x384xf32>
    %cst_178 = arith.constant 5.000000e-01 : f32
    %425 = vector.broadcast %cst_178 : f32 to vector<8x384xf32>
    %426 = arith.addf %424, %425 : vector<8x384xf32>
    %427 = vector.extract_strided_slice %418 {offsets = [0, 384], sizes = [8, 128], strides = [1, 1]} : vector<8x512xf32> to vector<8x128xf32>
    %428 = math.tanh %427 : vector<8x128xf32>
    %429 = vector.extract_strided_slice %426 {offsets = [0, 0], sizes = [8, 128], strides = [1, 1]} : vector<8x384xf32> to vector<8x128xf32>
    %430 = vector.extract_strided_slice %426 {offsets = [0, 128], sizes = [8, 128], strides = [1, 1]} : vector<8x384xf32> to vector<8x128xf32>
    %431 = vector.extract_strided_slice %426 {offsets = [0, 256], sizes = [8, 128], strides = [1, 1]} : vector<8x384xf32> to vector<8x128xf32>
    %432 = arith.mulf %430, %382 : vector<8x128xf32>
    %433 = arith.mulf %429, %428 : vector<8x128xf32>
    %434 = arith.addf %432, %433 : vector<8x128xf32>
    %435 = math.tanh %434 : vector<8x128xf32>
    %436 = arith.mulf %431, %435 : vector<8x128xf32>
    %c56_179 = arith.constant 56 : index
    %c0_180 = arith.constant 0 : index
    %437 = vector.load %arg15[%c56_179, %c0_180] : memref<64x128xf32, #tpu.memory_space<vmem>>, vector<8x128xf32>
    tpu.vector_store %arg15[%c56_179, %c0_180], %436 {strides = array<i32>} : memref<64x128xf32, #tpu.memory_space<vmem>>, vector<8x128xf32>,
    %c0_181 = arith.constant 0 : index
    %c0_182 = arith.constant 0 : index
    %438 = vector.load %arg15[%c0_181, %c0_182] : memref<64x128xf32, #tpu.memory_space<vmem>>, vector<64x128xf32>
    %439 = arith.truncf %438 : vector<64x128xf32> to vector<64x128xbf16>
    %c0_183 = arith.constant 0 : index
    %c0_184 = arith.constant 0 : index
    %440 = vector.load %arg9[%c0_183, %c0_184] : memref<128x256xbf16, #tpu.memory_space<vmem>>, vector<128x256xbf16>
    %cst_185 = arith.constant dense<0.000000e+00> : vector<64x256xf32>
    %441 = tpu.matmul %439, %440, %cst_185 {dimension_numbers = #tpu.dot_dimension_numbers<[1], [0], [0], [1], [0, 0, 1, 1], [], []>} : vector<64x128xbf16>, vector<128x256xbf16>, vector<64x256xf32> -> vector<64x256xf32>
    %c0_186 = arith.constant 0 : index
    %c0_187 = arith.constant 0 : index
    %442 = vector.load %arg10[%c0_186, %c0_187] : memref<1x256xf32, #tpu.memory_space<vmem>>, vector<1x256xf32>
    %443 = vector.broadcast %442 : vector<1x256xf32> to vector<64x256xf32>
    %444 = arith.addf %441, %443 : vector<64x256xf32>
    %445 = vector.extract_strided_slice %444 {offsets = [0, 0], sizes = [8, 256], strides = [1, 1]} : vector<64x256xf32> to vector<8x256xf32>
    %c0_188 = arith.constant 0 : index
    %c0_189 = arith.constant 0 : index
    %446 = vector.load %arg11[%c0_188, %c0_189] : memref<8x2048xf32, #tpu.memory_space<vmem>>, vector<8x256xf32>
    tpu.vector_store %arg11[%c0_188, %c0_189], %445 {strides = array<i32>} : memref<8x2048xf32, #tpu.memory_space<vmem>>, vector<8x256xf32>,
    %447 = vector.extract_strided_slice %444 {offsets = [8, 0], sizes = [8, 256], strides = [1, 1]} : vector<64x256xf32> to vector<8x256xf32>
    %c0_190 = arith.constant 0 : index
    %c256 = arith.constant 256 : index
    %448 = vector.load %arg11[%c0_190, %c256] : memref<8x2048xf32, #tpu.memory_space<vmem>>, vector<8x256xf32>
    tpu.vector_store %arg11[%c0_190, %c256], %447 {strides = array<i32>} : memref<8x2048xf32, #tpu.memory_space<vmem>>, vector<8x256xf32>,
    %449 = vector.extract_strided_slice %444 {offsets = [16, 0], sizes = [8, 256], strides = [1, 1]} : vector<64x256xf32> to vector<8x256xf32>
    %c0_191 = arith.constant 0 : index
    %c512 = arith.constant 512 : index
    %450 = vector.load %arg11[%c0_191, %c512] : memref<8x2048xf32, #tpu.memory_space<vmem>>, vector<8x256xf32>
    tpu.vector_store %arg11[%c0_191, %c512], %449 {strides = array<i32>} : memref<8x2048xf32, #tpu.memory_space<vmem>>, vector<8x256xf32>,
    %451 = vector.extract_strided_slice %444 {offsets = [24, 0], sizes = [8, 256], strides = [1, 1]} : vector<64x256xf32> to vector<8x256xf32>
    %c0_192 = arith.constant 0 : index
    %c768 = arith.constant 768 : index
    %452 = vector.load %arg11[%c0_192, %c768] : memref<8x2048xf32, #tpu.memory_space<vmem>>, vector<8x256xf32>
    tpu.vector_store %arg11[%c0_192, %c768], %451 {strides = array<i32>} : memref<8x2048xf32, #tpu.memory_space<vmem>>, vector<8x256xf32>,
    %453 = vector.extract_strided_slice %444 {offsets = [32, 0], sizes = [8, 256], strides = [1, 1]} : vector<64x256xf32> to vector<8x256xf32>
    %c0_193 = arith.constant 0 : index
    %c1024 = arith.constant 1024 : index
    %454 = vector.load %arg11[%c0_193, %c1024] : memref<8x2048xf32, #tpu.memory_space<vmem>>, vector<8x256xf32>
    tpu.vector_store %arg11[%c0_193, %c1024], %453 {strides = array<i32>} : memref<8x2048xf32, #tpu.memory_space<vmem>>, vector<8x256xf32>,
    %455 = vector.extract_strided_slice %444 {offsets = [40, 0], sizes = [8, 256], strides = [1, 1]} : vector<64x256xf32> to vector<8x256xf32>
    %c0_194 = arith.constant 0 : index
    %c1280 = arith.constant 1280 : index
    %456 = vector.load %arg11[%c0_194, %c1280] : memref<8x2048xf32, #tpu.memory_space<vmem>>, vector<8x256xf32>
    tpu.vector_store %arg11[%c0_194, %c1280], %455 {strides = array<i32>} : memref<8x2048xf32, #tpu.memory_space<vmem>>, vector<8x256xf32>,
    %457 = vector.extract_strided_slice %444 {offsets = [48, 0], sizes = [8, 256], strides = [1, 1]} : vector<64x256xf32> to vector<8x256xf32>
    %c0_195 = arith.constant 0 : index
    %c1536 = arith.constant 1536 : index
    %458 = vector.load %arg11[%c0_195, %c1536] : memref<8x2048xf32, #tpu.memory_space<vmem>>, vector<8x256xf32>
    tpu.vector_store %arg11[%c0_195, %c1536], %457 {strides = array<i32>} : memref<8x2048xf32, #tpu.memory_space<vmem>>, vector<8x256xf32>,
    %459 = vector.extract_strided_slice %444 {offsets = [56, 0], sizes = [8, 256], strides = [1, 1]} : vector<64x256xf32> to vector<8x256xf32>
    %c0_196 = arith.constant 0 : index
    %c1792 = arith.constant 1792 : index
    %460 = vector.load %arg11[%c0_196, %c1792] : memref<8x2048xf32, #tpu.memory_space<vmem>>, vector<8x256xf32>
    tpu.vector_store %arg11[%c0_196, %c1792], %459 {strides = array<i32>} : memref<8x2048xf32, #tpu.memory_space<vmem>>, vector<8x256xf32>,
    %c0_197 = arith.constant 0 : index
    %c0_198 = arith.constant 0 : index
    %c0_199 = arith.constant 0 : index
    %461 = vector.load %arg12[%c0_197, %c0_198, %c0_199] : memref<2x8x128xf32, #tpu.memory_space<vmem>>, vector<1x8x128xf32>
    %462 = vector.shape_cast %461 : vector<1x8x128xf32> to vector<8x128xf32>
    %463 = vector.shape_cast %408 : vector<8x128xf32> to vector<1x8x128xf32>
    tpu.vector_store %arg12[%c0_197, %c0_198, %c0_199], %463 {strides = array<i32>} : memref<2x8x128xf32, #tpu.memory_space<vmem>>, vector<1x8x128xf32>,
    %c0_200 = arith.constant 0 : index
    %c0_201 = arith.constant 0 : index
    %c0_202 = arith.constant 0 : index
    %464 = vector.load %arg13[%c0_200, %c0_201, %c0_202] : memref<2x8x128xf32, #tpu.memory_space<vmem>>, vector<1x8x128xf32>
    %465 = vector.shape_cast %464 : vector<1x8x128xf32> to vector<8x128xf32>
    %466 = vector.shape_cast %406 : vector<8x128xf32> to vector<1x8x128xf32>
    tpu.vector_store %arg13[%c0_200, %c0_201, %c0_202], %466 {strides = array<i32>} : memref<2x8x128xf32, #tpu.memory_space<vmem>>, vector<1x8x128xf32>,
    %c1_203 = arith.constant 1 : index
    %c0_204 = arith.constant 0 : index
    %c0_205 = arith.constant 0 : index
    %467 = vector.load %arg12[%c1_203, %c0_204, %c0_205] : memref<2x8x128xf32, #tpu.memory_space<vmem>>, vector<1x8x128xf32>
    %468 = vector.shape_cast %467 : vector<1x8x128xf32> to vector<8x128xf32>
    %469 = vector.shape_cast %436 : vector<8x128xf32> to vector<1x8x128xf32>
    tpu.vector_store %arg12[%c1_203, %c0_204, %c0_205], %469 {strides = array<i32>} : memref<2x8x128xf32, #tpu.memory_space<vmem>>, vector<1x8x128xf32>,
    %c1_206 = arith.constant 1 : index
    %c0_207 = arith.constant 0 : index
    %c0_208 = arith.constant 0 : index
    %470 = vector.load %arg13[%c1_206, %c0_207, %c0_208] : memref<2x8x128xf32, #tpu.memory_space<vmem>>, vector<1x8x128xf32>
    %471 = vector.shape_cast %470 : vector<1x8x128xf32> to vector<8x128xf32>
    %472 = vector.shape_cast %434 : vector<8x128xf32> to vector<1x8x128xf32>
    tpu.vector_store %arg13[%c1_206, %c0_207, %c0_208], %472 {strides = array<i32>} : memref<2x8x128xf32, #tpu.memory_space<vmem>>, vector<1x8x128xf32>,
    return
  }
}

</mosaic_0001>

<bundles_post_ra>
// kernel: rnn_forward.1
= control target key start
LH: loop header
LB: loop body
LE: loop exit
PB: predicated region body
PF: predicated region fallthrough
CT: control target
= control target key end

     0   :  { %19 = vsyncpa [#allocation5], 0  ;;  %s12152_s0 = inlined_call_operand.vmem [shape: s32[64,1], index: 0, kind: input, shape index: {}]   ;;  %s12153_s1 = inlined_call_operand.vmem [shape: f32[2,8,128], index: 1, kind: input, shape index: {}]   ;;  %s12154_s2 = inlined_call_operand.vmem [shape: f32[2,8,128], index: 2, kind: input, shape index: {}]   ;;  %s12155_s3 = inlined_call_operand.hbm [shape: bf16[256,512], index: 3, kind: input, shape index: {}]   ;;  %s12156_s4 = inlined_call_operand.hbm [shape: bf16[128,512], index: 4, kind: input, shape index: {}]   ;;  %s12157_s5 = inlined_call_operand.vmem [shape: f32[1,512], index: 5, kind: input, shape index: {}]   ;;  %s12158_s6 = inlined_call_operand.hbm [shape: bf16[128,512], index: 6, kind: input, shape index: {}]   ;;  %s12159_s7 = inlined_call_operand.hbm [shape: bf16[128,512], index: 7, kind: input, shape index: {}]   ;;  %s12160_s8 = inlined_call_operand.vmem [shape: f32[1,512], index: 8, kind: input, shape index: {}]   ;;  %s12161_s9 = inlined_call_operand.vmem [shape: bf16[128,256], index: 9, kind: input, shape index: {}]   ;;  %s12162_s10 = inlined_call_operand.vmem [shape: f32[1,256], index: 10, kind: input, shape index: {}]   ;;  %s12163_s11 = inlined_call_operand.vmem [shape: f32[8,2048], index: 11, kind: output, shape index: {0}]   ;;  %s12164_s12 = inlined_call_operand.vmem [shape: f32[2,8,128], index: 12, kind: output, shape index: {1}]   ;;  %s12165_s13 = inlined_call_operand.vmem [shape: f32[2,8,128], index: 13, kind: output, shape index: {2}]  }
   0x1   :  { %20 = vsyncpa [#allocation7], 0 }
   0x2   :  { %21 = vsyncpa [#allocation10], 0  ;;  %s9994_s25 = smov [#allocation6]   ;;  %s9995_s27 = smov [#allocation4]  }
   0x3   :  { %s45_s26 = sshll.u32 %s9994_s25, 4  ;;  %s33_s28 = sshll.u32 %s9995_s27, 4  ;;  %s46_s26 = int_to_ptr.vmem [resolvable:$true] %s45_s26  ;;  %s34_s28 = int_to_ptr.vmem [resolvable:$true] %s33_s28 }
   0x4   :  { %s9916_s29 = scalar_lea.vmem %s46_s26, 4096  ;;  %p9921_p1 = scmp.lt.s32.totalorder %s46_s26, %s46_s26 }
   0x5   :  { %p9917_p0 = scmp.ne.s32.totalorder %s46_s26, %s9916_s29  ;;  %p9922_p2 = scmp.lt.s32.totalorder %s9916_s29, %s9916_s29 }
   0x7   :  { %p9923_p3 = por %p9922_p2, %p9921_p1 }
   0x9   :  { %p9924_p4 = pnand %p9923_p3, %p9917_p0 }
   0xb   :  { %9927 = shalt.err (!%p9924_p4)
}
   0xc   :  { %s9996_s30 = smov 256   ;;  %s9997_s14 = smov 16  }
   0xd   :  { %51 = dma.hbm_to_vmem [thread:$0]  %s12156_s4, 4096, %s46_s26, [#allocation7], %s9996_s30, %s9996_s30, %s9997_s14  }
   0xe   :  { %s9936_s17 = scalar_lea.vmem %s34_s28, 8192  ;;  %p9941_p6 = scmp.lt.s32.totalorder %s34_s28, %s34_s28 }
   0xf   :  { %p9937_p5 = scmp.ne.s32.totalorder %s34_s28, %s9936_s17  ;;  %p9942_p7 = scmp.lt.s32.totalorder %s9936_s17, %s9936_s17 }
  0x11   :  { %p9943_p8 = por %p9942_p7, %p9941_p6 }
  0x13   :  { %p9944_p9 = pnand %p9943_p8, %p9937_p5 }
  0x15   :  { %9947 = shalt.err (!%p9944_p9)
}
  0x16   :  { %39 = dma.hbm_to_vmem [thread:$0]  %s12155_s3, 8192, %s34_s28, [#allocation5], %s9996_s30, %s9996_s30, %s9997_s14  }
  0x17   :  { %s9998_s20 = smov [#allocation8]   ;;  %s9999_s22 = smov [#allocation9]  }
  0x18   :  { %s59_s21 = sshll.u32 %s9998_s20, 4  ;;  %s71_s23 = sshll.u32 %s9999_s22, 4  ;;  %s60_s21 = int_to_ptr.vmem [resolvable:$true] %s59_s21  ;;  %s72_s23 = int_to_ptr.vmem [resolvable:$true] %s71_s23 }
  0x19   :  { %s9956_s4 = scalar_lea.vmem %s60_s21, 4096  ;;  %p9961_p11 = scmp.lt.s32.totalorder %s60_s21, %s60_s21 }
  0x1a   :  { %p9957_p10 = scmp.ne.s32.totalorder %s60_s21, %s9956_s4  ;;  %p9962_p12 = scmp.lt.s32.totalorder %s9956_s4, %s9956_s4 }
  0x1c   :  { %p9963_p13 = por %p9962_p12, %p9961_p11 }
  0x1e   :  { %p9964_p0 = pnand %p9963_p13, %p9957_p10 }
  0x20   :  { %9967 = shalt.err (!%p9964_p0)
}
  0x21   :  { %65 = dma.hbm_to_vmem [thread:$0]  %s12158_s6, 4096, %s60_s21, [#allocation7], %s9996_s30, %s9996_s30, %s9997_s14  }
  0x22   :  { %s9976_s3 = scalar_lea.vmem %s72_s23, 4096  ;;  %p9981_p2 = scmp.lt.s32.totalorder %s72_s23, %s72_s23 }
  0x23   :  { %p9977_p1 = scmp.ne.s32.totalorder %s72_s23, %s9976_s3  ;;  %p9982_p3 = scmp.lt.s32.totalorder %s9976_s3, %s9976_s3 }
  0x25   :  { %p9983_p4 = por %p9982_p3, %p9981_p2 }
  0x27   :  { %p9984_p5 = pnand %p9983_p4, %p9977_p1 }
  0x29   :  { %9987 = shalt.err (!%p9984_p5)
}
  0x2a   :  { %77 = dma.hbm_to_vmem [thread:$0]  %s12159_s7, 4096, %s72_s23, [#allocation10], %s9996_s30, %s9996_s30, %s9997_s14  }
  0x2b   :  { %9988 = dma.done.wait [#allocation5], 8192  }
  0x2c   :  { %9989 = vsyncadd [#allocation5], 4294959104 }
  0x2d   :  { %9990 = dma.done.wait [#allocation7], 8192  }
  0x2e   :  { %9991 = vsyncadd [#allocation7], 4294959104 }
  0x2f   :  { %9992 = dma.done.wait [#allocation10], 4096  }
  0x30   :  { %9993 = vsyncadd [#allocation10], 4294963200  ;;  %v12169_v0 = vmov 0   ;;  %v99_v1 = vld [vmem:[%s12152_s0 + $0x10] sm:$0xff]  ;;  %v97_v2 = vld [vmem:[%s12152_s0] sm:$0xff] }
  0x31   :  { %9046 = vset.pattern.permute.xlu1 %v12169_v0  ;;  %9045 = vset.pattern.permute.xlu0 %v12169_v0  ;;  %v100_v3 = vld [vmem:[%s12152_s0 + $0x18] sm:$0xff]  ;;  %v98_v4 = vld [vmem:[%s12152_s0 + $0x8] sm:$0xff]  ;;  %v101_v7 = vld [vmem:[%s12152_s0 + $0x20] sm:$0xff] }
  0x32   :  { %115 = vperm.xlu1 %9046, %v99_v1   ;;  %109 = vperm.xlu0 %9045, %v97_v2   ;;  %v9047_v5 = vld [vmem:[#allocation4 + $0xec] ss:$16 sps:$4 sm:$0xff]   ;;  %v9049_v8 = vld [vmem:[#allocation4 + $0xe4] ss:$16 sps:$4 sm:$0xff]   ;;  %v9051_v9 = vld [vmem:[#allocation4 + $0xe8] ss:$16 sps:$4 sm:$0xff]  }
  0x33   :  { %v102_v6 = vld [vmem:[%s12152_s0 + $0x28] sm:$0xff]  ;;  %v9052_v10 = vld [vmem:[#allocation4 + $0xe0] ss:$16 sps:$4 sm:$0xff]   ;;  %651 = vmatprep.subr.bf16.mxu1 %v9047_v5  ;;  %578 = vmatprep.subr.bf16.mxu0 %v9049_v8  ;;  %v9055_v12 = vld [vmem:[#allocation4 + $0xc4] ss:$16 sps:$4 sm:$0xff]  }
  0x34   :  { %v9053_v11 = vld [vmem:[#allocation4 + $0xcc] ss:$16 sps:$4 sm:$0xff]   ;;  %652 = vmatpush1.bf16.msra.mxu1 %v9051_v9  ;;  %579 = vmatpush1.bf16.msra.mxu0 %v9052_v10  ;;  %v9057_v13 = vld [vmem:[#allocation4 + $0xc8] ss:$16 sps:$4 sm:$0xff]   ;;  %v9058_v14 = vld [vmem:[#allocation4 + $0xc0] ss:$16 sps:$4 sm:$0xff]  }
  0x35   :  { %v104_v15 = vld [vmem:[%s12152_s0 + $0x38] sm:$0xff]  ;;  %653 = vmatprep.subr.bf16.mxu1 %v9053_v11  ;;  %v9061_v17 = vld [vmem:[#allocation4 + $0xa4] ss:$16 sps:$4 sm:$0xff]   ;;  %580 = vmatprep.subr.bf16.mxu0 %v9055_v12  ;;  %v9064_v20 = vld [vmem:[#allocation4 + $0xa0] ss:$16 sps:$4 sm:$0xff]   ;;  %v12166_v11 = vlaneseq }
  0x36   :  { %118 = vperm.xlu1 %9046, %v100_v3   ;;  %112 = vperm.xlu0 %9045, %v98_v4   ;;  %v9059_v16 = vld [vmem:[#allocation4 + $0xac] ss:$16 sps:$4 sm:$0xff]   ;;  %v103_v18 = vld [vmem:[%s12152_s0 + $0x30] sm:$0xff]  ;;  %v9063_v19 = vld [vmem:[#allocation4 + $0xa8] ss:$16 sps:$4 sm:$0xff]  }
  0x37   :  { %v9065_v21 = vld [vmem:[#allocation4 + $0x8c] ss:$16 sps:$4 sm:$0xff]   ;;  %v9067_v22 = vld [vmem:[#allocation4 + $0x84] ss:$16 sps:$4 sm:$0xff]   ;;  %v9069_v23 = vld [vmem:[#allocation4 + $0x88] ss:$16 sps:$4 sm:$0xff]  }
  0x38   :  { %654 = vmatpush1.bf16.msra.mxu1 %v9057_v13  ;;  %581 = vmatpush1.bf16.msra.mxu0 %v9058_v14  ;;  %v9070_v24 = vld [vmem:[#allocation4 + $0x80] ss:$16 sps:$4 sm:$0xff]   ;;  %v9071_v25 = vld [vmem:[#allocation4 + $0x6c] ss:$16 sps:$4 sm:$0xff]   ;;  %v9073_v26 = vld [vmem:[#allocation4 + $0x64] ss:$16 sps:$4 sm:$0xff]  }
  0x39   :  { %655 = vmatprep.subr.bf16.mxu1 %v9059_v16  ;;  %582 = vmatprep.subr.bf16.mxu0 %v9061_v17  ;;  %v9075_v27 = vld [vmem:[#allocation4 + $0x68] ss:$16 sps:$4 sm:$0xff]   ;;  %v9076_v28 = vld [vmem:[#allocation4 + $0x60] ss:$16 sps:$4 sm:$0xff]   ;;  %v9077_v29 = vld [vmem:[#allocation4 + $0x4c] ss:$16 sps:$4 sm:$0xff]  }
  0x3a   :  { %124 = vperm.xlu1 %9046, %v102_v6   ;;  %121 = vperm.xlu0 %9045, %v101_v7   ;;  %v9079_v30 = vld [vmem:[#allocation4 + $0x44] ss:$16 sps:$4 sm:$0xff]   ;;  %v9081_v31 = vld [vmem:[#allocation4 + $0x48] ss:$16 sps:$4 sm:$0xff]   ;;  %v9082_v32 = vld [vmem:[#allocation4 + $0x40] ss:$16 sps:$4 sm:$0xff]  }
  0x3b   :  { %v9083_v33 = vld [vmem:[#allocation4 + $0x2c] ss:$16 sps:$4 sm:$0xff]   ;;  %v9085_v34 = vld [vmem:[#allocation4 + $0x24] ss:$16 sps:$4 sm:$0xff]   ;;  %v9087_v35 = vld [vmem:[#allocation4 + $0x28] ss:$16 sps:$4 sm:$0xff]  }
  0x3c   :  { %656 = vmatpush1.bf16.msra.mxu1 %v9063_v19  ;;  %583 = vmatpush1.bf16.msra.mxu0 %v9064_v20  ;;  %v9088_v36 = vld [vmem:[#allocation4 + $0x20] ss:$16 sps:$4 sm:$0xff]   ;;  %v9089_v37 = vld [vmem:[#allocation4 + $0xc] ss:$16 sps:$4 sm:$0xff]   ;;  %v9091_v38 = vld [vmem:[#allocation4 + $0x4] ss:$16 sps:$4 sm:$0xff]  }
  0x3d   :  { %657 = vmatprep.subr.bf16.mxu1 %v9065_v21  ;;  %584 = vmatprep.subr.bf16.mxu0 %v9067_v22  ;;  %v9093_v39 = vld [vmem:[#allocation4 + $0x8] ss:$16 sps:$4 sm:$0xff]   ;;  %v9094_v40 = vld [vmem:[#allocation4] ss:$16 sps:$4 sm:$0xff]   ;;  %v9095_v41 = vld [vmem:[#allocation4 + $0x1ec] ss:$16 sps:$4 sm:$0xff]  }
  0x3e   :  { %130 = vperm.xlu1 %9046, %v104_v15   ;;  %127 = vperm.xlu0 %9045, %v103_v18   ;;  %v9097_v42 = vld [vmem:[#allocation4 + $0x1e4] ss:$16 sps:$4 sm:$0xff]   ;;  %v9099_v43 = vld [vmem:[#allocation4 + $0x1e8] ss:$16 sps:$4 sm:$0xff]   ;;  %v9100_v44 = vld [vmem:[#allocation4 + $0x1e0] ss:$16 sps:$4 sm:$0xff]  }
  0x3f   :  { %v9101_v45 = vld [vmem:[#allocation4 + $0x1cc] ss:$16 sps:$4 sm:$0xff]   ;;  %v9103_v46 = vld [vmem:[#allocation4 + $0x1c4] ss:$16 sps:$4 sm:$0xff]   ;;  %v9105_v47 = vld [vmem:[#allocation4 + $0x1c8] ss:$16 sps:$4 sm:$0xff]  }
  0x40   :  { %658 = vmatpush1.bf16.msra.mxu1 %v9069_v23  ;;  %585 = vmatpush1.bf16.msra.mxu0 %v9070_v24  ;;  %v9106_v48 = vld [vmem:[#allocation4 + $0x1c0] ss:$16 sps:$4 sm:$0xff]   ;;  %v9107_v49 = vld [vmem:[#allocation4 + $0x1ac] ss:$16 sps:$4 sm:$0xff]   ;;  %v9109_v50 = vld [vmem:[#allocation4 + $0x1a4] ss:$16 sps:$4 sm:$0xff]  }
  0x41   :  { %659 = vmatprep.subr.bf16.mxu1 %v9071_v25  ;;  %586 = vmatprep.subr.bf16.mxu0 %v9073_v26  ;;  %v9111_v51 = vld [vmem:[#allocation4 + $0x1a8] ss:$16 sps:$4 sm:$0xff]   ;;  %v9112_v52 = vld [vmem:[#allocation4 + $0x1a0] ss:$16 sps:$4 sm:$0xff]   ;;  %v9113_v53 = vld [vmem:[#allocation4 + $0x18c] ss:$16 sps:$4 sm:$0xff]  }
  0x42   :  { %v9115_v54 = vld [vmem:[#allocation4 + $0x184] ss:$16 sps:$4 sm:$0xff]   ;;  %v9117_v55 = vld [vmem:[#allocation4 + $0x188] ss:$16 sps:$4 sm:$0xff]   ;;  %v9118_v56 = vld [vmem:[#allocation4 + $0x180] ss:$16 sps:$4 sm:$0xff]  }
  0x43   :  { %v9119_v57 = vld [vmem:[#allocation4 + $0x16c] ss:$16 sps:$4 sm:$0xff]   ;;  %v9121_v58 = vld [vmem:[#allocation4 + $0x164] ss:$16 sps:$4 sm:$0xff]   ;;  %v9123_v59 = vld [vmem:[#allocation4 + $0x168] ss:$16 sps:$4 sm:$0xff]  }
  0x44   :  { %660 = vmatpush1.bf16.msra.mxu1 %v9075_v27  ;;  %587 = vmatpush1.bf16.msra.mxu0 %v9076_v28  ;;  %v9124_v60 = vld [vmem:[#allocation4 + $0x160] ss:$16 sps:$4 sm:$0xff]   ;;  %v9125_v61 = vld [vmem:[#allocation4 + $0x14c] ss:$16 sps:$4 sm:$0xff]   ;;  %v9127_v62 = vld [vmem:[#allocation4 + $0x144] ss:$16 sps:$4 sm:$0xff]  }
  0x45   :  { %661 = vmatprep.subr.bf16.mxu1 %v9077_v29  ;;  %588 = vmatprep.subr.bf16.mxu0 %v9079_v30  ;;  %v9129_v63 = vld [vmem:[#allocation4 + $0x148] ss:$16 sps:$4 sm:$0xff]   ;;  %v9130_v1 = vld [vmem:[#allocation4 + $0x140] ss:$16 sps:$4 sm:$0xff]   ;;  %v9131_v2 = vld [vmem:[#allocation4 + $0x12c] ss:$16 sps:$4 sm:$0xff]  }
  0x46   :  { %v9133_v3 = vld [vmem:[#allocation4 + $0x124] ss:$16 sps:$4 sm:$0xff]   ;;  %v9135_v4 = vld [vmem:[#allocation4 + $0x128] ss:$16 sps:$4 sm:$0xff]   ;;  %v9136_v5 = vld [vmem:[#allocation4 + $0x120] ss:$16 sps:$4 sm:$0xff]  }
  0x47   :  { %v9137_v6 = vld [vmem:[#allocation4 + $0x10c] ss:$16 sps:$4 sm:$0xff]   ;;  %v9139_v7 = vld [vmem:[#allocation4 + $0x104] ss:$16 sps:$4 sm:$0xff]   ;;  %v9141_v8 = vld [vmem:[#allocation4 + $0x108] ss:$16 sps:$4 sm:$0xff]  }
  0x48   :  { %662 = vmatpush1.bf16.msra.mxu1 %v9081_v31  ;;  %589 = vmatpush1.bf16.msra.mxu0 %v9082_v32  ;;  %v9142_v9 = vld [vmem:[#allocation4 + $0x100] ss:$16 sps:$4 sm:$0xff]   ;;  %v9145_v10 = vld [vmem:[#allocation6 + $0xe4] ss:$16 sps:$4 sm:$0xff]   ;;  %v106_v12 = vand.u32 127, %v12166_v11  ;;  %v8249_v30 = vld [vmem:[%s12153_s1 + $0x8] sm:$0xff] }
  0x49   :  { %663 = vmatprep.subr.bf16.mxu1 %v9083_v33  ;;  %590 = vmatprep.subr.bf16.mxu0 %v9085_v34  ;;  %v9143_v18 = vld [vmem:[#allocation6 + $0xe0] ss:$16 sps:$4 sm:$0xff]   ;;  %v9148_v20 = vld [vmem:[#allocation6 + $0xc4] ss:$16 sps:$4 sm:$0xff]   ;;  %v10001_v23 = vmov 1.0|1.0   ;;  %v1096_v32 = vpack.c.bf16 %v8249_v30, %v8249_v30 }
  0x4a   :  { %v107_v15 = vadd.s32 128, %v106_v12  ;;  %v9146_v24 = vld [vmem:[#allocation6 + $0xc0] ss:$16 sps:$4 sm:$0xff]   ;;  %v9151_v25 = vld [vmem:[#allocation6 + $0xa4] ss:$16 sps:$4 sm:$0xff]  }
  0x4b   :  { %v10131_v28 = vld [vmem:[#allocation6 + $0xa0] ss:$16 sps:$4 sm:$0xff]   ;;  %v10133_v29 = vld [vmem:[#allocation6 + $0x84] ss:$16 sps:$4 sm:$0xff]   ;;  %v10303_v19 = vld [vmem:[#allocation9 + $0x68] ss:$16 sps:$4 sm:$0xff]  }
  0x4c   :  { %664 = vmatpush1.bf16.msra.mxu1 %v9087_v35  ;;  %591 = vmatpush1.bf16.msra.mxu0 %v9088_v36  ;;  %v10139_v31 = vld [vmem:[#allocation6 + $0x80] ss:$16 sps:$4 sm:$0xff]   ;;  %v10145_v33 = vld [vmem:[#allocation6 + $0x64] ss:$16 sps:$4 sm:$0xff]   ;;  %12382 = vst [vmem:[#allocation21_spill] sm:$0xff] %v10303_v19 }
  0x4d   :  { %665 = vmatprep.subr.bf16.mxu1 %v9089_v37  ;;  %592 = vmatprep.subr.bf16.mxu0 %v9091_v38  ;;  %v10149_v34 = vld [vmem:[#allocation6 + $0x60] ss:$16 sps:$4 sm:$0xff]   ;;  %v10151_v35 = vld [vmem:[#allocation6 + $0x44] ss:$16 sps:$4 sm:$0xff]   ;;  %v10336_v36 = vld [vmem:[#allocation9 + $0xc] ss:$16 sps:$4 sm:$0xff]  }
  0x4e   :  { %v10159_v37 = vld [vmem:[#allocation6 + $0x40] ss:$16 sps:$4 sm:$0xff]   ;;  %v10165_v38 = vld [vmem:[#allocation6 + $0x24] ss:$16 sps:$4 sm:$0xff]   ;;  %12391 = vst [vmem:[#allocation30_spill] sm:$0xff] %v10336_v36 }
  0x4f   :  { %v10345_v11 = vld [vmem:[#allocation8 + $0xec] ss:$16 sps:$4 sm:$0xff]   ;;  %v10355_v30 = vld [vmem:[#allocation8 + $0xc4] ss:$16 sps:$4 sm:$0xff]  }
  0x50   :  { %666 = vmatpush1.bf16.msra.mxu1 %v9093_v39  ;;  %593 = vmatpush1.bf16.msra.mxu0 %v9094_v40  ;;  %v10173_v39 = vld [vmem:[#allocation6 + $0x20] ss:$16 sps:$4 sm:$0xff]   ;;  %v10175_v40 = vld [vmem:[#allocation6 + $0x4] ss:$16 sps:$4 sm:$0xff]   ;;  %12394 = vst [vmem:[#allocation33_spill] sm:$0xff] %v10345_v11  ;;  %12397 = vst [vmem:[#allocation36_spill] sm:$0xff] %v10355_v30 }
  0x51   :  { %667 = vmatprep.subr.bf16.mxu1 %v9095_v41  ;;  %594 = vmatprep.subr.bf16.mxu0 %v9097_v42  ;;  %v10179_v41 = vld [vmem:[#allocation6] ss:$16 sps:$4 sm:$0xff]  }
  0x52   :  { %v756_v42 = vld [vmem:[%s12153_s1] sm:$0xff] }
  0x54   :  { %668 = vmatpush2.bf16.msra.mxu1 %v9099_v43  ;;  %595 = vmatpush2.bf16.msra.mxu0 %v9100_v44  ;;  %v10188_v43 = vld [vmem:[#allocation6 + $0xec] ss:$16 sps:$4 sm:$0xff]   ;;  %v10194_v44 = vld [vmem:[#allocation6 + $0xe8] ss:$16 sps:$4 sm:$0xff]  }
  0x55   :  { %669 = vmatprep.subr.bf16.mxu1 %v9101_v45  ;;  %596 = vmatprep.subr.bf16.mxu0 %v9103_v46  ;;  %v766_v45 = vpack.c.bf16 %v756_v42, %v756_v42  ;;  %v10196_v46 = vld [vmem:[#allocation6 + $0xcc] ss:$16 sps:$4 sm:$0xff]   ;;  %v10338_v42 = vld [vmem:[#allocation9 + $0x8] ss:$16 sps:$4 sm:$0xff]  }
  0x56   :  { %12392 = vst [vmem:[#allocation31_spill] sm:$0xff] %v10338_v42 }
  0x58   :  { %670 = vmatpush2.bf16.msra.mxu1 %v9105_v47  ;;  %597 = vmatpush2.bf16.msra.mxu0 %v9106_v48  ;;  %v10200_v47 = vld [vmem:[#allocation6 + $0xc8] ss:$16 sps:$4 sm:$0xff]   ;;  %v10202_v48 = vld [vmem:[#allocation6 + $0xac] ss:$16 sps:$4 sm:$0xff]  }
  0x59   :  { %671 = vmatprep.subr.bf16.mxu1 %v9107_v49  ;;  %598 = vmatprep.subr.bf16.mxu0 %v9109_v50  ;;  %v10207_v49 = vld [vmem:[#allocation6 + $0xa8] ss:$16 sps:$4 sm:$0xff]   ;;  %v10209_v50 = vld [vmem:[#allocation6 + $0x8c] ss:$16 sps:$4 sm:$0xff]  }
  0x5c   :  { %672 = vmatpush2.bf16.msra.mxu1 %v9111_v51  ;;  %599 = vmatpush2.bf16.msra.mxu0 %v9112_v52  ;;  %v10213_v51 = vld [vmem:[#allocation6 + $0x88] ss:$16 sps:$4 sm:$0xff]   ;;  %v10215_v52 = vld [vmem:[#allocation6 + $0x6c] ss:$16 sps:$4 sm:$0xff]  }
  0x5d   :  { %673 = vmatprep.subr.bf16.mxu1 %v9113_v53  ;;  %600 = vmatprep.subr.bf16.mxu0 %v9115_v54  ;;  %v10219_v53 = vld [vmem:[#allocation6 + $0x68] ss:$16 sps:$4 sm:$0xff]   ;;  %v10221_v54 = vld [vmem:[#allocation6 + $0x4c] ss:$16 sps:$4 sm:$0xff]  }
  0x60   :  { %674 = vmatpush2.bf16.msra.mxu1 %v9117_v55  ;;  %601 = vmatpush2.bf16.msra.mxu0 %v9118_v56  ;;  %v10225_v55 = vld [vmem:[#allocation6 + $0x48] ss:$16 sps:$4 sm:$0xff]   ;;  %v10227_v56 = vld [vmem:[#allocation6 + $0x2c] ss:$16 sps:$4 sm:$0xff]  }
  0x61   :  { %675 = vmatprep.subr.bf16.mxu1 %v9119_v57  ;;  %602 = vmatprep.subr.bf16.mxu0 %v9121_v58  ;;  %v10231_v57 = vld [vmem:[#allocation6 + $0x28] ss:$16 sps:$4 sm:$0xff]   ;;  %v10233_v58 = vld [vmem:[#allocation6 + $0xc] ss:$16 sps:$4 sm:$0xff]  }
  0x64   :  { %676 = vmatpush2.bf16.msra.mxu1 %v9123_v59  ;;  %603 = vmatpush2.bf16.msra.mxu0 %v9124_v60  ;;  %v10238_v59 = vld [vmem:[#allocation6 + $0x8] ss:$16 sps:$4 sm:$0xff]   ;;  %v10243_v60 = vld [vmem:[#allocation9 + $0xe4] ss:$16 sps:$4 sm:$0xff]  }
  0x65   :  { %677 = vmatprep.subr.bf16.mxu1 %v9125_v61  ;;  %604 = vmatprep.subr.bf16.mxu0 %v9127_v62  ;;  %v10245_v61 = vld [vmem:[#allocation9 + $0xe0] ss:$16 sps:$4 sm:$0xff]   ;;  %v10249_v62 = vld [vmem:[#allocation9 + $0xc4] ss:$16 sps:$4 sm:$0xff]  }
  0x68   :  { %678 = vmatpush2.bf16.msra.mxu1 %v9129_v63  ;;  %605 = vmatpush2.bf16.msra.mxu0 %v9130_v1  ;;  %v10251_v63 = vld [vmem:[#allocation9 + $0xec] ss:$16 sps:$4 sm:$0xff]   ;;  %v10253_v1 = vld [vmem:[#allocation9 + $0xc0] ss:$16 sps:$4 sm:$0xff]  }
  0x69   :  { %679 = vmatprep.subr.bf16.mxu1 %v9131_v2  ;;  %606 = vmatprep.subr.bf16.mxu0 %v9133_v3  ;;  %v10255_v2 = vld [vmem:[#allocation9 + $0xe8] ss:$16 sps:$4 sm:$0xff]   ;;  %v10261_v3 = vld [vmem:[#allocation9 + $0xa4] ss:$16 sps:$4 sm:$0xff]  }
  0x6c   :  { %680 = vmatpush2.bf16.msra.mxu1 %v9135_v4  ;;  %607 = vmatpush2.bf16.msra.mxu0 %v9136_v5  ;;  %v10263_v4 = vld [vmem:[#allocation9 + $0xcc] ss:$16 sps:$4 sm:$0xff]   ;;  %v10265_v5 = vld [vmem:[#allocation9 + $0xa0] ss:$16 sps:$4 sm:$0xff]  }
  0x6d   :  { %681 = vmatprep.subr.bf16.mxu1 %v9137_v6  ;;  %608 = vmatprep.subr.bf16.mxu0 %v9139_v7  ;;  %v10267_v6 = vld [vmem:[#allocation9 + $0xc8] ss:$16 sps:$4 sm:$0xff]   ;;  %v10273_v7 = vld [vmem:[#allocation9 + $0x84] ss:$16 sps:$4 sm:$0xff]  }
  0x70   :  { %682 = vmatpush2.bf16.msra.mxu1 %v9141_v8  ;;  %609 = vmatpush2.bf16.msra.mxu0 %v9142_v9  ;;  %v10275_v8 = vld [vmem:[#allocation9 + $0xac] ss:$16 sps:$4 sm:$0xff]   ;;  %v10277_v9 = vld [vmem:[#allocation9 + $0x80] ss:$16 sps:$4 sm:$0xff]  }
  0x71   :  { %959 = vmatprep.subr.bf16.mxu1 %v9145_v10  ;;  %1289 = vmatprep.subr.bf16.mxu0 %v10243_v60  ;;  %12375 = vst [vmem:[#allocation14_spill] sm:$0xff] %v10277_v9  ;;  %v10279_v10 = vld [vmem:[#allocation9 + $0xa8] ss:$16 sps:$4 sm:$0xff]  }
  0xad   :  { %v116_v13 = vpop.permute.xlu1 %115  ;;  %v110_v14 = vpop.permute.xlu0 %109 }
  0xae   :  { %vm137_vm0 = vcmp.eq.s32.totalorder %v116_v13, %v107_v15  ;;  %vm132_vm4 = vcmp.eq.s32.totalorder %v110_v14, %v106_v12  ;;  %vm133_vm7 = vcmp.eq.s32.totalorder %v110_v14, %v107_v15  ;;  %vm136_vm9 = vcmp.eq.s32.totalorder %v116_v13, %v106_v12  ;;  %v10287_v13 = vld [vmem:[#allocation9 + $0x8c] ss:$16 sps:$4 sm:$0xff]   ;;  %v10289_v14 = vld [vmem:[#allocation9 + $0x60] ss:$16 sps:$4 sm:$0xff]  }
  0xaf   :  { %12377 = vst [vmem:[#allocation16_spill] sm:$0xff] %v10289_v14 }
  0xb1   :  { %v119_v16 = vpop.permute.xlu1 %118  ;;  %v113_v17 = vpop.permute.xlu0 %112 }
  0xb2   :  { %vm139_vm1 = vcmp.eq.s32.totalorder %v119_v16, %v107_v15  ;;  %vm134_vm2 = vcmp.eq.s32.totalorder %v113_v17, %v106_v12  ;;  %vm135_vm3 = vcmp.eq.s32.totalorder %v113_v17, %v107_v15  ;;  %vm138_vm10 = vcmp.eq.s32.totalorder %v119_v16, %v106_v12  ;;  %v10297_v16 = vld [vmem:[#allocation9 + $0x44] ss:$16 sps:$4 sm:$0xff]   ;;  %v10299_v17 = vld [vmem:[#allocation9 + $0x6c] ss:$16 sps:$4 sm:$0xff]  }
  0xb3   :  { %vm10123_vm5 = vmpackc.low %vm139_vm1, %vm137_vm0  ;;  %12379 = vst [vmem:[#allocation18_spill] sm:$0xff] %v10297_v16 }
  0xb4   :  { %vm8219_vm6 = vmpackc.low %vm134_vm2, %vm132_vm4  ;;  %12380 = vst [vmem:[#allocation19_spill] sm:$0xff] %v10299_v17 }
  0xb5   :  { %v125_v21 = vpop.permute.xlu1 %124  ;;  %v122_v22 = vpop.permute.xlu0 %121  ;;  %vm8217_vm8 = vmpackc.low %vm135_vm3, %vm133_vm7 }
  0xb6   :  { %8218 = vmatprep.mubr.msk.bf16.mxu0 %vm8217_vm8, %v10001_v23  ;;  %8234 = vmatprep.mubr.msk.bf16.mxu1 %vm8217_vm8, %v10001_v23  ;;  %vm143_vm11 = vcmp.eq.s32.totalorder %v125_v21, %v107_v15  ;;  %vm141_vm12 = vcmp.eq.s32.totalorder %v122_v22, %v107_v15  ;;  %vm8223_vm13 = vmpackc.low %vm138_vm10, %vm136_vm9  ;;  %vm142_vm14 = vcmp.eq.s32.totalorder %v125_v21, %v106_v12  ;;  %v10311_v21 = vld [vmem:[#allocation9 + $0x24] ss:$16 sps:$4 sm:$0xff]  }
  0xb7   :  { %8220 = vmatmul.mubr.msk.bf16.vlgmr.msra.gmra.mxu0 %vm8219_vm6, %v10001_v23  ;;  %8236 = vmatmul.mubr.msk.bf16.vlgmr.msra.gmra.mxu1 %vm8219_vm6, %v10001_v23  ;;  %vm140_vm15 = vcmp.eq.s32.totalorder %v122_v22, %v106_v12  ;;  %vm8225_vm0 = vmpackc.low %vm143_vm11, %vm141_vm12  ;;  %12384 = vst [vmem:[#allocation23_spill] sm:$0xff] %v10311_v21  ;;  %v10313_v22 = vld [vmem:[#allocation9 + $0x48] ss:$16 sps:$4 sm:$0xff]  }
  0xb8   :  { %960 = vmatpush1.bf16.msra.mxu1 %v9143_v18  ;;  %8222 = vmatprep.mubr.msk.bf16.mxu0 %vm10123_vm5, %v10001_v23  ;;  %vm10135_vm3 = vmpackc.low %vm142_vm14, %vm140_vm15  ;;  %v10301_v18 = vld [vmem:[#allocation9 + $0x40] ss:$16 sps:$4 sm:$0xff]   ;;  %12385 = vst [vmem:[#allocation24_spill] sm:$0xff] %v10313_v22 }
  0xb9   :  { %8238 = vmatprep.mubr.msk.bf16.mxu1 %vm10123_vm5, %v10001_v23  ;;  %961 = vmatprep.subr.bf16.mxu1 %v9148_v20  ;;  %v131_v26 = vpop.permute.xlu1 %130  ;;  %v128_v27 = vpop.permute.xlu0 %127  ;;  %12381 = vst [vmem:[#allocation20_spill] sm:$0xff] %v10301_v18  ;;  %v10309_v20 = vld [vmem:[#allocation9 + $0x20] ss:$16 sps:$4 sm:$0xff]  }
  0xba   :  { %vm147_vm1 = vcmp.eq.s32.totalorder %v131_v26, %v107_v15  ;;  %vm145_vm2 = vcmp.eq.s32.totalorder %v128_v27, %v107_v15  ;;  %vm146_vm5 = vcmp.eq.s32.totalorder %v131_v26, %v106_v12  ;;  %vm144_vm6 = vcmp.eq.s32.totalorder %v128_v27, %v106_v12  ;;  %1290 = vmatpush1.bf16.msra.mxu0 %v10245_v61  ;;  %v10285_v12 = vld [vmem:[#allocation9 + $0x64] ss:$16 sps:$4 sm:$0xff]   ;;  %v10291_v15 = vld [vmem:[#allocation9 + $0x88] ss:$16 sps:$4 sm:$0xff]   ;;  %v10325_v26 = vld [vmem:[#allocation9] ss:$16 sps:$4 sm:$0xff]  }
  0xbb   :  { %vm10141_vm4 = vmpackc.low %vm147_vm1, %vm145_vm2  ;;  %1291 = vmatprep.subr.bf16.mxu0 %v10249_v62  ;;  %12376 = vst [vmem:[#allocation15_spill] sm:$0xff] %v10285_v12  ;;  %v10327_v27 = vld [vmem:[#allocation9 + $0x28] ss:$16 sps:$4 sm:$0xff]  }
  0xbc   :  { %962 = vmatpush1.bf16.msra.mxu1 %v9146_v24  ;;  %vm10155_vm7 = vmpackc.low %vm146_vm5, %vm144_vm6  ;;  %12378 = vst [vmem:[#allocation17_spill] sm:$0xff] %v10291_v15  ;;  %v10321_v24 = vld [vmem:[#allocation9 + $0x4] ss:$16 sps:$4 sm:$0xff]  }
  0xbd   :  { %963 = vmatprep.subr.bf16.mxu1 %v9151_v25  ;;  %12383 = vst [vmem:[#allocation22_spill] sm:$0xff] %v10309_v20  ;;  %12387 = vst [vmem:[#allocation26_spill] sm:$0xff] %v10321_v24  ;;  %v10323_v25 = vld [vmem:[#allocation9 + $0x2c] ss:$16 sps:$4 sm:$0xff]  }
  0xbe   :  { %1292 = vmatpush1.bf16.msra.mxu0 %v10253_v1  ;;  %12388 = vst [vmem:[#allocation27_spill] sm:$0xff] %v10323_v25  ;;  %12389 = vst [vmem:[#allocation28_spill] sm:$0xff] %v10325_v26 }
  0xbf   :  { %8224 = vmatmul.mubr.msk.bf16.gmra.mxu0 %vm8223_vm13, %v10001_v23  ;;  %8240 = vmatmul.mubr.msk.bf16.gmra.mxu1 %vm8223_vm13, %v10001_v23  ;;  %12390 = vst [vmem:[#allocation29_spill] sm:$0xff] %v10327_v27 }
  0xc0   :  { %964 = vmatpush1.bf16.msra.mxu1 %v10131_v28  ;;  %8226 = vmatprep.mubr.msk.bf16.mxu0 %vm8225_vm0, %v10001_v23 }
  0xc1   :  { %8242 = vmatprep.mubr.msk.bf16.mxu1 %vm8225_vm0, %v10001_v23  ;;  %965 = vmatprep.subr.bf16.mxu1 %v10133_v29 }
  0xc2   :  { %1293 = vmatprep.subr.bf16.mxu0 %v10261_v3 }
  0xc3   :  { %1294 = vmatpush1.bf16.msra.mxu0 %v10265_v5 }
  0xc4   :  { %966 = vmatpush1.bf16.msra.mxu1 %v10139_v31  ;;  %1295 = vmatprep.subr.bf16.mxu0 %v10273_v7 }
  0xc5   :  { %967 = vmatprep.subr.bf16.mxu1 %v10145_v33 }
  0xc7   :  { %8228 = vmatmul.mubr.msk.bf16.gmra.mxu0 %vm10135_vm3, %v10001_v23  ;;  %8244 = vmatmul.mubr.msk.bf16.gmra.mxu1 %vm10135_vm3, %v10001_v23 }
  0xc8   :  { %968 = vmatpush1.bf16.msra.mxu1 %v10149_v34  ;;  %8230 = vmatprep.mubr.msk.bf16.mxu0 %vm10141_vm4, %v10001_v23 }
  0xc9   :  { %8246 = vmatprep.mubr.msk.bf16.mxu1 %vm10141_vm4, %v10001_v23  ;;  %969 = vmatprep.subr.bf16.mxu1 %v10151_v35 }
  0xca   :  { %1296 = vmatpush1.bf16.msra.mxu0 %v10277_v9 }
  0xcb   :  { %1297 = vmatprep.subr.bf16.mxu0 %v10285_v12 }
  0xcc   :  { %970 = vmatpush1.bf16.msra.mxu1 %v10159_v37 }
  0xcd   :  { %971 = vmatprep.subr.bf16.mxu1 %v10165_v38 }
  0xce   :  { %1298 = vmatpush1.bf16.msra.mxu0 %v10289_v14 }
  0xcf   :  { %8232 = vmatmul.mubr.msk.bf16.gmra.mxu0 %vm10155_vm7, %v10001_v23  ;;  %8248 = vmatmul.mubr.msk.bf16.gmra.mxu1 %vm10155_vm7, %v10001_v23  ;;  %v10315_v23 = vld [vmem:[#allocation9 + $0x4c] ss:$16 sps:$4 sm:$0xff]  }
  0xd0   :  { %972 = vmatpush1.bf16.msra.mxu1 %v10173_v39  ;;  %991 = vmatprep.mubr.bf16.mxu1 %v12169_v0  ;;  %12386 = vst [vmem:[#allocation25_spill] sm:$0xff] %v10315_v23 }
  0xd1   :  { %973 = vmatprep.subr.bf16.mxu1 %v10175_v40  ;;  %1321 = vmatprep.mubr.bf16.mxu0 %v12169_v0 }
  0xd2   :  { %1299 = vmatprep.subr.bf16.mxu0 %v10297_v16 }
  0xd3   :  { %1300 = vmatpush1.bf16.msra.mxu0 %v10301_v18 }
  0xd4   :  { %974 = vmatpush1.bf16.msra.mxu1 %v10179_v41  ;;  %1301 = vmatprep.subr.bf16.mxu0 %v10311_v21 }
  0xd5   :  { %1000 = vmatprep.subr.bf16.mxu1 %v10188_v43 }
  0xd7   :  { %992 = vmatmul.mubr.bf16.vlgmr.msra.gmra.mxu1 %v766_v45  ;;  %1302 = vmatpush1.bf16.msra.mxu0 %v10309_v20 }
  0xd8   :  { %1001 = vmatpush1.bf16.msra.mxu1 %v10194_v44  ;;  %1032 = vmatprep.mubr.bf16.mxu1 %v12169_v0 }
  0xd9   :  { %1002 = vmatprep.subr.bf16.mxu1 %v10196_v46  ;;  %1303 = vmatprep.subr.bf16.mxu0 %v10321_v24  ;;  %v10349_v24 = vld [vmem:[#allocation8 + $0xe8] ss:$16 sps:$4 sm:$0xff]  }
  0xda   :  { %12396 = vst [vmem:[#allocation35_spill] sm:$0xff] %v10349_v24 }
  0xdb   :  { %1304 = vmatpush1.bf16.msra.mxu0 %v10325_v26  ;;  %v10347_v26 = vld [vmem:[#allocation8 + $0xe0] ss:$16 sps:$4 sm:$0xff]  }
  0xdc   :  { %1003 = vmatpush1.bf16.msra.mxu1 %v10200_v47  ;;  %12395 = vst [vmem:[#allocation34_spill] sm:$0xff] %v10347_v26 }
  0xdd   :  { %1004 = vmatprep.subr.bf16.mxu1 %v10202_v48 }
  0xde   :  { %1322 = vmatmul.mubr.bf16.vlgmr.msra.gmra.mxu0 %v1096_v32 }
  0xdf   :  { %1563 = vmatprep.mubr.bf16.mxu0 %v12169_v0 }
  0xe0   :  { %1005 = vmatpush1.bf16.msra.mxu1 %v10207_v49 }
  0xe1   :  { %1006 = vmatprep.subr.bf16.mxu1 %v10209_v50 }
  0xe4   :  { %1007 = vmatpush1.bf16.msra.mxu1 %v10213_v51 }
  0xe5   :  { %1008 = vmatprep.subr.bf16.mxu1 %v10215_v52 }
  0xe8   :  { %1009 = vmatpush1.bf16.msra.mxu1 %v10219_v53 }
  0xe9   :  { %1010 = vmatprep.subr.bf16.mxu1 %v10221_v54 }
  0xec   :  { %1011 = vmatpush1.bf16.msra.mxu1 %v10225_v55 }
  0xed   :  { %1012 = vmatprep.subr.bf16.mxu1 %v10227_v56 }
  0xf0   :  { %1013 = vmatpush1.bf16.msra.mxu1 %v10231_v57 }
  0xf1   :  { %1014 = vmatprep.subr.bf16.mxu1 %v10233_v58 }
  0xf4   :  { %1015 = vmatpush1.bf16.msra.mxu1 %v10238_v59 }
  0xf5   :  { %1330 = vmatprep.subr.bf16.mxu1 %v10251_v63 }
  0xf7   :  { %1033 = vmatmul.mubr.bf16.vlgmr.msra.gmra.mxu1 %v766_v45  ;;  %v10343_v45 = vld [vmem:[#allocation8 + $0xe4] ss:$16 sps:$4 sm:$0xff]  }
  0xf8   :  { %1362 = vmatprep.mubr.bf16.mxu1 %v12169_v0  ;;  %1331 = vmatpush1.bf16.msra.mxu1 %v10255_v2  ;;  %12393 = vst [vmem:[#allocation32_spill] sm:$0xff] %v10343_v45  ;;  %v10357_v0 = vld [vmem:[#allocation8 + $0xcc] ss:$16 sps:$4 sm:$0xff]  }
  0xf9   :  { %1332 = vmatprep.subr.bf16.mxu1 %v10263_v4  ;;  %1531 = vmatprep.subr.bf16.mxu0 %v10343_v45  ;;  %12398 = vst [vmem:[#allocation37_spill] sm:$0xff] %v10357_v0  ;;  %v10402_v45 = vld [vmem:[#allocation8 + $0x44] ss:$16 sps:$4 sm:$0xff]  }
  0xfa   :  { %1532 = vmatpush1.bf16.msra.mxu0 %v10347_v26  ;;  %v10372_v26 = vld [vmem:[#allocation8 + $0xa0] ss:$16 sps:$4 sm:$0xff]   ;;  %12414 = vst [vmem:[#allocation52_spill] sm:$0xff] %v10402_v45 }
  0xfb   :  { %1533 = vmatprep.subr.bf16.mxu0 %v10355_v30  ;;  %12404 = vst [vmem:[#allocation42_spill] sm:$0xff] %v10372_v26  ;;  %v10386_v30 = vld [vmem:[#allocation8 + $0x88] ss:$16 sps:$4 sm:$0xff]  }
  0xfc   :  { %1333 = vmatpush1.bf16.msra.mxu1 %v10267_v6  ;;  %12409 = vst [vmem:[#allocation47_spill] sm:$0xff] %v10386_v30 }
  0xfd   :  { %1334 = vmatprep.subr.bf16.mxu1 %v10275_v8 }
 0x100   :  { %1335 = vmatpush1.bf16.msra.mxu1 %v10279_v10 }
 0x101   :  { %1336 = vmatprep.subr.bf16.mxu1 %v10287_v13 }
 0x104   :  { %1337 = vmatpush1.bf16.msra.mxu1 %v10291_v15 }
 0x105   :  { %1338 = vmatprep.subr.bf16.mxu1 %v10299_v17 }
 0x108   :  { %1339 = vmatpush1.bf16.msra.mxu1 %v10303_v19 }
 0x109   :  { %1340 = vmatprep.subr.bf16.mxu1 %v10315_v23 }
 0x10c   :  { %1341 = vmatpush1.bf16.msra.mxu1 %v10313_v22 }
 0x10d   :  { %1342 = vmatprep.subr.bf16.mxu1 %v10323_v25 }
 0x110   :  { %1343 = vmatpush1.bf16.msra.mxu1 %v10327_v27  ;;  %v10362_v27 = vld [vmem:[#allocation8 + $0xc8] ss:$16 sps:$4 sm:$0xff]  }
 0x111   :  { %1344 = vmatprep.subr.bf16.mxu1 %v10336_v36  ;;  %v10360_v36 = vld [vmem:[#allocation8 + $0xc0] ss:$16 sps:$4 sm:$0xff]   ;;  %12401 = vst [vmem:[#allocation39_spill] sm:$0xff] %v10362_v27 }
 0x112   :  { %12400 = vst [vmem:[#allocation38_spill] sm:$0xff] %v10360_v36  ;;  %1534 = vmatpush1.bf16.msra.mxu0 %v10360_v36  ;;  %v10382_v36 = vld [vmem:[#allocation8 + $0x8c] ss:$16 sps:$4 sm:$0xff]  }
 0x113   :  { %12407 = vst [vmem:[#allocation45_spill] sm:$0xff] %v10382_v36 }
 0x114   :  { %1345 = vmatpush1.bf16.msra.mxu1 %v10338_v42  ;;  %v12399_v42 = vmov 0  }
 0x115   :  { %1572 = vmatprep.subr.bf16.mxu1 %v10345_v11  ;;  %v10374_v11 = vld [vmem:[#allocation8 + $0xa8] ss:$16 sps:$4 sm:$0xff]  }
 0x116   :  { %12405 = vst [vmem:[#allocation43_spill] sm:$0xff] %v10374_v11 }
 0x117   :  { %1363 = vmatmul.mubr.bf16.vlgmr.msra.gmra.mxu1 %v1096_v32  ;;  %v10368_v32 = vld [vmem:[#allocation8 + $0xa4] ss:$16 sps:$4 sm:$0xff]  }
 0x118   :  { %1573 = vmatpush1.bf16.msra.mxu1 %v10349_v24  ;;  %1604 = vmatprep.mubr.bf16.mxu1 %v12399_v42  ;;  %12402 = vst [vmem:[#allocation40_spill] sm:$0xff] %v10368_v32  ;;  %v10370_v24 = vld [vmem:[#allocation8 + $0xac] ss:$16 sps:$4 sm:$0xff]  }
 0x119   :  { %1574 = vmatprep.subr.bf16.mxu1 %v10357_v0  ;;  %12403 = vst [vmem:[#allocation41_spill] sm:$0xff] %v10370_v24  ;;  %1535 = vmatprep.subr.bf16.mxu0 %v10368_v32  ;;  %v10380_v0 = vld [vmem:[#allocation8 + $0x84] ss:$16 sps:$4 sm:$0xff]   ;;  %v10398_v32 = vld [vmem:[#allocation8 + $0x68] ss:$16 sps:$4 sm:$0xff]  }
 0x11a   :  { %1536 = vmatpush1.bf16.msra.mxu0 %v10372_v26  ;;  %12406 = vst [vmem:[#allocation44_spill] sm:$0xff] %v10380_v0  ;;  %v10394_v26 = vld [vmem:[#allocation8 + $0x6c] ss:$16 sps:$4 sm:$0xff]   ;;  %12413 = vst [vmem:[#allocation51_spill] sm:$0xff] %v10398_v32 }
 0x11b   :  { %1537 = vmatprep.subr.bf16.mxu0 %v10380_v0  ;;  %12411 = vst [vmem:[#allocation49_spill] sm:$0xff] %v10394_v26  ;;  %v10404_v0 = vld [vmem:[#allocation8 + $0x4c] ss:$16 sps:$4 sm:$0xff]  }
 0x11c   :  { %1575 = vmatpush1.bf16.msra.mxu1 %v10362_v27  ;;  %v10384_v27 = vld [vmem:[#allocation8 + $0x80] ss:$16 sps:$4 sm:$0xff]   ;;  %12415 = vst [vmem:[#allocation53_spill] sm:$0xff] %v10404_v0 }
 0x11d   :  { %1576 = vmatprep.subr.bf16.mxu1 %v10370_v24  ;;  %12408 = vst [vmem:[#allocation46_spill] sm:$0xff] %v10384_v27  ;;  %v10392_v24 = vld [vmem:[#allocation8 + $0x64] ss:$16 sps:$4 sm:$0xff]  }
 0x11e   :  { %1538 = vmatpush1.bf16.msra.mxu0 %v10384_v27  ;;  %12410 = vst [vmem:[#allocation48_spill] sm:$0xff] %v10392_v24  ;;  %v10407_v27 = vld [vmem:[#allocation8 + $0x40] ss:$16 sps:$4 sm:$0xff]  }
 0x11f   :  { %1539 = vmatprep.subr.bf16.mxu0 %v10392_v24  ;;  %12416 = vst [vmem:[#allocation54_spill] sm:$0xff] %v10407_v27  ;;  %v10416_v24 = vld [vmem:[#allocation8 + $0x2c] ss:$16 sps:$4 sm:$0xff]  }
 0x120   :  { %1577 = vmatpush1.bf16.msra.mxu1 %v10374_v11  ;;  %v10396_v11 = vld [vmem:[#allocation8 + $0x60] ss:$16 sps:$4 sm:$0xff]   ;;  %12419 = vst [vmem:[#allocation57_spill] sm:$0xff] %v10416_v24 }
 0x121   :  { %1578 = vmatprep.subr.bf16.mxu1 %v10382_v36  ;;  %12412 = vst [vmem:[#allocation50_spill] sm:$0xff] %v10396_v11  ;;  %v10413_v36 = vld [vmem:[#allocation8 + $0x24] ss:$16 sps:$4 sm:$0xff]  }
 0x122   :  { %1540 = vmatpush1.bf16.msra.mxu0 %v10396_v11  ;;  %12418 = vst [vmem:[#allocation56_spill] sm:$0xff] %v10413_v36  ;;  %v10423_v11 = vld [vmem:[#allocation8 + $0x28] ss:$16 sps:$4 sm:$0xff]  }
 0x123   :  { %1541 = vmatprep.subr.bf16.mxu0 %v10402_v45  ;;  %12421 = vst [vmem:[#allocation59_spill] sm:$0xff] %v10423_v11  ;;  %v10428_v45 = vld [vmem:[#allocation8 + $0xc] ss:$16 sps:$4 sm:$0xff]  }
 0x124   :  { %1579 = vmatpush1.bf16.msra.mxu1 %v10386_v30  ;;  %v10411_v30 = vld [vmem:[#allocation8 + $0x48] ss:$16 sps:$4 sm:$0xff]   ;;  %12423 = vst [vmem:[#allocation61_spill] sm:$0xff] %v10428_v45 }
 0x125   :  { %1580 = vmatprep.subr.bf16.mxu1 %v10394_v26  ;;  %12417 = vst [vmem:[#allocation55_spill] sm:$0xff] %v10411_v30  ;;  %v10419_v26 = vld [vmem:[#allocation8 + $0x20] ss:$16 sps:$4 sm:$0xff]  }
 0x126   :  { %1542 = vmatpush1.bf16.msra.mxu0 %v10407_v27  ;;  %12420 = vst [vmem:[#allocation58_spill] sm:$0xff] %v10419_v26  ;;  %v10435_v27 = vld [vmem:[#allocation8 + $0x8] ss:$16 sps:$4 sm:$0xff]  }
 0x127   :  { %1543 = vmatprep.subr.bf16.mxu0 %v10413_v36  ;;  %12425 = vst [vmem:[#allocation63_spill] sm:$0xff] %v10435_v27  ;;  %v9903_v36 = vld [vmem:[#allocation6 + $0xe4] ss:$16 sps:$4 sm:$0xff]  }
 0x128   :  { %1581 = vmatpush1.bf16.msra.mxu1 %v10398_v32  ;;  %v10425_v32 = vld [vmem:[#allocation8 + $0x4] ss:$16 sps:$4 sm:$0xff]  }
 0x129   :  { %1582 = vmatprep.subr.bf16.mxu1 %v10404_v0  ;;  %12422 = vst [vmem:[#allocation60_spill] sm:$0xff] %v10425_v32  ;;  %v10431_v0 = vld [vmem:[#allocation8] ss:$16 sps:$4 sm:$0xff]  }
 0x12a   :  { %1544 = vmatpush1.bf16.msra.mxu0 %v10419_v26  ;;  %12424 = vst [vmem:[#allocation62_spill] sm:$0xff] %v10431_v0 }
 0x12b   :  { %1545 = vmatprep.subr.bf16.mxu0 %v10425_v32  ;;  %v236_v32 = vld [vmem:[%s12157_s5] sm:$0xf] }
 0x12c   :  { %1583 = vmatpush1.bf16.msra.mxu1 %v10411_v30 }
 0x12d   :  { %1584 = vmatprep.subr.bf16.mxu1 %v10416_v24  ;;  %v12426_v24 = vlaneseq }
 0x12e   :  { %1546 = vmatpush1.bf16.msra.mxu0 %v10431_v0 }
 0x12f   :  { %1854 = vmatprep.subr.bf16.mxu0 %v9903_v36  ;;  %v239_v26 = vshrl.u32 %v12426_v24, 7 }
 0x130   :  { %1585 = vmatpush1.bf16.msra.mxu1 %v10423_v11 }
 0x131   :  { %1586 = vmatprep.subr.bf16.mxu1 %v10428_v45  ;;  %v10442_v30 = vsub.s32 0, %v239_v26  ;;  %v10444_v20 = vsub.s32 2, %v239_v26  ;;  %v10459_v21 = vsub.s32 1, %v239_v26  ;;  %v10461_v22 = vsub.s32 3, %v239_v26 }
 0x133   :  { %12427 = vst [vmem:[#allocation64_spill] sm:$0xff] %v10442_v30  ;;  %12428 = vst [vmem:[#allocation65_spill] sm:$0xff] %v10444_v20  ;;  %v241_v36 = vrot.slane %v236_v32, %v10442_v30  ;;  %v10476_v17 = vrot.slane %v236_v32, %v10461_v22 }
 0x134   :  { %1587 = vmatpush1.bf16.msra.mxu1 %v10435_v27  ;;  %12429 = vst [vmem:[#allocation66_spill] sm:$0xff] %v10459_v21  ;;  %12430 = vst [vmem:[#allocation67_spill] sm:$0xff] %v10461_v22 }
 0x135   :  { %1895 = vmatprep.subr.bf16.mxu1 %v10188_v43  ;;  %v10457_v43 = vrot.slane %v236_v32, %v10444_v20  ;;  %v10473_v20 = vrot.slane %v236_v32, %v10459_v21 }
 0x137   :  { %12435 = vst [vmem:[#allocation72_spill] sm:$0xff] %v10473_v20 }
 0x177   :  { %v10449_v11 = vpop.f32.mrf.mxu0  ;;  %v10451_v45 = vpop.f32.mrf.mxu1 }
 0x179   :  { %v614_v0 = vpop.f32.mrf.mxu0  ;;  %v10453_v27 = vpop.f32.mrf.mxu1 }
 0x17b   :  { %v616_v24 = vpop.f32.mrf.mxu0  ;;  %v689_v25 = vpop.f32.mrf.mxu1 }
 0x17c   :  { %v10463_v18 = vadd.f32 %v616_v24, %v241_v36  ;;  %v10466_v23 = vadd.f32 %v689_v25, %v10457_v43 }
 0x17d   :  { %v10468_v16 = vpop.f32.mrf.mxu0  ;;  %v10470_v19 = vpop.f32.mrf.mxu1 }
 0x17e   :  { %12431 = vst [vmem:[#allocation68_spill] sm:$0xff] %v10463_v18  ;;  %12432 = vst [vmem:[#allocation69_spill] sm:$0xff] %v10466_v23 }
 0x17f   :  { %12433 = vst [vmem:[#allocation70_spill] sm:$0xff] %v10468_v16  ;;  %12434 = vst [vmem:[#allocation71_spill] sm:$0xff] %v10470_v19  ;;  %v622_v14 = vpop.f32.mrf.mxu0  ;;  %v695_v30 = vpop.f32.mrf.mxu1 }
 0x180   :  { %v10478_v12 = vadd.f32 %v622_v14, %v241_v36  ;;  %v10481_v26 = vadd.f32 %v695_v30, %v10457_v43 }
 0x181   :  { %v624_v24 = vpop.f32.mrf.mxu0  ;;  %v697_v25 = vpop.f32.mrf.mxu1 }
 0x182   :  { %12436 = vst [vmem:[#allocation73_spill] sm:$0xff] %v10478_v12  ;;  %12437 = vst [vmem:[#allocation74_spill] sm:$0xff] %v10481_v26  ;;  %v10484_v23 = vadd.f32 %v624_v24, %v10473_v20  ;;  %v10487_v19 = vadd.f32 %v697_v25, %v10476_v17 }
 0x183   :  { %v626_v18 = vpop.f32.mrf.mxu0  ;;  %v699_v16 = vpop.f32.mrf.mxu1 }
 0x184   :  { %12438 = vst [vmem:[#allocation75_spill] sm:$0xff] %v10484_v23  ;;  %12439 = vst [vmem:[#allocation76_spill] sm:$0xff] %v10487_v19  ;;  %v10489_v21 = vadd.f32 %v626_v18, %v241_v36  ;;  %v10492_v32 = vadd.f32 %v699_v16, %v10457_v43 }
 0x185   :  { %v10494_v14 = vpop.f32.mrf.mxu0  ;;  %v701_v12 = vpop.f32.mrf.mxu1 }
 0x186   :  { %12440 = vst [vmem:[#allocation77_spill] sm:$0xff] %v10489_v21  ;;  %12441 = vst [vmem:[#allocation78_spill] sm:$0xff] %v10492_v32  ;;  %v10497_v30 = vadd.f32 %v701_v12, %v10476_v17 }
 0x187   :  { %12442 = vst [vmem:[#allocation79_spill] sm:$0xff] %v10494_v14  ;;  %v632_v26 = vpop.f32.mrf.mxu0  ;;  %v705_v22 = vpop.f32.mrf.mxu1 }
 0x188   :  { %12443 = vst [vmem:[#allocation80_spill] sm:$0xff] %v10497_v30  ;;  %v10499_v24 = vadd.f32 %v632_v26, %v241_v36  ;;  %v10502_v25 = vadd.f32 %v705_v22, %v10457_v43 }
 0x189   :  { %v634_v19 = vpop.f32.mrf.mxu0  ;;  %v707_v23 = vpop.f32.mrf.mxu1 }
 0x18a   :  { %12444 = vst [vmem:[#allocation81_spill] sm:$0xff] %v10499_v24  ;;  %12445 = vst [vmem:[#allocation82_spill] sm:$0xff] %v10502_v25  ;;  %v10505_v18 = vadd.f32 %v634_v19, %v10473_v20  ;;  %v10508_v16 = vadd.f32 %v707_v23, %v10476_v17 }
 0x18b   :  { %v636_v32 = vpop.f32.mrf.mxu0  ;;  %v709_v21 = vpop.f32.mrf.mxu1 }
 0x18c   :  { %12446 = vst [vmem:[#allocation83_spill] sm:$0xff] %v10505_v18  ;;  %12447 = vst [vmem:[#allocation84_spill] sm:$0xff] %v10508_v16  ;;  %v10510_v14 = vadd.f32 %v636_v32, %v241_v36  ;;  %v10513_v12 = vadd.f32 %v709_v21, %v10457_v43 }
 0x18d   :  { %v10515_v26 = vpop.f32.mrf.mxu0  ;;  %v711_v24 = vpop.f32.mrf.mxu1 }
 0x18e   :  { %12448 = vst [vmem:[#allocation85_spill] sm:$0xff] %v10510_v14  ;;  %12449 = vst [vmem:[#allocation86_spill] sm:$0xff] %v10513_v12  ;;  %v10518_v22 = vadd.f32 %v711_v24, %v10476_v17 }
 0x18f   :  { %12450 = vst [vmem:[#allocation87_spill] sm:$0xff] %v10515_v26  ;;  %v642_v25 = vpop.f32.mrf.mxu0  ;;  %v715_v30 = vpop.f32.mrf.mxu1 }
 0x190   :  { %12451 = vst [vmem:[#allocation88_spill] sm:$0xff] %v10518_v22  ;;  %v10520_v19 = vadd.f32 %v642_v25, %v241_v36  ;;  %v10523_v23 = vadd.f32 %v715_v30, %v10457_v43 }
 0x191   :  { %v644_v16 = vpop.f32.mrf.mxu0  ;;  %v717_v18 = vpop.f32.mrf.mxu1 }
 0x192   :  { %12452 = vst [vmem:[#allocation89_spill] sm:$0xff] %v10520_v19  ;;  %12453 = vst [vmem:[#allocation90_spill] sm:$0xff] %v10523_v23  ;;  %v10526_v32 = vadd.f32 %v644_v16, %v10473_v20  ;;  %v10529_v21 = vadd.f32 %v717_v18, %v10476_v17  ;;  %v615_v16 = vadd.f32 %v614_v0, %v10473_v20 }
 0x193   :  { %v646_v12 = vpop.f32.mrf.mxu0  ;;  %v719_v14 = vpop.f32.mrf.mxu1  ;;  %v613_v18 = vadd.f32 %v10449_v11, %v241_v36 }
 0x194   :  { %12454 = vst [vmem:[#allocation91_spill] sm:$0xff] %v10526_v32  ;;  %12455 = vst [vmem:[#allocation92_spill] sm:$0xff] %v10529_v21  ;;  %v10531_v26 = vadd.f32 %v646_v12, %v241_v36  ;;  %v10534_v24 = vadd.f32 %v719_v14, %v10457_v43 }
 0x195   :  { %v721_v25 = vpop.f32.mrf.mxu1 }
 0x196   :  { %12456 = vst [vmem:[#allocation93_spill] sm:$0xff] %v10531_v26  ;;  %12457 = vst [vmem:[#allocation94_spill] sm:$0xff] %v10534_v24  ;;  %v10537_v19 = vadd.f32 %v721_v25, %v10476_v17  ;;  %v688_v24 = vadd.f32 %v10453_v27, %v10476_v17  ;;  %v759_v27 = vld [vmem:[%s12154_s2] sm:$0xff] }
 0x197   :  { %v993_v30 = vpop.f32.mrf.mxu1 }
 0x198   :  { %12458 = vst [vmem:[#allocation95_spill] sm:$0xff] %v10537_v19  ;;  %v1041_v32 = vadd.f32 %v993_v30, %v613_v18 }
 0x199   :  { %v995_v23 = vpop.f32.mrf.mxu1 }
 0x19a   :  { %v1042_v21 = vadd.f32 %v995_v23, %v615_v16  ;;  %v1045_v12 = vmul.f32 0.5, %v1041_v32 }
 0x19b   :  { %v997_v22 = vpop.f32.mrf.mxu1 }
 0x19c   :  { %v1046_v9 = vmul.f32 0.5, %v1042_v21 }
 0x19d   :  { %v998_v15 = vpop.f32.mrf.mxu1 }
 0x19e   :  { %9743 = vtanh.f32 %v1046_v9  ;;  %v686_v15 = vadd.f32 %v10451_v45, %v10457_v43 }
 0x19f   :  { %9745 = vtanh.f32 %v1045_v12 }
 0x1ab   :  { %v9744_v11 = vpop.eup %9743 }
 0x1ac   :  { %v9746_v36 = vpop.eup %9745  ;;  %v1052_v23 = vmul.f32 0.5, %v9744_v11  ;;  %v9907_v11 = vld [vmem:[#allocation6 + $0xa4] ss:$16 sps:$4 sm:$0xff]  }
 0x1ad   :  { %v1051_v32 = vmul.f32 0.5, %v9746_v36 }
 0x1ae   :  { %v1055_v9 = vadd.f32 0.5, %v1052_v23 }
 0x1af   :  { %v1054_v30 = vadd.f32 0.5, %v1051_v32 }
 0x1b7   :  { %v1034_v14 = vpop.f32.mrf.mxu1 }
 0x1b8   :  { %v1043_v22 = vadd.f32 %v1034_v14, %v686_v15  ;;  %v9904_v15 = vld [vmem:[#allocation6 + $0xe0] ss:$16 sps:$4 sm:$0xff]  }
 0x1b9   :  { %v1036_v25 = vpop.f32.mrf.mxu1 }
 0x1ba   :  { %v1044_v19 = vadd.f32 %v1036_v25, %v688_v24  ;;  %v1047_v21 = vmul.f32 0.5, %v1043_v22  ;;  %v9906_v22 = vld [vmem:[#allocation6 + $0xc0] ss:$16 sps:$4 sm:$0xff]  }
 0x1bb   :  { %v1038_v26 = vpop.f32.mrf.mxu1 }
 0x1bc   :  { %9747 = vtanh.f32 %v1044_v19  ;;  %v1058_v26 = vmul.f32 %v1055_v9, %v759_v27 }
 0x1bd   :  { %v1039_v0 = vpop.f32.mrf.mxu1  ;;  %9749 = vtanh.f32 %v1047_v21 }
 0x1be   :  { %v9905_v0 = vld [vmem:[#allocation6 + $0xc4] ss:$16 sps:$4 sm:$0xff]  }
 0x1c9   :  { %v9748_v24 = vpop.eup %9747 }
 0x1ca   :  { %v1059_v16 = vmul.f32 %v9748_v24, %v1054_v30  ;;  %v9750_v45 = vpop.eup %9749  ;;  %v12482_v30 = vld [vmem:[#allocation67_spill] sm:$0xff] }
 0x1cb   :  { %v1053_v43 = vmul.f32 0.5, %v9750_v45 }
 0x1cc   :  { %v10548_v18 = vadd.f32 %v1059_v16, %v1058_v26 }
 0x1cd   :  { %v1056_v19 = vadd.f32 0.5, %v1053_v43 }
 0x1ce   :  { %9751 = vtanh.f32 %v10548_v18 }
 0x1db   :  { %v9752_v12 = vpop.eup %9751 }
 0x1dc   :  { %v1062_v14 = vmul.f32 %v9752_v12, %v1056_v19  ;;  %v12483_v12 = vld [vmem:[#allocation65_spill] sm:$0xff] }
 0x1de   :  { %v1063_v25 = vpack.c.bf16 %v1062_v14, %v1062_v14 }
 0x1e0   :  { %1564 = vmatmul.mubr.bf16.vlgmr.msra.gmra.mxu0 %v1063_v25  ;;  %1605 = vmatmul.mubr.bf16.vlgmr.msra.gmra.mxu1 %v1063_v25 }
 0x1e1   :  { %1855 = vmatpush1.bf16.msra.mxu0 %v9904_v15  ;;  %1896 = vmatpush1.bf16.msra.mxu1 %v10194_v44  ;;  %v12462_v44 = vld [vmem:[#allocation15_spill] sm:$0xff] }
 0x1e2   :  { %1856 = vmatprep.subr.bf16.mxu0 %v9905_v0  ;;  %1897 = vmatprep.subr.bf16.mxu1 %v10196_v46  ;;  %v12463_v46 = vld [vmem:[#allocation19_spill] sm:$0xff] }
 0x1e3   :  { %1886 = vmatprep.mubr.bf16.mxu0 %v12399_v42  ;;  %1927 = vmatprep.mubr.bf16.mxu1 %v12399_v42 }
 0x1e5   :  { %1857 = vmatpush1.bf16.msra.mxu0 %v9906_v22  ;;  %1898 = vmatpush1.bf16.msra.mxu1 %v10200_v47  ;;  %v12464_v47 = vld [vmem:[#allocation16_spill] sm:$0xff] }
 0x1e6   :  { %1858 = vmatprep.subr.bf16.mxu0 %v9907_v11  ;;  %1899 = vmatprep.subr.bf16.mxu1 %v10202_v48  ;;  %v12465_v48 = vld [vmem:[#allocation21_spill] sm:$0xff] }
 0x1e9   :  { %1859 = vmatpush1.bf16.msra.mxu0 %v10131_v28  ;;  %1900 = vmatpush1.bf16.msra.mxu1 %v10207_v49  ;;  %v10573_v28 = vpop.f32.mrf.mxu0  ;;  %v12466_v49 = vld [vmem:[#allocation18_spill] sm:$0xff] }
 0x1ea   :  { %1860 = vmatprep.subr.bf16.mxu0 %v10133_v29  ;;  %1901 = vmatprep.subr.bf16.mxu1 %v10209_v50  ;;  %12459 = vst [vmem:[#allocation96_spill] sm:$0xff] %v10573_v28  ;;  %v12467_v50 = vld [vmem:[#allocation25_spill] sm:$0xff] }
 0x1eb   :  { %v1323_v29 = vpop.f32.mrf.mxu0  ;;  %v10848_v28 = vld [vmem:[#allocation9 + $0x48] ss:$16 sps:$4 sm:$0xff]  }
 0x1ed   :  { %1861 = vmatpush1.bf16.msra.mxu0 %v10139_v31  ;;  %1902 = vmatpush1.bf16.msra.mxu1 %v10213_v51  ;;  %v1325_v31 = vpop.f32.mrf.mxu0  ;;  %v12468_v51 = vld [vmem:[#allocation20_spill] sm:$0xff] }
 0x1ee   :  { %1862 = vmatprep.subr.bf16.mxu0 %v10145_v33  ;;  %1903 = vmatprep.subr.bf16.mxu1 %v10215_v52  ;;  %v12469_v52 = vld [vmem:[#allocation24_spill] sm:$0xff] }
 0x1ef   :  { %v1327_v33 = vpop.f32.mrf.mxu0 }
 0x1f0   :  { %v8250_v33 = vld [vmem:[%s12154_s2 + $0x8] sm:$0xff] }
 0x1f1   :  { %1863 = vmatpush1.bf16.msra.mxu0 %v10149_v34  ;;  %1904 = vmatpush1.bf16.msra.mxu1 %v10219_v53  ;;  %v1364_v34 = vpop.f32.mrf.mxu1  ;;  %v12470_v53 = vld [vmem:[#allocation23_spill] sm:$0xff] }
 0x1f2   :  { %1864 = vmatprep.subr.bf16.mxu0 %v10151_v35  ;;  %1905 = vmatprep.subr.bf16.mxu1 %v10221_v54  ;;  %v1328_v35 = vpop.f32.mrf.mxu0  ;;  %v12471_v54 = vld [vmem:[#allocation27_spill] sm:$0xff] }
 0x1f5   :  { %1865 = vmatpush1.bf16.msra.mxu0 %v10159_v37  ;;  %1906 = vmatpush1.bf16.msra.mxu1 %v10225_v55  ;;  %v1366_v37 = vpop.f32.mrf.mxu1  ;;  %v12472_v55 = vld [vmem:[#allocation22_spill] sm:$0xff] }
 0x1f6   :  { %1866 = vmatprep.subr.bf16.mxu0 %v10165_v38  ;;  %1907 = vmatprep.subr.bf16.mxu1 %v10227_v56  ;;  %v12473_v56 = vld [vmem:[#allocation29_spill] sm:$0xff] }
 0x1f7   :  { %v1368_v38 = vpop.f32.mrf.mxu1 }
 0x1f9   :  { %1867 = vmatpush1.bf16.msra.mxu0 %v10173_v39  ;;  %1908 = vmatpush1.bf16.msra.mxu1 %v10231_v57  ;;  %v1369_v39 = vpop.f32.mrf.mxu1  ;;  %v12474_v57 = vld [vmem:[#allocation26_spill] sm:$0xff] }
 0x1fa   :  { %1868 = vmatprep.subr.bf16.mxu0 %v10175_v40  ;;  %1909 = vmatprep.subr.bf16.mxu1 %v10233_v58  ;;  %v12460_v40 = vld [vmem:[#allocation14_spill] sm:$0xff] }
 0x1fb   :  { %v12475_v58 = vld [vmem:[#allocation30_spill] sm:$0xff] }
 0x1fd   :  { %1869 = vmatpush1.bf16.msra.mxu0 %v10179_v41  ;;  %1910 = vmatpush1.bf16.msra.mxu1 %v10238_v59  ;;  %v12461_v41 = vld [vmem:[#allocation17_spill] sm:$0xff]  ;;  %v12476_v59 = vld [vmem:[#allocation28_spill] sm:$0xff] }
 0x1fe   :  { %2184 = vmatprep.subr.bf16.mxu0 %v10243_v60  ;;  %2225 = vmatprep.subr.bf16.mxu1 %v10251_v63  ;;  %v12477_v60 = vld [vmem:[#allocation31_spill] sm:$0xff]  ;;  %v1613_v63 = vld [vmem:[%s12160_s8] sm:$0xf] }
 0x1ff   :  { %v1630_v24 = vrot.slane %v1613_v63, %v12482_v30  ;;  %v1626_v14 = vrot.slane %v1613_v63, %v12483_v12 }
 0x200   :  { %1887 = vmatmul.mubr.bf16.vlgmr.msra.gmra.mxu0 %v1063_v25  ;;  %1928 = vmatmul.mubr.bf16.vlgmr.msra.gmra.mxu1 %v1063_v25 }
 0x201   :  { %2185 = vmatpush1.bf16.msra.mxu0 %v10245_v61  ;;  %2226 = vmatpush1.bf16.msra.mxu1 %v10255_v2  ;;  %v12478_v61 = vld [vmem:[#allocation32_spill] sm:$0xff] }
 0x202   :  { %2186 = vmatprep.subr.bf16.mxu0 %v10249_v62  ;;  %2227 = vmatprep.subr.bf16.mxu1 %v10263_v4  ;;  %v12479_v62 = vld [vmem:[#allocation33_spill] sm:$0xff] }
 0x203   :  { %2216 = vmatprep.mubr.bf16.mxu0 %v12399_v42  ;;  %2257 = vmatprep.mubr.bf16.mxu1 %v12399_v42 }
 0x205   :  { %2187 = vmatpush1.bf16.msra.mxu0 %v10253_v1  ;;  %2228 = vmatpush1.bf16.msra.mxu1 %v10267_v6  ;;  %v12480_v1 = vld [vmem:[#allocation64_spill] sm:$0xff]  ;;  %v12481_v6 = vld [vmem:[#allocation66_spill] sm:$0xff] }
 0x206   :  { %2188 = vmatprep.subr.bf16.mxu0 %v10261_v3  ;;  %2229 = vmatprep.subr.bf16.mxu1 %v10275_v8  ;;  %v1618_v2 = vrot.slane %v1613_v63, %v12480_v1 }
 0x209   :  { %2189 = vmatpush1.bf16.msra.mxu0 %v10265_v5  ;;  %2230 = vmatpush1.bf16.msra.mxu1 %v10279_v10 }
 0x20a   :  { %2190 = vmatprep.subr.bf16.mxu0 %v10273_v7  ;;  %2231 = vmatprep.subr.bf16.mxu1 %v10287_v13  ;;  %v1622_v7 = vrot.slane %v1613_v63, %v12481_v6 }
 0x20d   :  { %2191 = vmatpush1.bf16.msra.mxu0 %v12460_v40  ;;  %2232 = vmatpush1.bf16.msra.mxu1 %v12461_v41 }
 0x20e   :  { %2192 = vmatprep.subr.bf16.mxu0 %v12462_v44  ;;  %2233 = vmatprep.subr.bf16.mxu1 %v12463_v46  ;;  %v12484_v44 = vld [vmem:[#allocation70_spill] sm:$0xff] }
 0x20f   :  { %v619_v46 = vadd.f32 %v12484_v44, %v10473_v20  ;;  %12540 = vst [vmem:[#allocation70_spill] sm:$0xff] %v10848_v28  ;;  %v10854_v20 = vld [vmem:[#allocation9 + $0x24] ss:$16 sps:$4 sm:$0xff]  }
 0x211   :  { %2193 = vmatpush1.bf16.msra.mxu0 %v12464_v47  ;;  %2234 = vmatpush1.bf16.msra.mxu1 %v12465_v48  ;;  %v12485_v47 = vld [vmem:[#allocation68_spill] sm:$0xff] }
 0x212   :  { %2194 = vmatprep.subr.bf16.mxu0 %v12466_v49  ;;  %2235 = vmatprep.subr.bf16.mxu1 %v12467_v50  ;;  %12541 = vst [vmem:[#allocation68_spill] sm:$0xff] %v10854_v20 }
 0x215   :  { %2195 = vmatpush1.bf16.msra.mxu0 %v12468_v51  ;;  %2236 = vmatpush1.bf16.msra.mxu1 %v12469_v52  ;;  %v12486_v51 = vld [vmem:[#allocation71_spill] sm:$0xff] }
 0x216   :  { %2196 = vmatprep.subr.bf16.mxu0 %v12470_v53  ;;  %2237 = vmatprep.subr.bf16.mxu1 %v12471_v54  ;;  %v692_v52 = vadd.f32 %v12486_v51, %v10476_v17 }
 0x219   :  { %2197 = vmatpush1.bf16.msra.mxu0 %v12472_v55  ;;  %2238 = vmatpush1.bf16.msra.mxu1 %v12473_v56 }
 0x21a   :  { %2198 = vmatprep.subr.bf16.mxu0 %v12474_v57  ;;  %2239 = vmatprep.subr.bf16.mxu1 %v12475_v58 }
 0x21d   :  { %2199 = vmatpush1.bf16.msra.mxu0 %v12476_v59  ;;  %2240 = vmatpush1.bf16.msra.mxu1 %v12477_v60 }
 0x21e   :  { %2426 = vmatprep.subr.bf16.mxu0 %v12478_v61  ;;  %2467 = vmatprep.subr.bf16.mxu1 %v12479_v62 }
 0x2a0   :  { %v1565_v3 = vpop.f32.mrf.mxu0  ;;  %v1606_v4 = vpop.f32.mrf.mxu1 }
 0x2a1   :  { %v1566_v5 = vadd.f32 %v1565_v3, %v1323_v29  ;;  %v1607_v19 = vadd.f32 %v1606_v4, %v1364_v34  ;;  %v12487_v3 = vld [vmem:[#allocation69_spill] sm:$0xff] }
 0x2a2   :  { %v1567_v8 = vpop.f32.mrf.mxu0  ;;  %v1608_v10 = vpop.f32.mrf.mxu1 }
 0x2a3   :  { %v1635_v13 = vadd.f32 %v1618_v2, %v1566_v5  ;;  %v1568_v36 = vadd.f32 %v1567_v8, %v1325_v31  ;;  %v1609_v27 = vadd.f32 %v1608_v10, %v1366_v37  ;;  %v1637_v25 = vadd.f32 %v1626_v14, %v1607_v19  ;;  %v12489_v10 = vld [vmem:[#allocation34_spill] sm:$0xff]  ;;  %v12495_v19 = vld [vmem:[#allocation40_spill] sm:$0xff]  ;;  %v12496_v14 = vld [vmem:[#allocation41_spill] sm:$0xff] }
 0x2a4   :  { %v1569_v23 = vpop.f32.mrf.mxu0  ;;  %v1610_v21 = vpop.f32.mrf.mxu1 }
 0x2a5   :  { %v1639_v32 = vmul.f32 0.5, %v1635_v13  ;;  %v1636_v9 = vadd.f32 %v1622_v7, %v1568_v36  ;;  %v1638_v43 = vadd.f32 %v1630_v24, %v1609_v27  ;;  %v1641_v15 = vmul.f32 0.5, %v1637_v25  ;;  %v12490_v13 = vld [vmem:[#allocation35_spill] sm:$0xff]  ;;  %v12491_v23 = vld [vmem:[#allocation36_spill] sm:$0xff]  ;;  %v12492_v21 = vld [vmem:[#allocation37_spill] sm:$0xff] }
 0x2a6   :  { %v1570_v26 = vpop.f32.mrf.mxu0  ;;  %v1611_v16 = vpop.f32.mrf.mxu1 }
 0x2a7   :  { %9753 = vtanh.f32 %v1639_v32  ;;  %v1640_v45 = vmul.f32 0.5, %v1636_v9  ;;  %v12493_v26 = vld [vmem:[#allocation38_spill] sm:$0xff]  ;;  %v12494_v16 = vld [vmem:[#allocation39_spill] sm:$0xff] }
 0x2a9   :  { %9755 = vtanh.f32 %v1640_v45 }
 0x2aa   :  { %9757 = vtanh.f32 %v1638_v43 }
 0x2ab   :  { %9759 = vtanh.f32 %v1641_v15  ;;  %v12497_v15 = vld [vmem:[#allocation42_spill] sm:$0xff] }
 0x2b4   :  { %v9754_v0 = vpop.eup %9753 }
 0x2b5   :  { %v1645_v22 = vmul.f32 0.5, %v9754_v0  ;;  %v12498_v0 = vld [vmem:[#allocation43_spill] sm:$0xff] }
 0x2b6   :  { %v9756_v11 = vpop.eup %9755 }
 0x2b7   :  { %v1648_v29 = vadd.f32 0.5, %v1645_v22  ;;  %v1646_v31 = vmul.f32 0.5, %v9756_v11  ;;  %v9758_v37 = vpop.eup %9757  ;;  %v12499_v11 = vld [vmem:[#allocation44_spill] sm:$0xff] }
 0x2b8   :  { %v9760_v55 = vpop.eup %9759 }
 0x2b9   :  { %v1649_v35 = vadd.f32 0.5, %v1646_v31  ;;  %v1653_v39 = vmul.f32 %v9758_v37, %v1648_v29  ;;  %v1647_v62 = vmul.f32 0.5, %v9760_v55  ;;  %v12500_v29 = vld [vmem:[#allocation45_spill] sm:$0xff]  ;;  %v12501_v31 = vld [vmem:[#allocation46_spill] sm:$0xff] }
 0x2ba   :  { %v12504_v37 = vld [vmem:[#allocation49_spill] sm:$0xff] }
 0x2bb   :  { %v1652_v38 = vmul.f32 %v8250_v33, %v1649_v35  ;;  %v1650_v63 = vadd.f32 0.5, %v1647_v62  ;;  %v12502_v33 = vld [vmem:[#allocation47_spill] sm:$0xff]  ;;  %v12503_v35 = vld [vmem:[#allocation48_spill] sm:$0xff]  ;;  %v12516_v55 = vld [vmem:[#allocation61_spill] sm:$0xff] }
 0x2bc   :  { %v10682_v62 = vld [vmem:[#allocation6 + $0xe8] ss:$16 sps:$4 sm:$0xff]  }
 0x2bd   :  { %v10627_v34 = vadd.f32 %v1653_v39, %v1652_v38  ;;  %v12505_v38 = vld [vmem:[#allocation50_spill] sm:$0xff]  ;;  %v12506_v39 = vld [vmem:[#allocation51_spill] sm:$0xff] }
 0x2bf   :  { %9761 = vtanh.f32 %v10627_v34 }
 0x2c0   :  { %v1888_v40 = vpop.f32.mrf.mxu0  ;;  %v1929_v41 = vpop.f32.mrf.mxu1 }
 0x2c1   :  { %v1936_v48 = vadd.f32 %v1888_v40, %v12485_v47  ;;  %v1938_v4 = vadd.f32 %v1929_v41, %v12487_v3  ;;  %v12507_v40 = vld [vmem:[#allocation52_spill] sm:$0xff]  ;;  %v12508_v41 = vld [vmem:[#allocation53_spill] sm:$0xff]  ;;  %v12510_v47 = vld [vmem:[#allocation55_spill] sm:$0xff] }
 0x2c2   :  { %v1890_v49 = vpop.f32.mrf.mxu0  ;;  %v1931_v50 = vpop.f32.mrf.mxu1  ;;  %v10690_v3 = vld [vmem:[#allocation6 + $0xcc] ss:$16 sps:$4 sm:$0xff]  }
 0x2c3   :  { %v1940_v53 = vmul.f32 0.5, %v1936_v48  ;;  %v1937_v54 = vadd.f32 %v1890_v49, %v619_v46  ;;  %v1939_v59 = vadd.f32 %v1931_v50, %v692_v52  ;;  %v1942_v7 = vmul.f32 0.5, %v1938_v4  ;;  %v12509_v46 = vld [vmem:[#allocation54_spill] sm:$0xff]  ;;  %v12511_v48 = vld [vmem:[#allocation56_spill] sm:$0xff]  ;;  %v12512_v49 = vld [vmem:[#allocation57_spill] sm:$0xff] }
 0x2c4   :  { %v1892_v56 = vpop.f32.mrf.mxu0  ;;  %v1933_v57 = vpop.f32.mrf.mxu1  ;;  %v12513_v52 = vld [vmem:[#allocation58_spill] sm:$0xff] }
 0x2c5   :  { %9763 = vtanh.f32 %v1940_v53  ;;  %v1941_v58 = vmul.f32 0.5, %v1937_v54  ;;  %v12514_v53 = vld [vmem:[#allocation59_spill] sm:$0xff]  ;;  %v12515_v54 = vld [vmem:[#allocation60_spill] sm:$0xff] }
 0x2c6   :  { %v1893_v60 = vpop.f32.mrf.mxu0  ;;  %v1934_v61 = vpop.f32.mrf.mxu1  ;;  %v10674_v57 = vld [vmem:[#allocation6 + $0xe4] ss:$16 sps:$4 sm:$0xff]   ;;  %v10696_v4 = vld [vmem:[#allocation6 + $0xc0] ss:$16 sps:$4 sm:$0xff]  }
 0x2c7   :  { %9765 = vtanh.f32 %v1941_v58  ;;  %v10676_v58 = vld [vmem:[#allocation6 + $0xec] ss:$16 sps:$4 sm:$0xff]   ;;  %v10680_v61 = vld [vmem:[#allocation6 + $0xe0] ss:$16 sps:$4 sm:$0xff]  }
 0x2c8   :  { %9767 = vtanh.f32 %v1939_v59  ;;  %v12517_v59 = vld [vmem:[#allocation62_spill] sm:$0xff]  ;;  %v12518_v60 = vld [vmem:[#allocation63_spill] sm:$0xff] }
 0x2c9   :  { %9769 = vtanh.f32 %v1942_v7  ;;  %v10702_v7 = vld [vmem:[#allocation6 + $0xa4] ss:$16 sps:$4 sm:$0xff]  }
 0x2cc   :  { %v9762_v2 = vpop.eup %9761 }
 0x2cd   :  { %v10636_v5 = vmul.f32 %v9762_v2, %v1650_v63  ;;  %v10688_v2 = vld [vmem:[#allocation6 + $0xc4] ss:$16 sps:$4 sm:$0xff]  }
 0x2cf   :  { %12488 = vst [vmem:[#allocation14_spill] sm:$0xff] %v10636_v5  ;;  %v1991_v17 = vpack.c.bf16 %v10636_v5, %v10636_v5  ;;  %v10846_v5 = vld [vmem:[#allocation9 + $0x40] ss:$16 sps:$4 sm:$0xff]  }
 0x2d0   :  { %12539 = vst [vmem:[#allocation65_spill] sm:$0xff] %v10846_v5 }
 0x2d1   :  { %2217 = vmatmul.mubr.bf16.vlgmr.msra.gmra.mxu0 %v1991_v17  ;;  %2258 = vmatmul.mubr.bf16.vlgmr.msra.gmra.mxu1 %v1991_v17  ;;  %v10698_v17 = vld [vmem:[#allocation6 + $0xc8] ss:$16 sps:$4 sm:$0xff]  }
 0x2d2   :  { %v9764_v8 = vpop.eup %9763  ;;  %2427 = vmatpush1.bf16.msra.mxu0 %v12489_v10  ;;  %2468 = vmatpush1.bf16.msra.mxu1 %v12490_v13  ;;  %v10710_v10 = vld [vmem:[#allocation6 + $0xa0] ss:$16 sps:$4 sm:$0xff]   ;;  %v10712_v13 = vld [vmem:[#allocation6 + $0xa8] ss:$16 sps:$4 sm:$0xff]  }
 0x2d3   :  { %v1946_v36 = vmul.f32 0.5, %v9764_v8  ;;  %2428 = vmatprep.subr.bf16.mxu0 %v12491_v23  ;;  %2469 = vmatprep.subr.bf16.mxu1 %v12492_v21  ;;  %v10704_v8 = vld [vmem:[#allocation6 + $0xac] ss:$16 sps:$4 sm:$0xff]   ;;  %v10722_v21 = vld [vmem:[#allocation6 + $0x80] ss:$16 sps:$4 sm:$0xff]  }
 0x2d4   :  { %v9766_v32 = vpop.eup %9765  ;;  %2458 = vmatprep.mubr.bf16.mxu0 %v12399_v42  ;;  %2499 = vmatprep.mubr.bf16.mxu1 %v12399_v42  ;;  %v10718_v23 = vld [vmem:[#allocation6 + $0x8c] ss:$16 sps:$4 sm:$0xff]  }
 0x2d5   :  { %v1949_v9 = vadd.f32 0.5, %v1946_v36  ;;  %v1947_v27 = vmul.f32 0.5, %v9766_v32  ;;  %v9768_v24 = vpop.eup %9767  ;;  %v10716_v36 = vld [vmem:[#allocation6 + $0x84] ss:$16 sps:$4 sm:$0xff]   ;;  %v10724_v32 = vld [vmem:[#allocation6 + $0x88] ss:$16 sps:$4 sm:$0xff]  }
 0x2d6   :  { %2429 = vmatpush1.bf16.msra.mxu0 %v12493_v26  ;;  %2470 = vmatpush1.bf16.msra.mxu1 %v12494_v16  ;;  %v10736_v26 = vld [vmem:[#allocation6 + $0x68] ss:$16 sps:$4 sm:$0xff]   ;;  %v10740_v16 = vld [vmem:[#allocation6 + $0x44] ss:$16 sps:$4 sm:$0xff]  }
 0x2d7   :  { %v1950_v45 = vadd.f32 0.5, %v1947_v27  ;;  %v1954_v43 = vmul.f32 %v9768_v24, %v1949_v9  ;;  %2430 = vmatprep.subr.bf16.mxu0 %v12495_v19  ;;  %2471 = vmatprep.subr.bf16.mxu1 %v12496_v14  ;;  %v10728_v9 = vld [vmem:[#allocation6 + $0x64] ss:$16 sps:$4 sm:$0xff]   ;;  %v10730_v27 = vld [vmem:[#allocation6 + $0x6c] ss:$16 sps:$4 sm:$0xff]  }
 0x2d8   :  { %v10734_v24 = vld [vmem:[#allocation6 + $0x60] ss:$16 sps:$4 sm:$0xff]   ;;  %v10748_v19 = vld [vmem:[#allocation6 + $0x48] ss:$16 sps:$4 sm:$0xff]   ;;  %v10752_v14 = vld [vmem:[#allocation6 + $0x24] ss:$16 sps:$4 sm:$0xff]  }
 0x2d9   :  { %v1953_v25 = vmul.f32 %v1950_v45, %v10548_v18  ;;  %v9770_v18 = vpop.eup %9769  ;;  %v10742_v45 = vld [vmem:[#allocation6 + $0x4c] ss:$16 sps:$4 sm:$0xff]  }
 0x2da   :  { %2431 = vmatpush1.bf16.msra.mxu0 %v12497_v15  ;;  %2472 = vmatpush1.bf16.msra.mxu1 %v12498_v0  ;;  %v1948_v44 = vmul.f32 0.5, %v9770_v18  ;;  %v10758_v15 = vld [vmem:[#allocation6 + $0x20] ss:$16 sps:$4 sm:$0xff]   ;;  %v10760_v0 = vld [vmem:[#allocation6 + $0x28] ss:$16 sps:$4 sm:$0xff]  }
 0x2db   :  { %v10653_v22 = vadd.f32 %v1954_v43, %v1953_v25  ;;  %2432 = vmatprep.subr.bf16.mxu0 %v12499_v11  ;;  %2473 = vmatprep.subr.bf16.mxu1 %v12500_v29  ;;  %v10746_v43 = vld [vmem:[#allocation6 + $0x40] ss:$16 sps:$4 sm:$0xff]   ;;  %v10754_v25 = vld [vmem:[#allocation6 + $0x2c] ss:$16 sps:$4 sm:$0xff]   ;;  %v10764_v11 = vld [vmem:[#allocation6 + $0x4] ss:$16 sps:$4 sm:$0xff]  }
 0x2dc   :  { %v1951_v50 = vadd.f32 0.5, %v1948_v44  ;;  %v10766_v29 = vld [vmem:[#allocation6 + $0xc] ss:$16 sps:$4 sm:$0xff]   ;;  %v10786_v18 = vld [vmem:[#allocation9 + $0xe0] ss:$16 sps:$4 sm:$0xff]  }
 0x2dd   :  { %9771 = vtanh.f32 %v10653_v22  ;;  %12519 = vst [vmem:[#allocation17_spill] sm:$0xff] %v10786_v18  ;;  %v10800_v44 = vld [vmem:[#allocation9 + $0xc8] ss:$16 sps:$4 sm:$0xff]  }
 0x2de   :  { %2433 = vmatpush1.bf16.msra.mxu0 %v12501_v31  ;;  %2474 = vmatpush1.bf16.msra.mxu1 %v12502_v33  ;;  %v10770_v31 = vld [vmem:[#allocation6] ss:$16 sps:$4 sm:$0xff]   ;;  %v10772_v33 = vld [vmem:[#allocation6 + $0x8] ss:$16 sps:$4 sm:$0xff]   ;;  %12524 = vst [vmem:[#allocation18_spill] sm:$0xff] %v10800_v44 }
 0x2df   :  { %2434 = vmatprep.subr.bf16.mxu0 %v12503_v35  ;;  %2475 = vmatprep.subr.bf16.mxu1 %v12504_v37  ;;  %v10782_v35 = vld [vmem:[#allocation9 + $0xe4] ss:$16 sps:$4 sm:$0xff]   ;;  %v10784_v37 = vld [vmem:[#allocation9 + $0xec] ss:$16 sps:$4 sm:$0xff]  }
 0x2e2   :  { %2435 = vmatpush1.bf16.msra.mxu0 %v12505_v38  ;;  %2476 = vmatpush1.bf16.msra.mxu1 %v12506_v39  ;;  %v10788_v38 = vld [vmem:[#allocation9 + $0xe8] ss:$16 sps:$4 sm:$0xff]   ;;  %v10794_v39 = vld [vmem:[#allocation9 + $0xc4] ss:$16 sps:$4 sm:$0xff]  }
 0x2e3   :  { %2436 = vmatprep.subr.bf16.mxu0 %v12507_v40  ;;  %2477 = vmatprep.subr.bf16.mxu1 %v12508_v41  ;;  %12520 = vst [vmem:[#allocation15_spill] sm:$0xff] %v10788_v38  ;;  %12521 = vst [vmem:[#allocation19_spill] sm:$0xff] %v10794_v39  ;;  %v10796_v40 = vld [vmem:[#allocation9 + $0xcc] ss:$16 sps:$4 sm:$0xff]   ;;  %v10798_v41 = vld [vmem:[#allocation9 + $0xc0] ss:$16 sps:$4 sm:$0xff]  }
 0x2e4   :  { %12522 = vst [vmem:[#allocation16_spill] sm:$0xff] %v10796_v40  ;;  %12523 = vst [vmem:[#allocation21_spill] sm:$0xff] %v10798_v41 }
 0x2e6   :  { %2437 = vmatpush1.bf16.msra.mxu0 %v12509_v46  ;;  %2478 = vmatpush1.bf16.msra.mxu1 %v12510_v47  ;;  %v10806_v46 = vld [vmem:[#allocation9 + $0xa4] ss:$16 sps:$4 sm:$0xff]   ;;  %v10808_v47 = vld [vmem:[#allocation9 + $0xac] ss:$16 sps:$4 sm:$0xff]  }
 0x2e7   :  { %2438 = vmatprep.subr.bf16.mxu0 %v12511_v48  ;;  %2479 = vmatprep.subr.bf16.mxu1 %v12512_v49  ;;  %12525 = vst [vmem:[#allocation25_spill] sm:$0xff] %v10806_v46  ;;  %12526 = vst [vmem:[#allocation20_spill] sm:$0xff] %v10808_v47  ;;  %v10810_v48 = vld [vmem:[#allocation9 + $0xa0] ss:$16 sps:$4 sm:$0xff]   ;;  %v10812_v49 = vld [vmem:[#allocation9 + $0xa8] ss:$16 sps:$4 sm:$0xff]  }
 0x2e8   :  { %12527 = vst [vmem:[#allocation24_spill] sm:$0xff] %v10810_v48  ;;  %12528 = vst [vmem:[#allocation23_spill] sm:$0xff] %v10812_v49 }
 0x2ea   :  { %v9772_v51 = vpop.eup %9771  ;;  %2439 = vmatpush1.bf16.msra.mxu0 %v12513_v52  ;;  %2480 = vmatpush1.bf16.msra.mxu1 %v12514_v53  ;;  %v10822_v52 = vld [vmem:[#allocation9 + $0x80] ss:$16 sps:$4 sm:$0xff]   ;;  %v10824_v53 = vld [vmem:[#allocation9 + $0x88] ss:$16 sps:$4 sm:$0xff]  }
 0x2eb   :  { %2440 = vmatprep.subr.bf16.mxu0 %v12515_v54  ;;  %2481 = vmatprep.subr.bf16.mxu1 %v12516_v55  ;;  %v1957_v56 = vmul.f32 %v9772_v51, %v1951_v50  ;;  %v10818_v50 = vld [vmem:[#allocation9 + $0x84] ss:$16 sps:$4 sm:$0xff]   ;;  %v10820_v51 = vld [vmem:[#allocation9 + $0x8c] ss:$16 sps:$4 sm:$0xff]   ;;  %12531 = vst [vmem:[#allocation29_spill] sm:$0xff] %v10822_v52  ;;  %12532 = vst [vmem:[#allocation26_spill] sm:$0xff] %v10824_v53 }
 0x2ec   :  { %12529 = vst [vmem:[#allocation27_spill] sm:$0xff] %v10818_v50  ;;  %12530 = vst [vmem:[#allocation22_spill] sm:$0xff] %v10820_v51  ;;  %v10830_v54 = vld [vmem:[#allocation9 + $0x64] ss:$16 sps:$4 sm:$0xff]   ;;  %v10832_v55 = vld [vmem:[#allocation9 + $0x6c] ss:$16 sps:$4 sm:$0xff]  }
 0x2ed   :  { %v10684_v63 = vpack.c.bf16 %v1957_v56, %v1957_v56  ;;  %12533 = vst [vmem:[#allocation30_spill] sm:$0xff] %v10830_v54  ;;  %12534 = vst [vmem:[#allocation28_spill] sm:$0xff] %v10832_v55  ;;  %v10834_v56 = vld [vmem:[#allocation9 + $0x60] ss:$16 sps:$4 sm:$0xff]  }
 0x2ee   :  { %2441 = vmatpush1.bf16.msra.mxu0 %v12517_v59  ;;  %2482 = vmatpush1.bf16.msra.mxu1 %v12518_v60  ;;  %12535 = vst [vmem:[#allocation31_spill] sm:$0xff] %v10834_v56  ;;  %v10836_v59 = vld [vmem:[#allocation9 + $0x68] ss:$16 sps:$4 sm:$0xff]   ;;  %v10842_v60 = vld [vmem:[#allocation9 + $0x44] ss:$16 sps:$4 sm:$0xff]  }
 0x2ef   :  { %2749 = vmatprep.subr.bf16.mxu0 %v10674_v57  ;;  %2790 = vmatprep.subr.bf16.mxu1 %v10676_v58  ;;  %12536 = vst [vmem:[#allocation32_spill] sm:$0xff] %v10836_v59  ;;  %12537 = vst [vmem:[#allocation33_spill] sm:$0xff] %v10842_v60 }
 0x2f1   :  { %2459 = vmatmul.mubr.bf16.vlgmr.msra.gmra.mxu0 %v10684_v63  ;;  %2500 = vmatmul.mubr.bf16.vlgmr.msra.gmra.mxu1 %v10684_v63 }
 0x2f2   :  { %2750 = vmatpush1.bf16.msra.mxu0 %v10680_v61  ;;  %2791 = vmatpush1.bf16.msra.mxu1 %v10682_v62 }
 0x2f3   :  { %2751 = vmatprep.subr.bf16.mxu0 %v10688_v2  ;;  %2792 = vmatprep.subr.bf16.mxu1 %v10690_v3 }
 0x2f4   :  { %2781 = vmatprep.mubr.bf16.mxu0 %v12399_v42  ;;  %2822 = vmatprep.mubr.bf16.mxu1 %v12399_v42 }
 0x2f6   :  { %2752 = vmatpush1.bf16.msra.mxu0 %v10696_v4  ;;  %2793 = vmatpush1.bf16.msra.mxu1 %v10698_v17 }
 0x2f7   :  { %2753 = vmatprep.subr.bf16.mxu0 %v10702_v7  ;;  %2794 = vmatprep.subr.bf16.mxu1 %v10704_v8 }
 0x2fa   :  { %2754 = vmatpush1.bf16.msra.mxu0 %v10710_v10  ;;  %2795 = vmatpush1.bf16.msra.mxu1 %v10712_v13 }
 0x2fb   :  { %2755 = vmatprep.subr.bf16.mxu0 %v10716_v36  ;;  %2796 = vmatprep.subr.bf16.mxu1 %v10718_v23 }
 0x2fe   :  { %2756 = vmatpush1.bf16.msra.mxu0 %v10722_v21  ;;  %2797 = vmatpush1.bf16.msra.mxu1 %v10724_v32 }
 0x2ff   :  { %2757 = vmatprep.subr.bf16.mxu0 %v10728_v9  ;;  %2798 = vmatprep.subr.bf16.mxu1 %v10730_v27 }
 0x302   :  { %2758 = vmatpush1.bf16.msra.mxu0 %v10734_v24  ;;  %2799 = vmatpush1.bf16.msra.mxu1 %v10736_v26 }
 0x303   :  { %2759 = vmatprep.subr.bf16.mxu0 %v10740_v16  ;;  %2800 = vmatprep.subr.bf16.mxu1 %v10742_v45 }
 0x306   :  { %2760 = vmatpush1.bf16.msra.mxu0 %v10746_v43  ;;  %2801 = vmatpush1.bf16.msra.mxu1 %v10748_v19 }
 0x307   :  { %2761 = vmatprep.subr.bf16.mxu0 %v10752_v14  ;;  %2802 = vmatprep.subr.bf16.mxu1 %v10754_v25 }
 0x30a   :  { %2762 = vmatpush1.bf16.msra.mxu0 %v10758_v15  ;;  %2803 = vmatpush1.bf16.msra.mxu1 %v10760_v0 }
 0x30b   :  { %2763 = vmatprep.subr.bf16.mxu0 %v10764_v11  ;;  %2804 = vmatprep.subr.bf16.mxu1 %v10766_v29 }
 0x30e   :  { %2764 = vmatpush1.bf16.msra.mxu0 %v10770_v31  ;;  %2805 = vmatpush1.bf16.msra.mxu1 %v10772_v33 }
 0x30f   :  { %3079 = vmatprep.subr.bf16.mxu0 %v10782_v35  ;;  %3120 = vmatprep.subr.bf16.mxu1 %v10784_v37 }
 0x311   :  { %2782 = vmatmul.mubr.bf16.vlgmr.msra.gmra.mxu0 %v10684_v63  ;;  %2823 = vmatmul.mubr.bf16.vlgmr.msra.gmra.mxu1 %v10684_v63  ;;  %v10844_v63 = vld [vmem:[#allocation9 + $0x4c] ss:$16 sps:$4 sm:$0xff]  }
 0x312   :  { %3111 = vmatprep.mubr.bf16.mxu0 %v12399_v42  ;;  %3152 = vmatprep.mubr.bf16.mxu1 %v12399_v42  ;;  %12538 = vst [vmem:[#allocation67_spill] sm:$0xff] %v10844_v63 }
 0x313   :  { %3080 = vmatpush1.bf16.msra.mxu0 %v10786_v18  ;;  %3121 = vmatpush1.bf16.msra.mxu1 %v10788_v38 }
 0x314   :  { %3081 = vmatprep.subr.bf16.mxu0 %v10794_v39  ;;  %3122 = vmatprep.subr.bf16.mxu1 %v10796_v40 }
 0x317   :  { %3082 = vmatpush1.bf16.msra.mxu0 %v10798_v41  ;;  %3123 = vmatpush1.bf16.msra.mxu1 %v10800_v44 }
 0x318   :  { %3083 = vmatprep.subr.bf16.mxu0 %v10806_v46  ;;  %3124 = vmatprep.subr.bf16.mxu1 %v10808_v47 }
 0x31b   :  { %3084 = vmatpush1.bf16.msra.mxu0 %v10810_v48  ;;  %3125 = vmatpush1.bf16.msra.mxu1 %v10812_v49 }
 0x31c   :  { %3085 = vmatprep.subr.bf16.mxu0 %v10818_v50  ;;  %3126 = vmatprep.subr.bf16.mxu1 %v10820_v51 }
 0x31f   :  { %3086 = vmatpush1.bf16.msra.mxu0 %v10822_v52  ;;  %3127 = vmatpush1.bf16.msra.mxu1 %v10824_v53 }
 0x320   :  { %3087 = vmatprep.subr.bf16.mxu0 %v10830_v54  ;;  %3128 = vmatprep.subr.bf16.mxu1 %v10832_v55  ;;  %v10860_v55 = vld [vmem:[#allocation9 + $0x28] ss:$16 sps:$4 sm:$0xff]  }
 0x321   :  { %12544 = vst [vmem:[#allocation34_spill] sm:$0xff] %v10860_v55 }
 0x323   :  { %3088 = vmatpush1.bf16.msra.mxu0 %v10834_v56  ;;  %3129 = vmatpush1.bf16.msra.mxu1 %v10836_v59  ;;  %v10856_v56 = vld [vmem:[#allocation9 + $0x2c] ss:$16 sps:$4 sm:$0xff]   ;;  %v10858_v59 = vld [vmem:[#allocation9 + $0x20] ss:$16 sps:$4 sm:$0xff]  }
 0x324   :  { %3089 = vmatprep.subr.bf16.mxu0 %v10842_v60  ;;  %3130 = vmatprep.subr.bf16.mxu1 %v10844_v63  ;;  %12542 = vst [vmem:[#allocation71_spill] sm:$0xff] %v10856_v56  ;;  %12543 = vst [vmem:[#allocation69_spill] sm:$0xff] %v10858_v59  ;;  %v10866_v63 = vld [vmem:[#allocation9 + $0x4] ss:$16 sps:$4 sm:$0xff]   ;;  %v10872_v60 = vld [vmem:[#allocation9 + $0x8] ss:$16 sps:$4 sm:$0xff]  }
 0x325   :  { %12545 = vst [vmem:[#allocation35_spill] sm:$0xff] %v10866_v63  ;;  %12548 = vst [vmem:[#allocation38_spill] sm:$0xff] %v10872_v60 }
 0x327   :  { %3090 = vmatpush1.bf16.msra.mxu0 %v10846_v5  ;;  %3131 = vmatpush1.bf16.msra.mxu1 %v10848_v28  ;;  %v10868_v5 = vld [vmem:[#allocation9 + $0xc] ss:$16 sps:$4 sm:$0xff]   ;;  %v10870_v28 = vld [vmem:[#allocation9] ss:$16 sps:$4 sm:$0xff]  }
 0x328   :  { %3091 = vmatprep.subr.bf16.mxu0 %v10854_v20  ;;  %3132 = vmatprep.subr.bf16.mxu1 %v10856_v56  ;;  %12546 = vst [vmem:[#allocation36_spill] sm:$0xff] %v10868_v5  ;;  %12547 = vst [vmem:[#allocation37_spill] sm:$0xff] %v10870_v28  ;;  %v10878_v56 = vld [vmem:[#allocation8 + $0xe4] ss:$16 sps:$4 sm:$0xff]  }
 0x329   :  { %12549 = vst [vmem:[#allocation39_spill] sm:$0xff] %v10878_v56 }
 0x32b   :  { %3092 = vmatpush1.bf16.msra.mxu0 %v10858_v59  ;;  %3133 = vmatpush1.bf16.msra.mxu1 %v10860_v55  ;;  %v10880_v59 = vld [vmem:[#allocation8 + $0xec] ss:$16 sps:$4 sm:$0xff]  }
 0x32c   :  { %3093 = vmatprep.subr.bf16.mxu0 %v10866_v63  ;;  %3134 = vmatprep.subr.bf16.mxu1 %v10868_v5  ;;  %12550 = vst [vmem:[#allocation40_spill] sm:$0xff] %v10880_v59 }
 0x32f   :  { %3094 = vmatpush1.bf16.msra.mxu0 %v10870_v28  ;;  %3135 = vmatpush1.bf16.msra.mxu1 %v10872_v60  ;;  %v2508_v60 = vld [vmem:[%s12160_s8] sm:$0xf] }
 0x330   :  { %3321 = vmatprep.subr.bf16.mxu0 %v10878_v56  ;;  %3362 = vmatprep.subr.bf16.mxu1 %v10880_v59  ;;  %v2513_v28 = vrot.slane %v2508_v60, %v12480_v1  ;;  %v2517_v56 = vrot.slane %v2508_v60, %v12481_v6  ;;  %v2525_v40 = vrot.slane %v2508_v60, %v12482_v30 }
 0x391   :  { %v2218_v55 = vpop.f32.mrf.mxu0  ;;  %v2259_v20 = vpop.f32.mrf.mxu1 }
 0x393   :  { %v2220_v54 = vpop.f32.mrf.mxu0  ;;  %v2261_v53 = vpop.f32.mrf.mxu1 }
 0x395   :  { %v2222_v52 = vpop.f32.mrf.mxu0  ;;  %v2263_v63 = vpop.f32.mrf.mxu1 }
 0x397   :  { %v2223_v51 = vpop.f32.mrf.mxu0  ;;  %v2264_v5 = vpop.f32.mrf.mxu1 }
 0x3b1   :  { %v2460_v50 = vpop.f32.mrf.mxu0  ;;  %v2501_v49 = vpop.f32.mrf.mxu1 }
 0x3b2   :  { %v2461_v48 = vadd.f32 %v2460_v50, %v2218_v55  ;;  %v2502_v50 = vadd.f32 %v2501_v49, %v2259_v20  ;;  %v2521_v55 = vrot.slane %v2508_v60, %v12483_v12  ;;  %v12552_v60 = vld [vmem:[#allocation75_spill] sm:$0xff] }
 0x3b3   :  { %v2462_v59 = vpop.f32.mrf.mxu0  ;;  %v2503_v47 = vpop.f32.mrf.mxu1 }
 0x3b4   :  { %v2530_v46 = vadd.f32 %v2513_v28, %v2461_v48  ;;  %v2463_v44 = vadd.f32 %v2462_v59, %v2220_v54  ;;  %v2504_v5 = vadd.f32 %v2503_v47, %v2261_v53  ;;  %v2532_v6 = vadd.f32 %v2521_v55, %v2502_v50 }
 0x3b5   :  { %v2464_v41 = vpop.f32.mrf.mxu0  ;;  %v2505_v52 = vpop.f32.mrf.mxu1 }
 0x3b6   :  { %v2534_v63 = vmul.f32 0.5, %v2530_v46  ;;  %v2531_v51 = vadd.f32 %v2517_v56, %v2463_v44  ;;  %v2533_v18 = vadd.f32 %v2525_v40, %v2504_v5  ;;  %v2536_v28 = vmul.f32 0.5, %v2532_v6 }
 0x3b7   :  { %v2465_v39 = vpop.f32.mrf.mxu0  ;;  %v2506_v38 = vpop.f32.mrf.mxu1 }
 0x3b8   :  { %9773 = vtanh.f32 %v2534_v63  ;;  %v2535_v1 = vmul.f32 0.5, %v2531_v51 }
 0x3ba   :  { %9775 = vtanh.f32 %v2535_v1 }
 0x3bb   :  { %9777 = vtanh.f32 %v2533_v18  ;;  %v12551_v18 = vld [vmem:[#allocation73_spill] sm:$0xff] }
 0x3bc   :  { %9779 = vtanh.f32 %v2536_v28 }
 0x3c5   :  { %v9774_v48 = vpop.eup %9773 }
 0x3c6   :  { %v2540_v41 = vmul.f32 0.5, %v9774_v48 }
 0x3c7   :  { %v9776_v54 = vpop.eup %9775 }
 0x3c8   :  { %v2543_v46 = vadd.f32 0.5, %v2540_v41  ;;  %v2541_v44 = vmul.f32 0.5, %v9776_v54  ;;  %v9778_v53 = vpop.eup %9777 }
 0x3c9   :  { %v9780_v63 = vpop.eup %9779 }
 0x3ca   :  { %v2544_v47 = vadd.f32 0.5, %v2541_v44  ;;  %v2548_v39 = vmul.f32 %v9778_v53, %v2543_v46  ;;  %v2542_v41 = vmul.f32 0.5, %v9780_v63  ;;  %v12554_v44 = vld [vmem:[#allocation74_spill] sm:$0xff]  ;;  %v10921_v63 = vld [vmem:[#allocation8 + $0xac] ss:$16 sps:$4 sm:$0xff]  }
 0x3cc   :  { %v2547_v38 = vmul.f32 %v2544_v47, %v10627_v34  ;;  %v12553_v34 = vld [vmem:[#allocation76_spill] sm:$0xff]  ;;  %v2545_v54 = vadd.f32 0.5, %v2542_v41 }
 0x3ce   :  { %v10892_v56 = vadd.f32 %v2548_v39, %v2547_v38  ;;  %v10901_v38 = vld [vmem:[#allocation8 + $0xe0] ss:$16 sps:$4 sm:$0xff]   ;;  %v10903_v39 = vld [vmem:[#allocation8 + $0xe8] ss:$16 sps:$4 sm:$0xff]  }
 0x3d0   :  { %9781 = vtanh.f32 %v10892_v56 }
 0x3d1   :  { %v2783_v20 = vpop.f32.mrf.mxu0  ;;  %v2824_v1 = vpop.f32.mrf.mxu1 }
 0x3d2   :  { %v2831_v40 = vadd.f32 %v2783_v20, %v12551_v18  ;;  %v2833_v47 = vadd.f32 %v2824_v1, %v12554_v44  ;;  %v10907_v18 = vld [vmem:[#allocation8 + $0xc4] ss:$16 sps:$4 sm:$0xff]   ;;  %v10913_v1 = vld [vmem:[#allocation8 + $0xc0] ss:$16 sps:$4 sm:$0xff]  }
 0x3d3   :  { %v2785_v6 = vpop.f32.mrf.mxu0  ;;  %v2826_v49 = vpop.f32.mrf.mxu1 }
 0x3d4   :  { %v2835_v59 = vmul.f32 0.5, %v2831_v40  ;;  %v2832_v52 = vadd.f32 %v2785_v6, %v12552_v60  ;;  %v2834_v55 = vadd.f32 %v2826_v49, %v12553_v34  ;;  %v10909_v40 = vld [vmem:[#allocation8 + $0xcc] ss:$16 sps:$4 sm:$0xff]   ;;  %v2837_v6 = vmul.f32 0.5, %v2833_v47  ;;  %v10940_v47 = vld [vmem:[#allocation8 + $0x80] ss:$16 sps:$4 sm:$0xff]  }
 0x3d5   :  { %v2787_v51 = vpop.f32.mrf.mxu0  ;;  %v2828_v5 = vpop.f32.mrf.mxu1 }
 0x3d6   :  { %9783 = vtanh.f32 %v2835_v59  ;;  %v2836_v50 = vmul.f32 0.5, %v2832_v52  ;;  %v10915_v59 = vld [vmem:[#allocation8 + $0xc8] ss:$16 sps:$4 sm:$0xff]   ;;  %v10919_v52 = vld [vmem:[#allocation8 + $0xa4] ss:$16 sps:$4 sm:$0xff]  }
 0x3d7   :  { %v2788_v28 = vpop.f32.mrf.mxu0  ;;  %v2829_v48 = vpop.f32.mrf.mxu1 }
 0x3d8   :  { %9785 = vtanh.f32 %v2836_v50  ;;  %v10929_v28 = vld [vmem:[#allocation8 + $0xa8] ss:$16 sps:$4 sm:$0xff]  }
 0x3d9   :  { %9787 = vtanh.f32 %v2834_v55  ;;  %v10927_v55 = vld [vmem:[#allocation8 + $0xa0] ss:$16 sps:$4 sm:$0xff]  }
 0x3da   :  { %9789 = vtanh.f32 %v2837_v6 }
 0x3dd   :  { %v9782_v46 = vpop.eup %9781 }
 0x3de   :  { %v10899_v53 = vmul.f32 %v9782_v46, %v2545_v54  ;;  %v10933_v54 = vld [vmem:[#allocation8 + $0x84] ss:$16 sps:$4 sm:$0xff]   ;;  %v10935_v46 = vld [vmem:[#allocation8 + $0x8c] ss:$16 sps:$4 sm:$0xff]  }
 0x3e0   :  { %12555 = vst [vmem:[#allocation41_spill] sm:$0xff] %v10899_v53  ;;  %v2886_v20 = vpack.c.bf16 %v10899_v53, %v10899_v53  ;;  %v10975_v53 = vld [vmem:[#allocation8 + $0x2c] ss:$16 sps:$4 sm:$0xff]  }
 0x3e1   :  { %12565 = vst [vmem:[#allocation51_spill] sm:$0xff] %v10975_v53 }
 0x3e2   :  { %3112 = vmatmul.mubr.bf16.vlgmr.msra.gmra.mxu0 %v2886_v20  ;;  %3153 = vmatmul.mubr.bf16.vlgmr.msra.gmra.mxu1 %v2886_v20  ;;  %v10942_v20 = vld [vmem:[#allocation8 + $0x88] ss:$16 sps:$4 sm:$0xff]  }
 0x3e3   :  { %v9784_v49 = vpop.eup %9783  ;;  %3322 = vmatpush1.bf16.msra.mxu0 %v10901_v38  ;;  %3363 = vmatpush1.bf16.msra.mxu1 %v10903_v39  ;;  %12556 = vst [vmem:[#allocation42_spill] sm:$0xff] %v10942_v20 }
 0x3e4   :  { %v2841_v60 = vmul.f32 0.5, %v9784_v49  ;;  %3323 = vmatprep.subr.bf16.mxu0 %v10907_v18  ;;  %3364 = vmatprep.subr.bf16.mxu1 %v10909_v40  ;;  %v10948_v49 = vld [vmem:[#allocation8 + $0x64] ss:$16 sps:$4 sm:$0xff]  }
 0x3e5   :  { %v9786_v51 = vpop.eup %9785  ;;  %3353 = vmatprep.mubr.bf16.mxu0 %v12399_v42  ;;  %3394 = vmatprep.mubr.bf16.mxu1 %v12399_v42  ;;  %12557 = vst [vmem:[#allocation43_spill] sm:$0xff] %v10948_v49 }
 0x3e6   :  { %v2844_v5 = vadd.f32 0.5, %v2841_v60  ;;  %v2842_v50 = vmul.f32 0.5, %v9786_v51  ;;  %v9788_v34 = vpop.eup %9787  ;;  %v10950_v60 = vld [vmem:[#allocation8 + $0x6c] ss:$16 sps:$4 sm:$0xff]   ;;  %v10957_v51 = vld [vmem:[#allocation8 + $0x68] ss:$16 sps:$4 sm:$0xff]  }
 0x3e7   :  { %3324 = vmatpush1.bf16.msra.mxu0 %v10913_v1  ;;  %3365 = vmatpush1.bf16.msra.mxu1 %v10915_v59  ;;  %12558 = vst [vmem:[#allocation44_spill] sm:$0xff] %v10950_v60  ;;  %12560 = vst [vmem:[#allocation46_spill] sm:$0xff] %v10957_v51 }
 0x3e8   :  { %v2845_v48 = vadd.f32 0.5, %v2842_v50  ;;  %v2849_v41 = vmul.f32 %v9788_v34, %v2844_v5  ;;  %3325 = vmatprep.subr.bf16.mxu0 %v10919_v52  ;;  %3366 = vmatprep.subr.bf16.mxu1 %v10921_v63  ;;  %v10961_v5 = vld [vmem:[#allocation8 + $0x44] ss:$16 sps:$4 sm:$0xff]   ;;  %v10963_v50 = vld [vmem:[#allocation8 + $0x4c] ss:$16 sps:$4 sm:$0xff]   ;;  %v9790_v34 = vpop.eup %9789 }
 0x3e9   :  { %12561 = vst [vmem:[#allocation47_spill] sm:$0xff] %v10961_v5  ;;  %12562 = vst [vmem:[#allocation48_spill] sm:$0xff] %v10963_v50 }
 0x3ea   :  { %v2848_v44 = vmul.f32 %v2845_v48, %v10653_v22  ;;  %v10955_v22 = vld [vmem:[#allocation8 + $0x60] ss:$16 sps:$4 sm:$0xff]  }
 0x3eb   :  { %3326 = vmatpush1.bf16.msra.mxu0 %v10927_v55  ;;  %3367 = vmatpush1.bf16.msra.mxu1 %v10929_v28  ;;  %12559 = vst [vmem:[#allocation45_spill] sm:$0xff] %v10955_v22  ;;  %v10967_v48 = vld [vmem:[#allocation8 + $0x40] ss:$16 sps:$4 sm:$0xff]  }
 0x3ec   :  { %v10944_v6 = vadd.f32 %v2849_v41, %v2848_v44  ;;  %3327 = vmatprep.subr.bf16.mxu0 %v10933_v54  ;;  %3368 = vmatprep.subr.bf16.mxu1 %v10935_v46  ;;  %v10969_v41 = vld [vmem:[#allocation8 + $0x48] ss:$16 sps:$4 sm:$0xff]   ;;  %v10973_v44 = vld [vmem:[#allocation8 + $0x24] ss:$16 sps:$4 sm:$0xff]  }
 0x3ed   :  { %12563 = vst [vmem:[#allocation49_spill] sm:$0xff] %v10969_v41  ;;  %12564 = vst [vmem:[#allocation50_spill] sm:$0xff] %v10973_v44 }
 0x3ee   :  { %9791 = vtanh.f32 %v10944_v6 }
 0x3ef   :  { %3328 = vmatpush1.bf16.msra.mxu0 %v10940_v47  ;;  %3369 = vmatpush1.bf16.msra.mxu1 %v10942_v20 }
 0x3f0   :  { %3329 = vmatprep.subr.bf16.mxu0 %v10948_v49  ;;  %3370 = vmatprep.subr.bf16.mxu1 %v10950_v60  ;;  %v2843_v60 = vmul.f32 0.5, %v9790_v34  ;;  %v10991_v34 = vld [vmem:[#allocation8] ss:$16 sps:$4 sm:$0xff]  }
 0x3f2   :  { %v2846_v49 = vadd.f32 0.5, %v2843_v60 }
 0x3f3   :  { %3330 = vmatpush1.bf16.msra.mxu0 %v10955_v22  ;;  %3371 = vmatpush1.bf16.msra.mxu1 %v10957_v51  ;;  %v10979_v22 = vld [vmem:[#allocation8 + $0x20] ss:$16 sps:$4 sm:$0xff]   ;;  %v10981_v51 = vld [vmem:[#allocation8 + $0x28] ss:$16 sps:$4 sm:$0xff]  }
 0x3f4   :  { %3331 = vmatprep.subr.bf16.mxu0 %v10961_v5  ;;  %3372 = vmatprep.subr.bf16.mxu1 %v10963_v50  ;;  %v10985_v5 = vld [vmem:[#allocation8 + $0x4] ss:$16 sps:$4 sm:$0xff]   ;;  %v10987_v50 = vld [vmem:[#allocation8 + $0xc] ss:$16 sps:$4 sm:$0xff]  }
 0x3f7   :  { %3332 = vmatpush1.bf16.msra.mxu0 %v10967_v48  ;;  %3373 = vmatpush1.bf16.msra.mxu1 %v10969_v41  ;;  %v10993_v41 = vld [vmem:[#allocation8 + $0x8] ss:$16 sps:$4 sm:$0xff]  }
 0x3f8   :  { %3333 = vmatprep.subr.bf16.mxu0 %v10973_v44  ;;  %3374 = vmatprep.subr.bf16.mxu1 %v10975_v53 }
 0x3fb   :  { %v9792_v20 = vpop.eup %9791  ;;  %3334 = vmatpush1.bf16.msra.mxu0 %v10979_v22  ;;  %3375 = vmatpush1.bf16.msra.mxu1 %v10981_v51 }
 0x3fc   :  { %3335 = vmatprep.subr.bf16.mxu0 %v10985_v5  ;;  %3376 = vmatprep.subr.bf16.mxu1 %v10987_v50  ;;  %v2852_v44 = vmul.f32 %v9792_v20, %v2846_v49 }
 0x3fe   :  { %v2853_v53 = vpack.c.bf16 %v2852_v44, %v2852_v44 }
 0x3ff   :  { %3336 = vmatpush1.bf16.msra.mxu0 %v10991_v34  ;;  %3377 = vmatpush1.bf16.msra.mxu1 %v10993_v41 }
 0x400   :  { %3644 = vmatprep.subr.bf16.mxu0 %v10674_v57  ;;  %3685 = vmatprep.subr.bf16.mxu1 %v10676_v58  ;;  %v12566_v57 = vld [vmem:[#allocation17_spill] sm:$0xff]  ;;  %v12567_v58 = vld [vmem:[#allocation15_spill] sm:$0xff] }
 0x402   :  { %3354 = vmatmul.mubr.bf16.vlgmr.msra.gmra.mxu0 %v2853_v53  ;;  %3395 = vmatmul.mubr.bf16.vlgmr.msra.gmra.mxu1 %v2853_v53 }
 0x403   :  { %3645 = vmatpush1.bf16.msra.mxu0 %v10680_v61  ;;  %3686 = vmatpush1.bf16.msra.mxu1 %v10682_v62  ;;  %v12568_v61 = vld [vmem:[#allocation19_spill] sm:$0xff]  ;;  %v12569_v62 = vld [vmem:[#allocation16_spill] sm:$0xff] }
 0x404   :  { %3646 = vmatprep.subr.bf16.mxu0 %v10688_v2  ;;  %3687 = vmatprep.subr.bf16.mxu1 %v10690_v3  ;;  %v12570_v2 = vld [vmem:[#allocation21_spill] sm:$0xff]  ;;  %v12571_v3 = vld [vmem:[#allocation18_spill] sm:$0xff] }
 0x405   :  { %3676 = vmatprep.mubr.bf16.mxu0 %v12399_v42  ;;  %3717 = vmatprep.mubr.bf16.mxu1 %v12399_v42 }
 0x407   :  { %3647 = vmatpush1.bf16.msra.mxu0 %v10696_v4  ;;  %3688 = vmatpush1.bf16.msra.mxu1 %v10698_v17  ;;  %v12572_v4 = vld [vmem:[#allocation25_spill] sm:$0xff]  ;;  %v12573_v17 = vld [vmem:[#allocation20_spill] sm:$0xff] }
 0x408   :  { %3648 = vmatprep.subr.bf16.mxu0 %v10702_v7  ;;  %3689 = vmatprep.subr.bf16.mxu1 %v10704_v8  ;;  %v12574_v7 = vld [vmem:[#allocation24_spill] sm:$0xff]  ;;  %v12575_v8 = vld [vmem:[#allocation23_spill] sm:$0xff] }
 0x40b   :  { %3649 = vmatpush1.bf16.msra.mxu0 %v10710_v10  ;;  %3690 = vmatpush1.bf16.msra.mxu1 %v10712_v13  ;;  %v12576_v10 = vld [vmem:[#allocation27_spill] sm:$0xff]  ;;  %v12577_v13 = vld [vmem:[#allocation22_spill] sm:$0xff] }
 0x40c   :  { %3650 = vmatprep.subr.bf16.mxu0 %v10716_v36  ;;  %3691 = vmatprep.subr.bf16.mxu1 %v10718_v23  ;;  %v12578_v36 = vld [vmem:[#allocation29_spill] sm:$0xff]  ;;  %v12579_v23 = vld [vmem:[#allocation26_spill] sm:$0xff] }
 0x40f   :  { %3651 = vmatpush1.bf16.msra.mxu0 %v10722_v21  ;;  %3692 = vmatpush1.bf16.msra.mxu1 %v10724_v32  ;;  %v12580_v21 = vld [vmem:[#allocation30_spill] sm:$0xff]  ;;  %v12581_v32 = vld [vmem:[#allocation28_spill] sm:$0xff] }
 0x410   :  { %3652 = vmatprep.subr.bf16.mxu0 %v10728_v9  ;;  %3693 = vmatprep.subr.bf16.mxu1 %v10730_v27  ;;  %v12582_v9 = vld [vmem:[#allocation31_spill] sm:$0xff]  ;;  %v12583_v27 = vld [vmem:[#allocation32_spill] sm:$0xff] }
 0x413   :  { %3653 = vmatpush1.bf16.msra.mxu0 %v10734_v24  ;;  %3694 = vmatpush1.bf16.msra.mxu1 %v10736_v26  ;;  %v12584_v24 = vld [vmem:[#allocation33_spill] sm:$0xff]  ;;  %v12585_v26 = vld [vmem:[#allocation67_spill] sm:$0xff] }
 0x414   :  { %3654 = vmatprep.subr.bf16.mxu0 %v10740_v16  ;;  %3695 = vmatprep.subr.bf16.mxu1 %v10742_v45  ;;  %v12586_v16 = vld [vmem:[#allocation65_spill] sm:$0xff]  ;;  %v12587_v45 = vld [vmem:[#allocation70_spill] sm:$0xff] }
 0x417   :  { %3655 = vmatpush1.bf16.msra.mxu0 %v10746_v43  ;;  %3696 = vmatpush1.bf16.msra.mxu1 %v10748_v19  ;;  %v12588_v43 = vld [vmem:[#allocation68_spill] sm:$0xff]  ;;  %v12589_v19 = vld [vmem:[#allocation71_spill] sm:$0xff] }
 0x418   :  { %3656 = vmatprep.subr.bf16.mxu0 %v10752_v14  ;;  %3697 = vmatprep.subr.bf16.mxu1 %v10754_v25  ;;  %v12590_v14 = vld [vmem:[#allocation69_spill] sm:$0xff]  ;;  %v12591_v25 = vld [vmem:[#allocation34_spill] sm:$0xff] }
 0x41b   :  { %3657 = vmatpush1.bf16.msra.mxu0 %v10758_v15  ;;  %3698 = vmatpush1.bf16.msra.mxu1 %v10760_v0  ;;  %v12592_v15 = vld [vmem:[#allocation35_spill] sm:$0xff]  ;;  %v12593_v0 = vld [vmem:[#allocation36_spill] sm:$0xff] }
 0x41c   :  { %3658 = vmatprep.subr.bf16.mxu0 %v10764_v11  ;;  %3699 = vmatprep.subr.bf16.mxu1 %v10766_v29  ;;  %v12594_v11 = vld [vmem:[#allocation37_spill] sm:$0xff]  ;;  %v12595_v29 = vld [vmem:[#allocation38_spill] sm:$0xff] }
 0x41f   :  { %3659 = vmatpush1.bf16.msra.mxu0 %v10770_v31  ;;  %3700 = vmatpush1.bf16.msra.mxu1 %v10772_v33  ;;  %v12596_v31 = vld [vmem:[#allocation39_spill] sm:$0xff]  ;;  %v12597_v33 = vld [vmem:[#allocation40_spill] sm:$0xff] }
 0x420   :  { %3974 = vmatprep.subr.bf16.mxu0 %v10782_v35  ;;  %4015 = vmatprep.subr.bf16.mxu1 %v10784_v37 }
 0x422   :  { %3677 = vmatmul.mubr.bf16.vlgmr.msra.gmra.mxu0 %v2853_v53  ;;  %3718 = vmatmul.mubr.bf16.vlgmr.msra.gmra.mxu1 %v2853_v53 }
 0x423   :  { %3975 = vmatpush1.bf16.msra.mxu0 %v12566_v57  ;;  %4016 = vmatpush1.bf16.msra.mxu1 %v12567_v58  ;;  %v3403_v58 = vld [vmem:[%s12160_s8] sm:$0xf] }
 0x424   :  { %3976 = vmatprep.subr.bf16.mxu0 %v12568_v61  ;;  %4017 = vmatprep.subr.bf16.mxu1 %v12569_v62  ;;  %v12598_v61 = vld [vmem:[#allocation64_spill] sm:$0xff] }
 0x425   :  { %4006 = vmatprep.mubr.bf16.mxu0 %v12399_v42  ;;  %4047 = vmatprep.mubr.bf16.mxu1 %v12399_v42  ;;  %v3408_v62 = vrot.slane %v3403_v58, %v12598_v61 }
 0x427   :  { %3977 = vmatpush1.bf16.msra.mxu0 %v12570_v2  ;;  %4018 = vmatpush1.bf16.msra.mxu1 %v12571_v3 }
 0x428   :  { %3978 = vmatprep.subr.bf16.mxu0 %v12572_v4  ;;  %4019 = vmatprep.subr.bf16.mxu1 %v12573_v17  ;;  %v12599_v17 = vld [vmem:[#allocation66_spill] sm:$0xff] }
 0x42b   :  { %3979 = vmatpush1.bf16.msra.mxu0 %v12574_v7  ;;  %4020 = vmatpush1.bf16.msra.mxu1 %v12575_v8  ;;  %v3412_v7 = vrot.slane %v3403_v58, %v12599_v17 }
 0x42c   :  { %3980 = vmatprep.subr.bf16.mxu0 %v12576_v10  ;;  %4021 = vmatprep.subr.bf16.mxu1 %v12577_v13 }
 0x42f   :  { %3981 = vmatpush1.bf16.msra.mxu0 %v12578_v36  ;;  %4022 = vmatpush1.bf16.msra.mxu1 %v12579_v23 }
 0x430   :  { %3982 = vmatprep.subr.bf16.mxu0 %v12580_v21  ;;  %4023 = vmatprep.subr.bf16.mxu1 %v12581_v32 }
 0x433   :  { %3983 = vmatpush1.bf16.msra.mxu0 %v12582_v9  ;;  %4024 = vmatpush1.bf16.msra.mxu1 %v12583_v27 }
 0x434   :  { %3984 = vmatprep.subr.bf16.mxu0 %v12584_v24  ;;  %4025 = vmatprep.subr.bf16.mxu1 %v12585_v26  ;;  %v3420_v24 = vrot.slane %v3403_v58, %v12482_v30 }
 0x437   :  { %3985 = vmatpush1.bf16.msra.mxu0 %v12586_v16  ;;  %4026 = vmatpush1.bf16.msra.mxu1 %v12587_v45 }
 0x438   :  { %3986 = vmatprep.subr.bf16.mxu0 %v12588_v43  ;;  %4027 = vmatprep.subr.bf16.mxu1 %v12589_v19 }
 0x43b   :  { %3987 = vmatpush1.bf16.msra.mxu0 %v12590_v14  ;;  %4028 = vmatpush1.bf16.msra.mxu1 %v12591_v25  ;;  %v3416_v14 = vrot.slane %v3403_v58, %v12483_v12  ;;  %v12601_v58 = vld [vmem:[#allocation79_spill] sm:$0xff] }
 0x43c   :  { %3988 = vmatprep.subr.bf16.mxu0 %v12592_v15  ;;  %4029 = vmatprep.subr.bf16.mxu1 %v12593_v0 }
 0x43f   :  { %3989 = vmatpush1.bf16.msra.mxu0 %v12594_v11  ;;  %4030 = vmatpush1.bf16.msra.mxu1 %v12595_v29 }
 0x440   :  { %4216 = vmatprep.subr.bf16.mxu0 %v12596_v31  ;;  %4257 = vmatprep.subr.bf16.mxu1 %v12597_v33 }
 0x4a2   :  { %v3113_v35 = vpop.f32.mrf.mxu0  ;;  %v3154_v37 = vpop.f32.mrf.mxu1 }
 0x4a4   :  { %v3115_v53 = vpop.f32.mrf.mxu0  ;;  %v3156_v20 = vpop.f32.mrf.mxu1 }
 0x4a6   :  { %v3117_v49 = vpop.f32.mrf.mxu0  ;;  %v3158_v60 = vpop.f32.mrf.mxu1 }
 0x4a8   :  { %v3118_v44 = vpop.f32.mrf.mxu0  ;;  %v3159_v57 = vpop.f32.mrf.mxu1 }
 0x4a9   :  { %v12600_v57 = vld [vmem:[#allocation72_spill] sm:$0xff] }
 0x4c2   :  { %v3355_v2 = vpop.f32.mrf.mxu0  ;;  %v3396_v3 = vpop.f32.mrf.mxu1 }
 0x4c3   :  { %v3356_v4 = vadd.f32 %v3355_v2, %v3113_v35  ;;  %v3397_v19 = vadd.f32 %v3396_v3, %v3154_v37  ;;  %v12602_v2 = vld [vmem:[#allocation77_spill] sm:$0xff] }
 0x4c4   :  { %v3357_v8 = vpop.f32.mrf.mxu0  ;;  %v3398_v10 = vpop.f32.mrf.mxu1 }
 0x4c5   :  { %v3425_v13 = vadd.f32 %v3408_v62, %v3356_v4  ;;  %v3358_v36 = vadd.f32 %v3357_v8, %v3115_v53  ;;  %v3399_v27 = vadd.f32 %v3398_v10, %v3156_v20  ;;  %v3427_v25 = vadd.f32 %v3416_v14, %v3397_v19 }
 0x4c6   :  { %v3359_v23 = vpop.f32.mrf.mxu0  ;;  %v3400_v21 = vpop.f32.mrf.mxu1  ;;  %v629_v62 = vadd.f32 %v12601_v58, %v12600_v57  ;;  %v11303_v57 = vld [vmem:[#allocation9 + $0x24] ss:$16 sps:$4 sm:$0xff]  }
 0x4c7   :  { %v3429_v32 = vmul.f32 0.5, %v3425_v13  ;;  %v3426_v9 = vadd.f32 %v3412_v7, %v3358_v36  ;;  %v3428_v43 = vadd.f32 %v3420_v24, %v3399_v27  ;;  %v3431_v15 = vmul.f32 0.5, %v3427_v25  ;;  %v12603_v21 = vld [vmem:[#allocation80_spill] sm:$0xff]  ;;  %12638 = vst [vmem:[#allocation20_spill] sm:$0xff] %v11303_v57 }
 0x4c8   :  { %v3360_v26 = vpop.f32.mrf.mxu0  ;;  %v3401_v16 = vpop.f32.mrf.mxu1 }
 0x4c9   :  { %9793 = vtanh.f32 %v3429_v32  ;;  %v3430_v45 = vmul.f32 0.5, %v3426_v9 }
 0x4cb   :  { %9795 = vtanh.f32 %v3430_v45  ;;  %v12604_v45 = vld [vmem:[#allocation78_spill] sm:$0xff] }
 0x4cc   :  { %9797 = vtanh.f32 %v3428_v43 }
 0x4cd   :  { %9799 = vtanh.f32 %v3431_v15 }
 0x4d6   :  { %v9794_v0 = vpop.eup %9793 }
 0x4d7   :  { %v3435_v11 = vmul.f32 0.5, %v9794_v0 }
 0x4d8   :  { %v9796_v29 = vpop.eup %9795 }
 0x4d9   :  { %v3438_v31 = vadd.f32 0.5, %v3435_v11  ;;  %v3436_v33 = vmul.f32 0.5, %v9796_v29  ;;  %v9798_v53 = vpop.eup %9797 }
 0x4da   :  { %v9800_v13 = vpop.eup %9799 }
 0x4db   :  { %v3439_v35 = vadd.f32 0.5, %v3436_v33  ;;  %v3443_v49 = vmul.f32 %v9798_v53, %v3438_v31  ;;  %v3437_v24 = vmul.f32 0.5, %v9800_v13  ;;  %v12615_v53 = vld [vmem:[#allocation51_spill] sm:$0xff] }
 0x4dc   :  { %v11173_v13 = vld [vmem:[#allocation6 + $0x88] ss:$16 sps:$4 sm:$0xff]  }
 0x4dd   :  { %v3442_v20 = vmul.f32 %v3439_v35, %v10892_v56  ;;  %v3440_v26 = vadd.f32 0.5, %v3437_v24  ;;  %v12613_v35 = vld [vmem:[#allocation49_spill] sm:$0xff] }
 0x4de   :  { %v11197_v24 = vld [vmem:[#allocation6 + $0x48] ss:$16 sps:$4 sm:$0xff]  }
 0x4df   :  { %v11077_v60 = vadd.f32 %v3443_v49, %v3442_v20 }
 0x4e1   :  { %9801 = vtanh.f32 %v11077_v60 }
 0x4e2   :  { %v3678_v37 = vpop.f32.mrf.mxu0  ;;  %v3719_v44 = vpop.f32.mrf.mxu1 }
 0x4e3   :  { %v3726_v3 = vadd.f32 %v3678_v37, %v12602_v2  ;;  %v3728_v43 = vadd.f32 %v3719_v44, %v12604_v45  ;;  %v11123_v44 = vld [vmem:[#allocation6 + $0xe4] ss:$16 sps:$4 sm:$0xff]   ;;  %v11153_v2 = vld [vmem:[#allocation6 + $0xac] ss:$16 sps:$4 sm:$0xff]   ;;  %v11207_v45 = vld [vmem:[#allocation6 + $0x20] ss:$16 sps:$4 sm:$0xff]  }
 0x4e4   :  { %v3680_v4 = vpop.f32.mrf.mxu0  ;;  %v3721_v7 = vpop.f32.mrf.mxu1 }
 0x4e5   :  { %v3730_v8 = vmul.f32 0.5, %v3726_v3  ;;  %v3727_v10 = vadd.f32 %v3680_v4, %v629_v62  ;;  %v3729_v32 = vadd.f32 %v3721_v7, %v12603_v21  ;;  %v3732_v25 = vmul.f32 0.5, %v3728_v43  ;;  %v11131_v62 = vld [vmem:[#allocation6 + $0xe0] ss:$16 sps:$4 sm:$0xff]   ;;  %v11161_v4 = vld [vmem:[#allocation6 + $0xa8] ss:$16 sps:$4 sm:$0xff]  }
 0x4e6   :  { %v3682_v36 = vpop.f32.mrf.mxu0  ;;  %v3723_v23 = vpop.f32.mrf.mxu1  ;;  %v11159_v3 = vld [vmem:[#allocation6 + $0xa0] ss:$16 sps:$4 sm:$0xff]   ;;  %v11165_v7 = vld [vmem:[#allocation6 + $0x84] ss:$16 sps:$4 sm:$0xff]   ;;  %v11185_v21 = vld [vmem:[#allocation6 + $0x68] ss:$16 sps:$4 sm:$0xff]  }
 0x4e7   :  { %9803 = vtanh.f32 %v3730_v8  ;;  %v3731_v56 = vmul.f32 0.5, %v3727_v10  ;;  %v11167_v8 = vld [vmem:[#allocation6 + $0x8c] ss:$16 sps:$4 sm:$0xff]   ;;  %v11171_v10 = vld [vmem:[#allocation6 + $0x80] ss:$16 sps:$4 sm:$0xff]  }
 0x4e8   :  { %v3683_v9 = vpop.f32.mrf.mxu0  ;;  %v3724_v27 = vpop.f32.mrf.mxu1  ;;  %v11177_v36 = vld [vmem:[#allocation6 + $0x64] ss:$16 sps:$4 sm:$0xff]   ;;  %v11179_v23 = vld [vmem:[#allocation6 + $0x6c] ss:$16 sps:$4 sm:$0xff]   ;;  %v11209_v43 = vld [vmem:[#allocation6 + $0x28] ss:$16 sps:$4 sm:$0xff]  }
 0x4e9   :  { %9805 = vtanh.f32 %v3731_v56  ;;  %v11183_v56 = vld [vmem:[#allocation6 + $0x60] ss:$16 sps:$4 sm:$0xff]   ;;  %v11191_v9 = vld [vmem:[#allocation6 + $0x4c] ss:$16 sps:$4 sm:$0xff]  }
 0x4ea   :  { %9807 = vtanh.f32 %v3729_v32  ;;  %v11189_v32 = vld [vmem:[#allocation6 + $0x44] ss:$16 sps:$4 sm:$0xff]   ;;  %v11195_v27 = vld [vmem:[#allocation6 + $0x40] ss:$16 sps:$4 sm:$0xff]  }
 0x4eb   :  { %9809 = vtanh.f32 %v3732_v25  ;;  %v11215_v25 = vld [vmem:[#allocation6 + $0xc] ss:$16 sps:$4 sm:$0xff]  }
 0x4ee   :  { %v9802_v16 = vpop.eup %9801 }
 0x4ef   :  { %v11085_v19 = vmul.f32 %v9802_v16, %v3440_v26  ;;  %v11201_v26 = vld [vmem:[#allocation6 + $0x24] ss:$16 sps:$4 sm:$0xff]   ;;  %v11203_v16 = vld [vmem:[#allocation6 + $0x2c] ss:$16 sps:$4 sm:$0xff]  }
 0x4f1   :  { %12605 = vst [vmem:[#allocation52_spill] sm:$0xff] %v11085_v19  ;;  %v3781_v14 = vpack.c.bf16 %v11085_v19, %v11085_v19  ;;  %v11297_v19 = vld [vmem:[#allocation9 + $0x48] ss:$16 sps:$4 sm:$0xff]  }
 0x4f2   :  { %12637 = vst [vmem:[#allocation25_spill] sm:$0xff] %v11297_v19 }
 0x4f3   :  { %4007 = vmatmul.mubr.bf16.vlgmr.msra.gmra.mxu0 %v3781_v14  ;;  %4048 = vmatmul.mubr.bf16.vlgmr.msra.gmra.mxu1 %v3781_v14  ;;  %v11213_v14 = vld [vmem:[#allocation6 + $0x4] ss:$16 sps:$4 sm:$0xff]  }
 0x4f4   :  { %v9804_v15 = vpop.eup %9803  ;;  %4217 = vmatpush1.bf16.msra.mxu0 %v10901_v38  ;;  %4258 = vmatpush1.bf16.msra.mxu1 %v10903_v39 }
 0x4f5   :  { %v3736_v0 = vmul.f32 0.5, %v9804_v15  ;;  %4218 = vmatprep.subr.bf16.mxu0 %v10907_v18  ;;  %4259 = vmatprep.subr.bf16.mxu1 %v10909_v40  ;;  %v11219_v15 = vld [vmem:[#allocation6] ss:$16 sps:$4 sm:$0xff]  }
 0x4f6   :  { %v9806_v11 = vpop.eup %9805  ;;  %4248 = vmatprep.mubr.bf16.mxu0 %v12399_v42  ;;  %4289 = vmatprep.mubr.bf16.mxu1 %v12399_v42 }
 0x4f7   :  { %v3739_v29 = vadd.f32 0.5, %v3736_v0  ;;  %v3737_v31 = vmul.f32 0.5, %v9806_v11  ;;  %v9808_v33 = vpop.eup %9807  ;;  %v11221_v0 = vld [vmem:[#allocation6 + $0x8] ss:$16 sps:$4 sm:$0xff]   ;;  %v11231_v11 = vld [vmem:[#allocation9 + $0xe4] ss:$16 sps:$4 sm:$0xff]  }
 0x4f8   :  { %4219 = vmatpush1.bf16.msra.mxu0 %v10913_v1  ;;  %4260 = vmatpush1.bf16.msra.mxu1 %v10915_v59  ;;  %v12606_v1 = vld [vmem:[#allocation42_spill] sm:$0xff]  ;;  %v12607_v59 = vld [vmem:[#allocation43_spill] sm:$0xff] }
 0x4f9   :  { %v3740_v38 = vadd.f32 0.5, %v3737_v31  ;;  %v3744_v39 = vmul.f32 %v9808_v33, %v3739_v29  ;;  %4220 = vmatprep.subr.bf16.mxu0 %v10919_v52  ;;  %4261 = vmatprep.subr.bf16.mxu1 %v10921_v63  ;;  %v12608_v52 = vld [vmem:[#allocation44_spill] sm:$0xff]  ;;  %v9810_v63 = vpop.eup %9809  ;;  %v11233_v29 = vld [vmem:[#allocation9 + $0xec] ss:$16 sps:$4 sm:$0xff]   ;;  %v11237_v33 = vld [vmem:[#allocation9 + $0xe8] ss:$16 sps:$4 sm:$0xff]  }
 0x4fa   :  { %v11235_v31 = vld [vmem:[#allocation9 + $0xe0] ss:$16 sps:$4 sm:$0xff]   ;;  %12617 = vst [vmem:[#allocation54_spill] sm:$0xff] %v11237_v33 }
 0x4fb   :  { %v3743_v18 = vmul.f32 %v3740_v38, %v10944_v6  ;;  %v12611_v6 = vld [vmem:[#allocation47_spill] sm:$0xff]  ;;  %12616 = vst [vmem:[#allocation53_spill] sm:$0xff] %v11235_v31  ;;  %v11243_v38 = vld [vmem:[#allocation9 + $0xc4] ss:$16 sps:$4 sm:$0xff]  }
 0x4fc   :  { %4221 = vmatpush1.bf16.msra.mxu0 %v10927_v55  ;;  %4262 = vmatpush1.bf16.msra.mxu1 %v10929_v28  ;;  %v12609_v55 = vld [vmem:[#allocation45_spill] sm:$0xff]  ;;  %v12610_v28 = vld [vmem:[#allocation46_spill] sm:$0xff]  ;;  %12618 = vst [vmem:[#allocation55_spill] sm:$0xff] %v11243_v38 }
 0x4fd   :  { %v11102_v40 = vadd.f32 %v3744_v39, %v3743_v18  ;;  %4222 = vmatprep.subr.bf16.mxu0 %v10933_v54  ;;  %4263 = vmatprep.subr.bf16.mxu1 %v10935_v46  ;;  %v12612_v54 = vld [vmem:[#allocation48_spill] sm:$0xff]  ;;  %v3738_v46 = vmul.f32 0.5, %v9810_v63  ;;  %v11245_v39 = vld [vmem:[#allocation9 + $0xcc] ss:$16 sps:$4 sm:$0xff]  }
 0x4fe   :  { %12619 = vst [vmem:[#allocation56_spill] sm:$0xff] %v11245_v39  ;;  %v11247_v18 = vld [vmem:[#allocation9 + $0xc0] ss:$16 sps:$4 sm:$0xff]  }
 0x4ff   :  { %9811 = vtanh.f32 %v11102_v40  ;;  %v3741_v20 = vadd.f32 0.5, %v3738_v46  ;;  %12620 = vst [vmem:[#allocation57_spill] sm:$0xff] %v11247_v18  ;;  %v11259_v63 = vld [vmem:[#allocation9 + $0xa0] ss:$16 sps:$4 sm:$0xff]   ;;  %v11273_v46 = vld [vmem:[#allocation9 + $0x88] ss:$16 sps:$4 sm:$0xff]  }
 0x500   :  { %4223 = vmatpush1.bf16.msra.mxu0 %v10940_v47  ;;  %4264 = vmatpush1.bf16.msra.mxu1 %v12606_v1  ;;  %v12614_v47 = vld [vmem:[#allocation50_spill] sm:$0xff]  ;;  %v11249_v1 = vld [vmem:[#allocation9 + $0xc8] ss:$16 sps:$4 sm:$0xff]   ;;  %12624 = vst [vmem:[#allocation61_spill] sm:$0xff] %v11259_v63  ;;  %12629 = vst [vmem:[#allocation76_spill] sm:$0xff] %v11273_v46 }
 0x501   :  { %4224 = vmatprep.subr.bf16.mxu0 %v12607_v59  ;;  %4265 = vmatprep.subr.bf16.mxu1 %v12608_v52  ;;  %12621 = vst [vmem:[#allocation58_spill] sm:$0xff] %v11249_v1  ;;  %v11255_v59 = vld [vmem:[#allocation9 + $0xa4] ss:$16 sps:$4 sm:$0xff]   ;;  %v11257_v52 = vld [vmem:[#allocation9 + $0xac] ss:$16 sps:$4 sm:$0xff]  }
 0x502   :  { %12622 = vst [vmem:[#allocation59_spill] sm:$0xff] %v11255_v59  ;;  %12623 = vst [vmem:[#allocation60_spill] sm:$0xff] %v11257_v52 }
 0x504   :  { %4225 = vmatpush1.bf16.msra.mxu0 %v12609_v55  ;;  %4266 = vmatpush1.bf16.msra.mxu1 %v12610_v28  ;;  %v11261_v55 = vld [vmem:[#allocation9 + $0xa8] ss:$16 sps:$4 sm:$0xff]   ;;  %v11267_v28 = vld [vmem:[#allocation9 + $0x84] ss:$16 sps:$4 sm:$0xff]  }
 0x505   :  { %4226 = vmatprep.subr.bf16.mxu0 %v12611_v6  ;;  %4267 = vmatprep.subr.bf16.mxu1 %v12612_v54  ;;  %12625 = vst [vmem:[#allocation62_spill] sm:$0xff] %v11261_v55  ;;  %12626 = vst [vmem:[#allocation63_spill] sm:$0xff] %v11267_v28  ;;  %v11269_v6 = vld [vmem:[#allocation9 + $0x8c] ss:$16 sps:$4 sm:$0xff]   ;;  %v11271_v54 = vld [vmem:[#allocation9 + $0x80] ss:$16 sps:$4 sm:$0xff]  }
 0x506   :  { %12627 = vst [vmem:[#allocation73_spill] sm:$0xff] %v11269_v6  ;;  %12628 = vst [vmem:[#allocation75_spill] sm:$0xff] %v11271_v54 }
 0x508   :  { %4227 = vmatpush1.bf16.msra.mxu0 %v10967_v48  ;;  %4268 = vmatpush1.bf16.msra.mxu1 %v12613_v35  ;;  %v11125_v48 = vld [vmem:[#allocation6 + $0xec] ss:$16 sps:$4 sm:$0xff]   ;;  %v11279_v35 = vld [vmem:[#allocation9 + $0x64] ss:$16 sps:$4 sm:$0xff]  }
 0x509   :  { %4228 = vmatprep.subr.bf16.mxu0 %v12614_v47  ;;  %4269 = vmatprep.subr.bf16.mxu1 %v12615_v53  ;;  %12630 = vst [vmem:[#allocation74_spill] sm:$0xff] %v11279_v35  ;;  %v11281_v47 = vld [vmem:[#allocation9 + $0x6c] ss:$16 sps:$4 sm:$0xff]   ;;  %v11283_v53 = vld [vmem:[#allocation9 + $0x60] ss:$16 sps:$4 sm:$0xff]  }
 0x50a   :  { %12631 = vst [vmem:[#allocation17_spill] sm:$0xff] %v11281_v47  ;;  %12632 = vst [vmem:[#allocation15_spill] sm:$0xff] %v11283_v53 }
 0x50c   :  { %v9812_v49 = vpop.eup %9811  ;;  %4229 = vmatpush1.bf16.msra.mxu0 %v10979_v22  ;;  %4270 = vmatpush1.bf16.msra.mxu1 %v10981_v51  ;;  %v11133_v22 = vld [vmem:[#allocation6 + $0xe8] ss:$16 sps:$4 sm:$0xff]   ;;  %v11137_v51 = vld [vmem:[#allocation6 + $0xc4] ss:$16 sps:$4 sm:$0xff]  }
 0x50d   :  { %4230 = vmatprep.subr.bf16.mxu0 %v10985_v5  ;;  %4271 = vmatprep.subr.bf16.mxu1 %v10987_v50  ;;  %v3747_v37 = vmul.f32 %v9812_v49, %v3741_v20  ;;  %v11139_v5 = vld [vmem:[#allocation6 + $0xcc] ss:$16 sps:$4 sm:$0xff]   ;;  %v11145_v50 = vld [vmem:[#allocation6 + $0xc0] ss:$16 sps:$4 sm:$0xff]   ;;  %v11285_v20 = vld [vmem:[#allocation9 + $0x68] ss:$16 sps:$4 sm:$0xff]  }
 0x50e   :  { %12633 = vst [vmem:[#allocation19_spill] sm:$0xff] %v11285_v20  ;;  %v11291_v49 = vld [vmem:[#allocation9 + $0x44] ss:$16 sps:$4 sm:$0xff]  }
 0x50f   :  { %v11127_v58 = vpack.c.bf16 %v3747_v37, %v3747_v37  ;;  %12634 = vst [vmem:[#allocation16_spill] sm:$0xff] %v11291_v49  ;;  %v11293_v37 = vld [vmem:[#allocation9 + $0x4c] ss:$16 sps:$4 sm:$0xff]  }
 0x510   :  { %4231 = vmatpush1.bf16.msra.mxu0 %v10991_v34  ;;  %4272 = vmatpush1.bf16.msra.mxu1 %v10993_v41  ;;  %v11147_v41 = vld [vmem:[#allocation6 + $0xc8] ss:$16 sps:$4 sm:$0xff]   ;;  %v11151_v34 = vld [vmem:[#allocation6 + $0xa4] ss:$16 sps:$4 sm:$0xff]   ;;  %12635 = vst [vmem:[#allocation21_spill] sm:$0xff] %v11293_v37 }
 0x511   :  { %4539 = vmatprep.subr.bf16.mxu0 %v11123_v44  ;;  %4580 = vmatprep.subr.bf16.mxu1 %v11125_v48 }
 0x513   :  { %4249 = vmatmul.mubr.bf16.vlgmr.msra.gmra.mxu0 %v11127_v58  ;;  %4290 = vmatmul.mubr.bf16.vlgmr.msra.gmra.mxu1 %v11127_v58 }
 0x514   :  { %4540 = vmatpush1.bf16.msra.mxu0 %v11131_v62  ;;  %4581 = vmatpush1.bf16.msra.mxu1 %v11133_v22 }
 0x515   :  { %4541 = vmatprep.subr.bf16.mxu0 %v11137_v51  ;;  %4582 = vmatprep.subr.bf16.mxu1 %v11139_v5 }
 0x516   :  { %4571 = vmatprep.mubr.bf16.mxu0 %v12399_v42  ;;  %4612 = vmatprep.mubr.bf16.mxu1 %v12399_v42 }
 0x518   :  { %4542 = vmatpush1.bf16.msra.mxu0 %v11145_v50  ;;  %4583 = vmatpush1.bf16.msra.mxu1 %v11147_v41 }
 0x519   :  { %4543 = vmatprep.subr.bf16.mxu0 %v11151_v34  ;;  %4584 = vmatprep.subr.bf16.mxu1 %v11153_v2 }
 0x51c   :  { %4544 = vmatpush1.bf16.msra.mxu0 %v11159_v3  ;;  %4585 = vmatpush1.bf16.msra.mxu1 %v11161_v4 }
 0x51d   :  { %4545 = vmatprep.subr.bf16.mxu0 %v11165_v7  ;;  %4586 = vmatprep.subr.bf16.mxu1 %v11167_v8 }
 0x520   :  { %4546 = vmatpush1.bf16.msra.mxu0 %v11171_v10  ;;  %4587 = vmatpush1.bf16.msra.mxu1 %v11173_v13 }
 0x521   :  { %4547 = vmatprep.subr.bf16.mxu0 %v11177_v36  ;;  %4588 = vmatprep.subr.bf16.mxu1 %v11179_v23 }
 0x524   :  { %4548 = vmatpush1.bf16.msra.mxu0 %v11183_v56  ;;  %4589 = vmatpush1.bf16.msra.mxu1 %v11185_v21 }
 0x525   :  { %4549 = vmatprep.subr.bf16.mxu0 %v11189_v32  ;;  %4590 = vmatprep.subr.bf16.mxu1 %v11191_v9 }
 0x528   :  { %4550 = vmatpush1.bf16.msra.mxu0 %v11195_v27  ;;  %4591 = vmatpush1.bf16.msra.mxu1 %v11197_v24 }
 0x529   :  { %4551 = vmatprep.subr.bf16.mxu0 %v11201_v26  ;;  %4592 = vmatprep.subr.bf16.mxu1 %v11203_v16 }
 0x52c   :  { %4552 = vmatpush1.bf16.msra.mxu0 %v11207_v45  ;;  %4593 = vmatpush1.bf16.msra.mxu1 %v11209_v43 }
 0x52d   :  { %4553 = vmatprep.subr.bf16.mxu0 %v11213_v14  ;;  %4594 = vmatprep.subr.bf16.mxu1 %v11215_v25 }
 0x530   :  { %4554 = vmatpush1.bf16.msra.mxu0 %v11219_v15  ;;  %4595 = vmatpush1.bf16.msra.mxu1 %v11221_v0 }
 0x531   :  { %4869 = vmatprep.subr.bf16.mxu0 %v11231_v11  ;;  %4910 = vmatprep.subr.bf16.mxu1 %v11233_v29 }
 0x533   :  { %4572 = vmatmul.mubr.bf16.vlgmr.msra.gmra.mxu0 %v11127_v58  ;;  %4613 = vmatmul.mubr.bf16.vlgmr.msra.gmra.mxu1 %v11127_v58  ;;  %v11295_v58 = vld [vmem:[#allocation9 + $0x40] ss:$16 sps:$4 sm:$0xff]  }
 0x534   :  { %4901 = vmatprep.mubr.bf16.mxu0 %v12399_v42  ;;  %4942 = vmatprep.mubr.bf16.mxu1 %v12399_v42  ;;  %12636 = vst [vmem:[#allocation18_spill] sm:$0xff] %v11295_v58 }
 0x535   :  { %4870 = vmatpush1.bf16.msra.mxu0 %v11235_v31  ;;  %4911 = vmatpush1.bf16.msra.mxu1 %v11237_v33 }
 0x536   :  { %4871 = vmatprep.subr.bf16.mxu0 %v11243_v38  ;;  %4912 = vmatprep.subr.bf16.mxu1 %v11245_v39 }
 0x539   :  { %4872 = vmatpush1.bf16.msra.mxu0 %v11247_v18  ;;  %4913 = vmatpush1.bf16.msra.mxu1 %v11249_v1 }
 0x53a   :  { %4873 = vmatprep.subr.bf16.mxu0 %v11255_v59  ;;  %4914 = vmatprep.subr.bf16.mxu1 %v11257_v52 }
 0x53d   :  { %4874 = vmatpush1.bf16.msra.mxu0 %v11259_v63  ;;  %4915 = vmatpush1.bf16.msra.mxu1 %v11261_v55 }
 0x53e   :  { %4875 = vmatprep.subr.bf16.mxu0 %v11267_v28  ;;  %4916 = vmatprep.subr.bf16.mxu1 %v11269_v6 }
 0x541   :  { %4876 = vmatpush1.bf16.msra.mxu0 %v11271_v54  ;;  %4917 = vmatpush1.bf16.msra.mxu1 %v11273_v46 }
 0x542   :  { %4877 = vmatprep.subr.bf16.mxu0 %v11279_v35  ;;  %4918 = vmatprep.subr.bf16.mxu1 %v11281_v47  ;;  %v11309_v47 = vld [vmem:[#allocation9 + $0x28] ss:$16 sps:$4 sm:$0xff]  }
 0x543   :  { %12641 = vst [vmem:[#allocation27_spill] sm:$0xff] %v11309_v47 }
 0x545   :  { %4878 = vmatpush1.bf16.msra.mxu0 %v11283_v53  ;;  %4919 = vmatpush1.bf16.msra.mxu1 %v11285_v20  ;;  %v11305_v53 = vld [vmem:[#allocation9 + $0x2c] ss:$16 sps:$4 sm:$0xff]   ;;  %v11307_v20 = vld [vmem:[#allocation9 + $0x20] ss:$16 sps:$4 sm:$0xff]  }
 0x546   :  { %4879 = vmatprep.subr.bf16.mxu0 %v11291_v49  ;;  %4920 = vmatprep.subr.bf16.mxu1 %v11293_v37  ;;  %12639 = vst [vmem:[#allocation24_spill] sm:$0xff] %v11305_v53  ;;  %12640 = vst [vmem:[#allocation23_spill] sm:$0xff] %v11307_v20  ;;  %v11315_v37 = vld [vmem:[#allocation9 + $0x4] ss:$16 sps:$4 sm:$0xff]   ;;  %v11321_v49 = vld [vmem:[#allocation9 + $0x8] ss:$16 sps:$4 sm:$0xff]  }
 0x547   :  { %12642 = vst [vmem:[#allocation22_spill] sm:$0xff] %v11315_v37  ;;  %12645 = vst [vmem:[#allocation30_spill] sm:$0xff] %v11321_v49 }
 0x549   :  { %4880 = vmatpush1.bf16.msra.mxu0 %v11295_v58  ;;  %4921 = vmatpush1.bf16.msra.mxu1 %v11297_v19  ;;  %v11317_v58 = vld [vmem:[#allocation9 + $0xc] ss:$16 sps:$4 sm:$0xff]   ;;  %v11319_v19 = vld [vmem:[#allocation9] ss:$16 sps:$4 sm:$0xff]  }
 0x54a   :  { %4881 = vmatprep.subr.bf16.mxu0 %v11303_v57  ;;  %4922 = vmatprep.subr.bf16.mxu1 %v11305_v53  ;;  %12643 = vst [vmem:[#allocation29_spill] sm:$0xff] %v11317_v58  ;;  %12644 = vst [vmem:[#allocation26_spill] sm:$0xff] %v11319_v19  ;;  %v11327_v53 = vld [vmem:[#allocation8 + $0xe4] ss:$16 sps:$4 sm:$0xff]  }
 0x54b   :  { %12646 = vst [vmem:[#allocation28_spill] sm:$0xff] %v11327_v53 }
 0x54d   :  { %4882 = vmatpush1.bf16.msra.mxu0 %v11307_v20  ;;  %4923 = vmatpush1.bf16.msra.mxu1 %v11309_v47  ;;  %v11329_v20 = vld [vmem:[#allocation8 + $0xec] ss:$16 sps:$4 sm:$0xff]  }
 0x54e   :  { %4883 = vmatprep.subr.bf16.mxu0 %v11315_v37  ;;  %4924 = vmatprep.subr.bf16.mxu1 %v11317_v58  ;;  %12647 = vst [vmem:[#allocation31_spill] sm:$0xff] %v11329_v20 }
 0x551   :  { %4884 = vmatpush1.bf16.msra.mxu0 %v11319_v19  ;;  %4925 = vmatpush1.bf16.msra.mxu1 %v11321_v49  ;;  %v4298_v49 = vld [vmem:[%s12160_s8] sm:$0xf] }
 0x552   :  { %5111 = vmatprep.subr.bf16.mxu0 %v11327_v53  ;;  %5152 = vmatprep.subr.bf16.mxu1 %v11329_v20  ;;  %v4303_v19 = vrot.slane %v4298_v49, %v12598_v61  ;;  %v4307_v53 = vrot.slane %v4298_v49, %v12599_v17  ;;  %v4315_v39 = vrot.slane %v4298_v49, %v12482_v30 }
 0x5b3   :  { %v4008_v47 = vpop.f32.mrf.mxu0  ;;  %v4049_v57 = vpop.f32.mrf.mxu1 }
 0x5b5   :  { %v4010_v35 = vpop.f32.mrf.mxu0  ;;  %v4051_v46 = vpop.f32.mrf.mxu1 }
 0x5b7   :  { %v4012_v54 = vpop.f32.mrf.mxu0  ;;  %v4053_v37 = vpop.f32.mrf.mxu1 }
 0x5b9   :  { %v4013_v6 = vpop.f32.mrf.mxu0  ;;  %v4054_v58 = vpop.f32.mrf.mxu1 }
 0x5d3   :  { %v4250_v28 = vpop.f32.mrf.mxu0  ;;  %v4291_v55 = vpop.f32.mrf.mxu1 }
 0x5d4   :  { %v4251_v63 = vadd.f32 %v4250_v28, %v4008_v47  ;;  %v4292_v28 = vadd.f32 %v4291_v55, %v4049_v57  ;;  %v4311_v47 = vrot.slane %v4298_v49, %v12483_v12  ;;  %v12649_v49 = vld [vmem:[#allocation83_spill] sm:$0xff] }
 0x5d5   :  { %v4252_v20 = vpop.f32.mrf.mxu0  ;;  %v4293_v52 = vpop.f32.mrf.mxu1 }
 0x5d6   :  { %v4320_v59 = vadd.f32 %v4303_v19, %v4251_v63  ;;  %v4253_v1 = vadd.f32 %v4252_v20, %v4010_v35  ;;  %v4294_v58 = vadd.f32 %v4293_v52, %v4051_v46  ;;  %v4322_v17 = vadd.f32 %v4311_v47, %v4292_v28 }
 0x5d7   :  { %v4254_v18 = vpop.f32.mrf.mxu0  ;;  %v4295_v54 = vpop.f32.mrf.mxu1 }
 0x5d8   :  { %v4324_v37 = vmul.f32 0.5, %v4320_v59  ;;  %v4321_v6 = vadd.f32 %v4307_v53, %v4253_v1  ;;  %v4323_v31 = vadd.f32 %v4315_v39, %v4294_v58  ;;  %v4326_v19 = vmul.f32 0.5, %v4322_v17 }
 0x5d9   :  { %v4255_v38 = vpop.f32.mrf.mxu0  ;;  %v4296_v33 = vpop.f32.mrf.mxu1 }
 0x5da   :  { %9813 = vtanh.f32 %v4324_v37  ;;  %v4325_v61 = vmul.f32 0.5, %v4321_v6 }
 0x5dc   :  { %9815 = vtanh.f32 %v4325_v61 }
 0x5dd   :  { %9817 = vtanh.f32 %v4323_v31  ;;  %v12648_v31 = vld [vmem:[#allocation81_spill] sm:$0xff] }
 0x5de   :  { %9819 = vtanh.f32 %v4326_v19 }
 0x5e7   :  { %v9814_v63 = vpop.eup %9813 }
 0x5e8   :  { %v4330_v18 = vmul.f32 0.5, %v9814_v63 }
 0x5e9   :  { %v9816_v35 = vpop.eup %9815 }
 0x5ea   :  { %v4333_v59 = vadd.f32 0.5, %v4330_v18  ;;  %v4331_v1 = vmul.f32 0.5, %v9816_v35  ;;  %v9818_v46 = vpop.eup %9817 }
 0x5eb   :  { %v9820_v37 = vpop.eup %9819 }
 0x5ec   :  { %v4334_v52 = vadd.f32 0.5, %v4331_v1  ;;  %v4338_v38 = vmul.f32 %v9818_v46, %v4333_v59  ;;  %v4332_v18 = vmul.f32 0.5, %v9820_v37  ;;  %v12651_v1 = vld [vmem:[#allocation82_spill] sm:$0xff]  ;;  %v11370_v37 = vld [vmem:[#allocation8 + $0xac] ss:$16 sps:$4 sm:$0xff]  }
 0x5ee   :  { %v4337_v33 = vmul.f32 %v4334_v52, %v11077_v60  ;;  %v12650_v60 = vld [vmem:[#allocation84_spill] sm:$0xff]  ;;  %v4335_v35 = vadd.f32 0.5, %v4332_v18 }
 0x5f0   :  { %v11341_v53 = vadd.f32 %v4338_v38, %v4337_v33  ;;  %v11350_v33 = vld [vmem:[#allocation8 + $0xe0] ss:$16 sps:$4 sm:$0xff]   ;;  %v11352_v38 = vld [vmem:[#allocation8 + $0xe8] ss:$16 sps:$4 sm:$0xff]  }
 0x5f2   :  { %9821 = vtanh.f32 %v11341_v53 }
 0x5f3   :  { %v4573_v61 = vpop.f32.mrf.mxu0  ;;  %v4614_v57 = vpop.f32.mrf.mxu1 }
 0x5f4   :  { %v4621_v39 = vadd.f32 %v4573_v61, %v12648_v31  ;;  %v4623_v52 = vadd.f32 %v4614_v57, %v12651_v1  ;;  %v11356_v31 = vld [vmem:[#allocation8 + $0xc4] ss:$16 sps:$4 sm:$0xff]   ;;  %v11362_v57 = vld [vmem:[#allocation8 + $0xc0] ss:$16 sps:$4 sm:$0xff]  }
 0x5f5   :  { %v4575_v17 = vpop.f32.mrf.mxu0  ;;  %v4616_v55 = vpop.f32.mrf.mxu1 }
 0x5f6   :  { %v4625_v20 = vmul.f32 0.5, %v4621_v39  ;;  %v4622_v54 = vadd.f32 %v4575_v17, %v12649_v49  ;;  %v4624_v47 = vadd.f32 %v4616_v55, %v12650_v60  ;;  %v11358_v39 = vld [vmem:[#allocation8 + $0xcc] ss:$16 sps:$4 sm:$0xff]   ;;  %v4627_v17 = vmul.f32 0.5, %v4623_v52  ;;  %v11389_v52 = vld [vmem:[#allocation8 + $0x80] ss:$16 sps:$4 sm:$0xff]  }
 0x5f7   :  { %v4577_v6 = vpop.f32.mrf.mxu0  ;;  %v4618_v58 = vpop.f32.mrf.mxu1 }
 0x5f8   :  { %9823 = vtanh.f32 %v4625_v20  ;;  %v4626_v28 = vmul.f32 0.5, %v4622_v54  ;;  %v11364_v20 = vld [vmem:[#allocation8 + $0xc8] ss:$16 sps:$4 sm:$0xff]   ;;  %v11368_v54 = vld [vmem:[#allocation8 + $0xa4] ss:$16 sps:$4 sm:$0xff]  }
 0x5f9   :  { %v4578_v19 = vpop.f32.mrf.mxu0  ;;  %v4619_v63 = vpop.f32.mrf.mxu1 }
 0x5fa   :  { %9825 = vtanh.f32 %v4626_v28  ;;  %v11378_v19 = vld [vmem:[#allocation8 + $0xa8] ss:$16 sps:$4 sm:$0xff]  }
 0x5fb   :  { %9827 = vtanh.f32 %v4624_v47  ;;  %v11376_v47 = vld [vmem:[#allocation8 + $0xa0] ss:$16 sps:$4 sm:$0xff]  }
 0x5fc   :  { %9829 = vtanh.f32 %v4627_v17 }
 0x5ff   :  { %v9822_v59 = vpop.eup %9821 }
 0x600   :  { %v11348_v46 = vmul.f32 %v9822_v59, %v4335_v35  ;;  %v11382_v35 = vld [vmem:[#allocation8 + $0x84] ss:$16 sps:$4 sm:$0xff]   ;;  %v11384_v59 = vld [vmem:[#allocation8 + $0x8c] ss:$16 sps:$4 sm:$0xff]  }
 0x602   :  { %12652 = vst [vmem:[#allocation32_spill] sm:$0xff] %v11348_v46  ;;  %v4676_v61 = vpack.c.bf16 %v11348_v46, %v11348_v46  ;;  %v11424_v46 = vld [vmem:[#allocation8 + $0x2c] ss:$16 sps:$4 sm:$0xff]  }
 0x603   :  { %12662 = vst [vmem:[#allocation36_spill] sm:$0xff] %v11424_v46 }
 0x604   :  { %4902 = vmatmul.mubr.bf16.vlgmr.msra.gmra.mxu0 %v4676_v61  ;;  %4943 = vmatmul.mubr.bf16.vlgmr.msra.gmra.mxu1 %v4676_v61  ;;  %v11391_v61 = vld [vmem:[#allocation8 + $0x88] ss:$16 sps:$4 sm:$0xff]  }
 0x605   :  { %v9824_v55 = vpop.eup %9823  ;;  %5112 = vmatpush1.bf16.msra.mxu0 %v11350_v33  ;;  %5153 = vmatpush1.bf16.msra.mxu1 %v11352_v38  ;;  %12653 = vst [vmem:[#allocation33_spill] sm:$0xff] %v11391_v61 }
 0x606   :  { %v4631_v49 = vmul.f32 0.5, %v9824_v55  ;;  %5113 = vmatprep.subr.bf16.mxu0 %v11356_v31  ;;  %5154 = vmatprep.subr.bf16.mxu1 %v11358_v39  ;;  %v11397_v55 = vld [vmem:[#allocation8 + $0x64] ss:$16 sps:$4 sm:$0xff]  }
 0x607   :  { %v9826_v6 = vpop.eup %9825  ;;  %5143 = vmatprep.mubr.bf16.mxu0 %v12399_v42  ;;  %5184 = vmatprep.mubr.bf16.mxu1 %v12399_v42  ;;  %12654 = vst [vmem:[#allocation67_spill] sm:$0xff] %v11397_v55 }
 0x608   :  { %v4634_v58 = vadd.f32 0.5, %v4631_v49  ;;  %v4632_v28 = vmul.f32 0.5, %v9826_v6  ;;  %v9828_v60 = vpop.eup %9827  ;;  %v11399_v49 = vld [vmem:[#allocation8 + $0x6c] ss:$16 sps:$4 sm:$0xff]   ;;  %v11406_v6 = vld [vmem:[#allocation8 + $0x68] ss:$16 sps:$4 sm:$0xff]  }
 0x609   :  { %5114 = vmatpush1.bf16.msra.mxu0 %v11362_v57  ;;  %5155 = vmatpush1.bf16.msra.mxu1 %v11364_v20  ;;  %12655 = vst [vmem:[#allocation65_spill] sm:$0xff] %v11399_v49  ;;  %12657 = vst [vmem:[#allocation68_spill] sm:$0xff] %v11406_v6 }
 0x60a   :  { %v4635_v63 = vadd.f32 0.5, %v4632_v28  ;;  %v4639_v18 = vmul.f32 %v9828_v60, %v4634_v58  ;;  %5115 = vmatprep.subr.bf16.mxu0 %v11368_v54  ;;  %5156 = vmatprep.subr.bf16.mxu1 %v11370_v37  ;;  %v11410_v58 = vld [vmem:[#allocation8 + $0x44] ss:$16 sps:$4 sm:$0xff]   ;;  %v11412_v28 = vld [vmem:[#allocation8 + $0x4c] ss:$16 sps:$4 sm:$0xff]   ;;  %v9830_v60 = vpop.eup %9829 }
 0x60b   :  { %12658 = vst [vmem:[#allocation71_spill] sm:$0xff] %v11410_v58  ;;  %12659 = vst [vmem:[#allocation69_spill] sm:$0xff] %v11412_v28 }
 0x60c   :  { %v4638_v1 = vmul.f32 %v4635_v63, %v11102_v40  ;;  %v11404_v40 = vld [vmem:[#allocation8 + $0x60] ss:$16 sps:$4 sm:$0xff]  }
 0x60d   :  { %5116 = vmatpush1.bf16.msra.mxu0 %v11376_v47  ;;  %5157 = vmatpush1.bf16.msra.mxu1 %v11378_v19  ;;  %12656 = vst [vmem:[#allocation70_spill] sm:$0xff] %v11404_v40  ;;  %v11416_v63 = vld [vmem:[#allocation8 + $0x40] ss:$16 sps:$4 sm:$0xff]  }
 0x60e   :  { %v11393_v17 = vadd.f32 %v4639_v18, %v4638_v1  ;;  %5117 = vmatprep.subr.bf16.mxu0 %v11382_v35  ;;  %5158 = vmatprep.subr.bf16.mxu1 %v11384_v59  ;;  %v11418_v18 = vld [vmem:[#allocation8 + $0x48] ss:$16 sps:$4 sm:$0xff]   ;;  %v11422_v1 = vld [vmem:[#allocation8 + $0x24] ss:$16 sps:$4 sm:$0xff]  }
 0x60f   :  { %12660 = vst [vmem:[#allocation34_spill] sm:$0xff] %v11418_v18  ;;  %12661 = vst [vmem:[#allocation35_spill] sm:$0xff] %v11422_v1 }
 0x610   :  { %9831 = vtanh.f32 %v11393_v17 }
 0x611   :  { %5118 = vmatpush1.bf16.msra.mxu0 %v11389_v52  ;;  %5159 = vmatpush1.bf16.msra.mxu1 %v11391_v61 }
 0x612   :  { %5119 = vmatprep.subr.bf16.mxu0 %v11397_v55  ;;  %5160 = vmatprep.subr.bf16.mxu1 %v11399_v49  ;;  %v4633_v49 = vmul.f32 0.5, %v9830_v60  ;;  %v11440_v60 = vld [vmem:[#allocation8] ss:$16 sps:$4 sm:$0xff]  }
 0x614   :  { %v4636_v55 = vadd.f32 0.5, %v4633_v49 }
 0x615   :  { %5120 = vmatpush1.bf16.msra.mxu0 %v11404_v40  ;;  %5161 = vmatpush1.bf16.msra.mxu1 %v11406_v6  ;;  %v11428_v40 = vld [vmem:[#allocation8 + $0x20] ss:$16 sps:$4 sm:$0xff]   ;;  %v11430_v6 = vld [vmem:[#allocation8 + $0x28] ss:$16 sps:$4 sm:$0xff]  }
 0x616   :  { %5121 = vmatprep.subr.bf16.mxu0 %v11410_v58  ;;  %5162 = vmatprep.subr.bf16.mxu1 %v11412_v28  ;;  %v11434_v58 = vld [vmem:[#allocation8 + $0x4] ss:$16 sps:$4 sm:$0xff]   ;;  %v11436_v28 = vld [vmem:[#allocation8 + $0xc] ss:$16 sps:$4 sm:$0xff]  }
 0x619   :  { %5122 = vmatpush1.bf16.msra.mxu0 %v11416_v63  ;;  %5163 = vmatpush1.bf16.msra.mxu1 %v11418_v18  ;;  %v11442_v18 = vld [vmem:[#allocation8 + $0x8] ss:$16 sps:$4 sm:$0xff]  }
 0x61a   :  { %5123 = vmatprep.subr.bf16.mxu0 %v11422_v1  ;;  %5164 = vmatprep.subr.bf16.mxu1 %v11424_v46 }
 0x61d   :  { %v9832_v61 = vpop.eup %9831  ;;  %5124 = vmatpush1.bf16.msra.mxu0 %v11428_v40  ;;  %5165 = vmatpush1.bf16.msra.mxu1 %v11430_v6 }
 0x61e   :  { %5125 = vmatprep.subr.bf16.mxu0 %v11434_v58  ;;  %5166 = vmatprep.subr.bf16.mxu1 %v11436_v28  ;;  %v4642_v1 = vmul.f32 %v9832_v61, %v4636_v55 }
 0x620   :  { %v4643_v46 = vpack.c.bf16 %v4642_v1, %v4642_v1 }
 0x621   :  { %5126 = vmatpush1.bf16.msra.mxu0 %v11440_v60  ;;  %5167 = vmatpush1.bf16.msra.mxu1 %v11442_v18 }
 0x622   :  { %5434 = vmatprep.subr.bf16.mxu0 %v11123_v44  ;;  %5475 = vmatprep.subr.bf16.mxu1 %v11125_v48  ;;  %v12663_v44 = vld [vmem:[#allocation53_spill] sm:$0xff]  ;;  %v12664_v48 = vld [vmem:[#allocation54_spill] sm:$0xff] }
 0x624   :  { %5144 = vmatmul.mubr.bf16.vlgmr.msra.gmra.mxu0 %v4643_v46  ;;  %5185 = vmatmul.mubr.bf16.vlgmr.msra.gmra.mxu1 %v4643_v46 }
 0x625   :  { %5435 = vmatpush1.bf16.msra.mxu0 %v11131_v62  ;;  %5476 = vmatpush1.bf16.msra.mxu1 %v11133_v22  ;;  %v12665_v62 = vld [vmem:[#allocation55_spill] sm:$0xff]  ;;  %v12666_v22 = vld [vmem:[#allocation56_spill] sm:$0xff] }
 0x626   :  { %5436 = vmatprep.subr.bf16.mxu0 %v11137_v51  ;;  %5477 = vmatprep.subr.bf16.mxu1 %v11139_v5  ;;  %v12667_v51 = vld [vmem:[#allocation57_spill] sm:$0xff]  ;;  %v12668_v5 = vld [vmem:[#allocation58_spill] sm:$0xff] }
 0x627   :  { %5466 = vmatprep.mubr.bf16.mxu0 %v12399_v42  ;;  %5507 = vmatprep.mubr.bf16.mxu1 %v12399_v42 }
 0x629   :  { %5437 = vmatpush1.bf16.msra.mxu0 %v11145_v50  ;;  %5478 = vmatpush1.bf16.msra.mxu1 %v11147_v41  ;;  %v12669_v50 = vld [vmem:[#allocation59_spill] sm:$0xff]  ;;  %v12670_v41 = vld [vmem:[#allocation60_spill] sm:$0xff] }
 0x62a   :  { %5438 = vmatprep.subr.bf16.mxu0 %v11151_v34  ;;  %5479 = vmatprep.subr.bf16.mxu1 %v11153_v2  ;;  %v12671_v34 = vld [vmem:[#allocation61_spill] sm:$0xff]  ;;  %v12672_v2 = vld [vmem:[#allocation62_spill] sm:$0xff] }
 0x62d   :  { %5439 = vmatpush1.bf16.msra.mxu0 %v11159_v3  ;;  %5480 = vmatpush1.bf16.msra.mxu1 %v11161_v4  ;;  %v12673_v3 = vld [vmem:[#allocation63_spill] sm:$0xff]  ;;  %v12674_v4 = vld [vmem:[#allocation73_spill] sm:$0xff] }
 0x62e   :  { %5440 = vmatprep.subr.bf16.mxu0 %v11165_v7  ;;  %5481 = vmatprep.subr.bf16.mxu1 %v11167_v8  ;;  %v12675_v7 = vld [vmem:[#allocation75_spill] sm:$0xff]  ;;  %v12676_v8 = vld [vmem:[#allocation76_spill] sm:$0xff] }
 0x631   :  { %5441 = vmatpush1.bf16.msra.mxu0 %v11171_v10  ;;  %5482 = vmatpush1.bf16.msra.mxu1 %v11173_v13  ;;  %v12677_v10 = vld [vmem:[#allocation74_spill] sm:$0xff]  ;;  %v12678_v13 = vld [vmem:[#allocation17_spill] sm:$0xff] }
 0x632   :  { %5442 = vmatprep.subr.bf16.mxu0 %v11177_v36  ;;  %5483 = vmatprep.subr.bf16.mxu1 %v11179_v23  ;;  %v12679_v36 = vld [vmem:[#allocation15_spill] sm:$0xff] }
 0x633   :  { %v12680_v23 = vld [vmem:[#allocation19_spill] sm:$0xff] }
 0x635   :  { %5443 = vmatpush1.bf16.msra.mxu0 %v11183_v56  ;;  %5484 = vmatpush1.bf16.msra.mxu1 %v11185_v21  ;;  %v12681_v56 = vld [vmem:[#allocation16_spill] sm:$0xff]  ;;  %v12682_v21 = vld [vmem:[#allocation21_spill] sm:$0xff] }
 0x636   :  { %5444 = vmatprep.subr.bf16.mxu0 %v11189_v32  ;;  %5485 = vmatprep.subr.bf16.mxu1 %v11191_v9  ;;  %v12683_v32 = vld [vmem:[#allocation18_spill] sm:$0xff]  ;;  %v12684_v9 = vld [vmem:[#allocation25_spill] sm:$0xff] }
 0x639   :  { %5445 = vmatpush1.bf16.msra.mxu0 %v11195_v27  ;;  %5486 = vmatpush1.bf16.msra.mxu1 %v11197_v24  ;;  %v12685_v27 = vld [vmem:[#allocation20_spill] sm:$0xff] }
 0x63a   :  { %5446 = vmatprep.subr.bf16.mxu0 %v11201_v26  ;;  %5487 = vmatprep.subr.bf16.mxu1 %v11203_v16  ;;  %v12686_v24 = vld [vmem:[#allocation24_spill] sm:$0xff]  ;;  %v12687_v26 = vld [vmem:[#allocation23_spill] sm:$0xff] }
 0x63b   :  { %v12688_v16 = vld [vmem:[#allocation27_spill] sm:$0xff] }
 0x63d   :  { %5447 = vmatpush1.bf16.msra.mxu0 %v11207_v45  ;;  %5488 = vmatpush1.bf16.msra.mxu1 %v11209_v43  ;;  %v12689_v45 = vld [vmem:[#allocation22_spill] sm:$0xff]  ;;  %v12690_v43 = vld [vmem:[#allocation29_spill] sm:$0xff] }
 0x63e   :  { %5448 = vmatprep.subr.bf16.mxu0 %v11213_v14  ;;  %5489 = vmatprep.subr.bf16.mxu1 %v11215_v25  ;;  %v12691_v14 = vld [vmem:[#allocation26_spill] sm:$0xff] }
 0x63f   :  { %v12692_v25 = vld [vmem:[#allocation30_spill] sm:$0xff] }
 0x641   :  { %5449 = vmatpush1.bf16.msra.mxu0 %v11219_v15  ;;  %5490 = vmatpush1.bf16.msra.mxu1 %v11221_v0  ;;  %v12693_v15 = vld [vmem:[#allocation28_spill] sm:$0xff]  ;;  %v12694_v0 = vld [vmem:[#allocation31_spill] sm:$0xff] }
 0x642   :  { %5764 = vmatprep.subr.bf16.mxu0 %v11231_v11  ;;  %5805 = vmatprep.subr.bf16.mxu1 %v11233_v29 }
 0x644   :  { %5467 = vmatmul.mubr.bf16.vlgmr.msra.gmra.mxu0 %v4643_v46  ;;  %5508 = vmatmul.mubr.bf16.vlgmr.msra.gmra.mxu1 %v4643_v46 }
 0x645   :  { %5765 = vmatpush1.bf16.msra.mxu0 %v12663_v44  ;;  %5806 = vmatpush1.bf16.msra.mxu1 %v12664_v48  ;;  %v5193_v48 = vld [vmem:[%s12160_s8] sm:$0xf] }
 0x646   :  { %5766 = vmatprep.subr.bf16.mxu0 %v12665_v62  ;;  %5807 = vmatprep.subr.bf16.mxu1 %v12666_v22  ;;  %v12695_v62 = vld [vmem:[#allocation64_spill] sm:$0xff] }
 0x647   :  { %5796 = vmatprep.mubr.bf16.mxu0 %v12399_v42  ;;  %5837 = vmatprep.mubr.bf16.mxu1 %v12399_v42  ;;  %v5198_v22 = vrot.slane %v5193_v48, %v12695_v62 }
 0x649   :  { %5767 = vmatpush1.bf16.msra.mxu0 %v12667_v51  ;;  %5808 = vmatpush1.bf16.msra.mxu1 %v12668_v5 }
 0x64a   :  { %5768 = vmatprep.subr.bf16.mxu0 %v12669_v50  ;;  %5809 = vmatprep.subr.bf16.mxu1 %v12670_v41  ;;  %v12696_v41 = vld [vmem:[#allocation66_spill] sm:$0xff] }
 0x64d   :  { %5769 = vmatpush1.bf16.msra.mxu0 %v12671_v34  ;;  %5810 = vmatpush1.bf16.msra.mxu1 %v12672_v2  ;;  %v5202_v34 = vrot.slane %v5193_v48, %v12696_v41 }
 0x64e   :  { %5770 = vmatprep.subr.bf16.mxu0 %v12673_v3  ;;  %5811 = vmatprep.subr.bf16.mxu1 %v12674_v4 }
 0x651   :  { %5771 = vmatpush1.bf16.msra.mxu0 %v12675_v7  ;;  %5812 = vmatpush1.bf16.msra.mxu1 %v12676_v8 }
 0x652   :  { %5772 = vmatprep.subr.bf16.mxu0 %v12677_v10  ;;  %5813 = vmatprep.subr.bf16.mxu1 %v12678_v13 }
 0x655   :  { %5773 = vmatpush1.bf16.msra.mxu0 %v12679_v36  ;;  %5814 = vmatpush1.bf16.msra.mxu1 %v12680_v23 }
 0x656   :  { %5774 = vmatprep.subr.bf16.mxu0 %v12681_v56  ;;  %5815 = vmatprep.subr.bf16.mxu1 %v12682_v21  ;;  %v5210_v56 = vrot.slane %v5193_v48, %v12482_v30 }
 0x659   :  { %5775 = vmatpush1.bf16.msra.mxu0 %v12683_v32  ;;  %5816 = vmatpush1.bf16.msra.mxu1 %v12684_v9 }
 0x65a   :  { %5776 = vmatprep.subr.bf16.mxu0 %v12685_v27  ;;  %5817 = vmatprep.subr.bf16.mxu1 %v12686_v24 }
 0x65d   :  { %5777 = vmatpush1.bf16.msra.mxu0 %v12687_v26  ;;  %5818 = vmatpush1.bf16.msra.mxu1 %v12688_v16  ;;  %v5206_v26 = vrot.slane %v5193_v48, %v12483_v12  ;;  %v12698_v48 = vld [vmem:[#allocation87_spill] sm:$0xff] }
 0x65e   :  { %5778 = vmatprep.subr.bf16.mxu0 %v12689_v45  ;;  %5819 = vmatprep.subr.bf16.mxu1 %v12690_v43 }
 0x661   :  { %5779 = vmatpush1.bf16.msra.mxu0 %v12691_v14  ;;  %5820 = vmatpush1.bf16.msra.mxu1 %v12692_v25 }
 0x662   :  { %6006 = vmatprep.subr.bf16.mxu0 %v12693_v15  ;;  %6047 = vmatprep.subr.bf16.mxu1 %v12694_v0 }
 0x6c4   :  { %v4903_v11 = vpop.f32.mrf.mxu0  ;;  %v4944_v29 = vpop.f32.mrf.mxu1 }
 0x6c6   :  { %v4905_v46 = vpop.f32.mrf.mxu0  ;;  %v4946_v61 = vpop.f32.mrf.mxu1 }
 0x6c8   :  { %v4907_v55 = vpop.f32.mrf.mxu0  ;;  %v4948_v49 = vpop.f32.mrf.mxu1 }
 0x6ca   :  { %v4908_v1 = vpop.f32.mrf.mxu0  ;;  %v4949_v44 = vpop.f32.mrf.mxu1 }
 0x6cb   :  { %v12697_v44 = vld [vmem:[#allocation72_spill] sm:$0xff] }
 0x6e4   :  { %v5145_v51 = vpop.f32.mrf.mxu0  ;;  %v5186_v5 = vpop.f32.mrf.mxu1 }
 0x6e5   :  { %v5146_v50 = vadd.f32 %v5145_v51, %v4903_v11  ;;  %v5187_v24 = vadd.f32 %v5186_v5, %v4944_v29  ;;  %v12699_v51 = vld [vmem:[#allocation85_spill] sm:$0xff] }
 0x6e6   :  { %v5147_v2 = vpop.f32.mrf.mxu0  ;;  %v5188_v3 = vpop.f32.mrf.mxu1 }
 0x6e7   :  { %v5215_v4 = vadd.f32 %v5198_v22, %v5146_v50  ;;  %v5148_v7 = vadd.f32 %v5147_v2, %v4905_v46  ;;  %v5189_v23 = vadd.f32 %v5188_v3, %v4946_v61  ;;  %v5217_v16 = vadd.f32 %v5206_v26, %v5187_v24 }
 0x6e8   :  { %v5149_v8 = vpop.f32.mrf.mxu0  ;;  %v5190_v10 = vpop.f32.mrf.mxu1  ;;  %v639_v22 = vadd.f32 %v12698_v48, %v12697_v44  ;;  %v11752_v44 = vld [vmem:[#allocation9 + $0x24] ss:$16 sps:$4 sm:$0xff]  }
 0x6e9   :  { %v5219_v13 = vmul.f32 0.5, %v5215_v4  ;;  %v5216_v36 = vadd.f32 %v5202_v34, %v5148_v7  ;;  %v5218_v27 = vadd.f32 %v5210_v56, %v5189_v23  ;;  %v5221_v45 = vmul.f32 0.5, %v5217_v16  ;;  %v12700_v10 = vld [vmem:[#allocation88_spill] sm:$0xff]  ;;  %12735 = vst [vmem:[#allocation54_spill] sm:$0xff] %v11752_v44 }
 0x6ea   :  { %v5150_v21 = vpop.f32.mrf.mxu0  ;;  %v5191_v32 = vpop.f32.mrf.mxu1 }
 0x6eb   :  { %9833 = vtanh.f32 %v5219_v13  ;;  %v5220_v9 = vmul.f32 0.5, %v5216_v36 }
 0x6ed   :  { %9835 = vtanh.f32 %v5220_v9  ;;  %v12701_v9 = vld [vmem:[#allocation86_spill] sm:$0xff] }
 0x6ee   :  { %9837 = vtanh.f32 %v5218_v27 }
 0x6ef   :  { %9839 = vtanh.f32 %v5221_v45 }
 0x6f8   :  { %v9834_v43 = vpop.eup %9833 }
 0x6f9   :  { %v5225_v14 = vmul.f32 0.5, %v9834_v43 }
 0x6fa   :  { %v9836_v25 = vpop.eup %9835 }
 0x6fb   :  { %v5228_v15 = vadd.f32 0.5, %v5225_v14  ;;  %v5226_v0 = vmul.f32 0.5, %v9836_v25  ;;  %v9838_v46 = vpop.eup %9837 }
 0x6fc   :  { %v9840_v4 = vpop.eup %9839 }
 0x6fd   :  { %v5229_v11 = vadd.f32 0.5, %v5226_v0  ;;  %v5233_v55 = vmul.f32 %v9838_v46, %v5228_v15  ;;  %v5227_v56 = vmul.f32 0.5, %v9840_v4  ;;  %v12712_v46 = vld [vmem:[#allocation36_spill] sm:$0xff]  ;;  %v11622_v4 = vld [vmem:[#allocation6 + $0x88] ss:$16 sps:$4 sm:$0xff]  }
 0x6ff   :  { %v5232_v61 = vmul.f32 %v5229_v11, %v11341_v53  ;;  %v5230_v21 = vadd.f32 0.5, %v5227_v56  ;;  %v12710_v11 = vld [vmem:[#allocation34_spill] sm:$0xff]  ;;  %v11646_v56 = vld [vmem:[#allocation6 + $0x48] ss:$16 sps:$4 sm:$0xff]  }
 0x701   :  { %v11526_v49 = vadd.f32 %v5233_v55, %v5232_v61 }
 0x703   :  { %9841 = vtanh.f32 %v11526_v49 }
 0x704   :  { %v5468_v29 = vpop.f32.mrf.mxu0  ;;  %v5509_v1 = vpop.f32.mrf.mxu1 }
 0x705   :  { %v5516_v5 = vadd.f32 %v5468_v29, %v12699_v51  ;;  %v5518_v27 = vadd.f32 %v5509_v1, %v12701_v9  ;;  %v11572_v1 = vld [vmem:[#allocation6 + $0xe4] ss:$16 sps:$4 sm:$0xff]   ;;  %v11602_v51 = vld [vmem:[#allocation6 + $0xac] ss:$16 sps:$4 sm:$0xff]   ;;  %v11656_v9 = vld [vmem:[#allocation6 + $0x20] ss:$16 sps:$4 sm:$0xff]  }
 0x706   :  { %v5470_v50 = vpop.f32.mrf.mxu0  ;;  %v5511_v34 = vpop.f32.mrf.mxu1 }
 0x707   :  { %v5520_v2 = vmul.f32 0.5, %v5516_v5  ;;  %v5517_v3 = vadd.f32 %v5470_v50, %v639_v22  ;;  %v5519_v13 = vadd.f32 %v5511_v34, %v12700_v10  ;;  %v5522_v16 = vmul.f32 0.5, %v5518_v27  ;;  %v11580_v22 = vld [vmem:[#allocation6 + $0xe0] ss:$16 sps:$4 sm:$0xff]   ;;  %v11610_v50 = vld [vmem:[#allocation6 + $0xa8] ss:$16 sps:$4 sm:$0xff]  }
 0x708   :  { %v5472_v7 = vpop.f32.mrf.mxu0  ;;  %v5513_v8 = vpop.f32.mrf.mxu1  ;;  %v11608_v5 = vld [vmem:[#allocation6 + $0xa0] ss:$16 sps:$4 sm:$0xff]   ;;  %v11614_v34 = vld [vmem:[#allocation6 + $0x84] ss:$16 sps:$4 sm:$0xff]   ;;  %v11634_v10 = vld [vmem:[#allocation6 + $0x68] ss:$16 sps:$4 sm:$0xff]  }
 0x709   :  { %9843 = vtanh.f32 %v5520_v2  ;;  %v5521_v53 = vmul.f32 0.5, %v5517_v3  ;;  %v11616_v2 = vld [vmem:[#allocation6 + $0x8c] ss:$16 sps:$4 sm:$0xff]   ;;  %v11620_v3 = vld [vmem:[#allocation6 + $0x80] ss:$16 sps:$4 sm:$0xff]  }
 0x70a   :  { %v5473_v36 = vpop.f32.mrf.mxu0  ;;  %v5514_v23 = vpop.f32.mrf.mxu1  ;;  %v11626_v7 = vld [vmem:[#allocation6 + $0x64] ss:$16 sps:$4 sm:$0xff]   ;;  %v11628_v8 = vld [vmem:[#allocation6 + $0x6c] ss:$16 sps:$4 sm:$0xff]   ;;  %v11658_v27 = vld [vmem:[#allocation6 + $0x28] ss:$16 sps:$4 sm:$0xff]  }
 0x70b   :  { %9845 = vtanh.f32 %v5521_v53  ;;  %v11632_v53 = vld [vmem:[#allocation6 + $0x60] ss:$16 sps:$4 sm:$0xff]   ;;  %v11640_v36 = vld [vmem:[#allocation6 + $0x4c] ss:$16 sps:$4 sm:$0xff]  }
 0x70c   :  { %9847 = vtanh.f32 %v5519_v13  ;;  %v11638_v13 = vld [vmem:[#allocation6 + $0x44] ss:$16 sps:$4 sm:$0xff]   ;;  %v11644_v23 = vld [vmem:[#allocation6 + $0x40] ss:$16 sps:$4 sm:$0xff]  }
 0x70d   :  { %9849 = vtanh.f32 %v5522_v16  ;;  %v11664_v16 = vld [vmem:[#allocation6 + $0xc] ss:$16 sps:$4 sm:$0xff]  }
 0x710   :  { %v9842_v32 = vpop.eup %9841 }
 0x711   :  { %v11534_v24 = vmul.f32 %v9842_v32, %v5230_v21  ;;  %v11650_v21 = vld [vmem:[#allocation6 + $0x24] ss:$16 sps:$4 sm:$0xff]   ;;  %v11652_v32 = vld [vmem:[#allocation6 + $0x2c] ss:$16 sps:$4 sm:$0xff]  }
 0x713   :  { %12702 = vst [vmem:[#allocation37_spill] sm:$0xff] %v11534_v24  ;;  %v5571_v26 = vpack.c.bf16 %v11534_v24, %v11534_v24  ;;  %v11746_v24 = vld [vmem:[#allocation9 + $0x48] ss:$16 sps:$4 sm:$0xff]  }
 0x714   :  { %12734 = vst [vmem:[#allocation53_spill] sm:$0xff] %v11746_v24 }
 0x715   :  { %5797 = vmatmul.mubr.bf16.vlgmr.msra.gmra.mxu0 %v5571_v26  ;;  %5838 = vmatmul.mubr.bf16.vlgmr.msra.gmra.mxu1 %v5571_v26  ;;  %v11662_v26 = vld [vmem:[#allocation6 + $0x4] ss:$16 sps:$4 sm:$0xff]  }
 0x716   :  { %v9844_v45 = vpop.eup %9843  ;;  %6007 = vmatpush1.bf16.msra.mxu0 %v11350_v33  ;;  %6048 = vmatpush1.bf16.msra.mxu1 %v11352_v38 }
 0x717   :  { %v5526_v43 = vmul.f32 0.5, %v9844_v45  ;;  %6008 = vmatprep.subr.bf16.mxu0 %v11356_v31  ;;  %6049 = vmatprep.subr.bf16.mxu1 %v11358_v39  ;;  %v11668_v45 = vld [vmem:[#allocation6] ss:$16 sps:$4 sm:$0xff]  }
 0x718   :  { %v9846_v14 = vpop.eup %9845  ;;  %6038 = vmatprep.mubr.bf16.mxu0 %v12399_v42  ;;  %6079 = vmatprep.mubr.bf16.mxu1 %v12399_v42 }
 0x719   :  { %v5529_v25 = vadd.f32 0.5, %v5526_v43  ;;  %v5527_v15 = vmul.f32 0.5, %v9846_v14  ;;  %v9848_v0 = vpop.eup %9847  ;;  %v11670_v43 = vld [vmem:[#allocation6 + $0x8] ss:$16 sps:$4 sm:$0xff]   ;;  %v11680_v14 = vld [vmem:[#allocation9 + $0xe4] ss:$16 sps:$4 sm:$0xff]  }
 0x71a   :  { %6009 = vmatpush1.bf16.msra.mxu0 %v11362_v57  ;;  %6050 = vmatpush1.bf16.msra.mxu1 %v11364_v20  ;;  %v12703_v57 = vld [vmem:[#allocation33_spill] sm:$0xff]  ;;  %v12704_v20 = vld [vmem:[#allocation67_spill] sm:$0xff] }
 0x71b   :  { %v5530_v33 = vadd.f32 0.5, %v5527_v15  ;;  %v5534_v38 = vmul.f32 %v9848_v0, %v5529_v25  ;;  %6010 = vmatprep.subr.bf16.mxu0 %v11368_v54  ;;  %6051 = vmatprep.subr.bf16.mxu1 %v11370_v37  ;;  %v12705_v54 = vld [vmem:[#allocation65_spill] sm:$0xff]  ;;  %v9850_v37 = vpop.eup %9849  ;;  %v11684_v15 = vld [vmem:[#allocation9 + $0xe0] ss:$16 sps:$4 sm:$0xff]  }
 0x71c   :  { %v11682_v25 = vld [vmem:[#allocation9 + $0xec] ss:$16 sps:$4 sm:$0xff]   ;;  %12713 = vst [vmem:[#allocation38_spill] sm:$0xff] %v11684_v15  ;;  %v11686_v0 = vld [vmem:[#allocation9 + $0xe8] ss:$16 sps:$4 sm:$0xff]  }
 0x71d   :  { %v5533_v31 = vmul.f32 %v5530_v33, %v11393_v17  ;;  %v12708_v17 = vld [vmem:[#allocation71_spill] sm:$0xff]  ;;  %12714 = vst [vmem:[#allocation39_spill] sm:$0xff] %v11686_v0  ;;  %v11692_v33 = vld [vmem:[#allocation9 + $0xc4] ss:$16 sps:$4 sm:$0xff]  }
 0x71e   :  { %6011 = vmatpush1.bf16.msra.mxu0 %v11376_v47  ;;  %6052 = vmatpush1.bf16.msra.mxu1 %v11378_v19  ;;  %v12706_v47 = vld [vmem:[#allocation70_spill] sm:$0xff]  ;;  %v12707_v19 = vld [vmem:[#allocation68_spill] sm:$0xff]  ;;  %12715 = vst [vmem:[#allocation40_spill] sm:$0xff] %v11692_v33 }
 0x71f   :  { %v11551_v39 = vadd.f32 %v5534_v38, %v5533_v31  ;;  %6012 = vmatprep.subr.bf16.mxu0 %v11382_v35  ;;  %6053 = vmatprep.subr.bf16.mxu1 %v11384_v59  ;;  %v12709_v35 = vld [vmem:[#allocation69_spill] sm:$0xff]  ;;  %v5528_v59 = vmul.f32 0.5, %v9850_v37  ;;  %v11696_v31 = vld [vmem:[#allocation9 + $0xc0] ss:$16 sps:$4 sm:$0xff]  }
 0x720   :  { %v11694_v38 = vld [vmem:[#allocation9 + $0xcc] ss:$16 sps:$4 sm:$0xff]   ;;  %12717 = vst [vmem:[#allocation77_spill] sm:$0xff] %v11696_v31  ;;  %v11708_v37 = vld [vmem:[#allocation9 + $0xa0] ss:$16 sps:$4 sm:$0xff]  }
 0x721   :  { %9851 = vtanh.f32 %v11551_v39  ;;  %v5531_v61 = vadd.f32 0.5, %v5528_v59  ;;  %12716 = vst [vmem:[#allocation79_spill] sm:$0xff] %v11694_v38  ;;  %12721 = vst [vmem:[#allocation43_spill] sm:$0xff] %v11708_v37  ;;  %v11722_v59 = vld [vmem:[#allocation9 + $0x88] ss:$16 sps:$4 sm:$0xff]  }
 0x722   :  { %6013 = vmatpush1.bf16.msra.mxu0 %v11389_v52  ;;  %6054 = vmatpush1.bf16.msra.mxu1 %v12703_v57  ;;  %v12711_v52 = vld [vmem:[#allocation35_spill] sm:$0xff]  ;;  %12726 = vst [vmem:[#allocation48_spill] sm:$0xff] %v11722_v59 }
 0x723   :  { %6014 = vmatprep.subr.bf16.mxu0 %v12704_v20  ;;  %6055 = vmatprep.subr.bf16.mxu1 %v12705_v54  ;;  %v11698_v57 = vld [vmem:[#allocation9 + $0xc8] ss:$16 sps:$4 sm:$0xff]   ;;  %v11704_v20 = vld [vmem:[#allocation9 + $0xa4] ss:$16 sps:$4 sm:$0xff]   ;;  %v11706_v54 = vld [vmem:[#allocation9 + $0xac] ss:$16 sps:$4 sm:$0xff]  }
 0x724   :  { %12718 = vst [vmem:[#allocation80_spill] sm:$0xff] %v11698_v57  ;;  %12719 = vst [vmem:[#allocation78_spill] sm:$0xff] %v11704_v20 }
 0x725   :  { %12720 = vst [vmem:[#allocation42_spill] sm:$0xff] %v11706_v54 }
 0x726   :  { %6015 = vmatpush1.bf16.msra.mxu0 %v12706_v47  ;;  %6056 = vmatpush1.bf16.msra.mxu1 %v12707_v19  ;;  %v11710_v47 = vld [vmem:[#allocation9 + $0xa8] ss:$16 sps:$4 sm:$0xff]   ;;  %v11716_v19 = vld [vmem:[#allocation9 + $0x84] ss:$16 sps:$4 sm:$0xff]  }
 0x727   :  { %6016 = vmatprep.subr.bf16.mxu0 %v12708_v17  ;;  %6057 = vmatprep.subr.bf16.mxu1 %v12709_v35  ;;  %12722 = vst [vmem:[#allocation44_spill] sm:$0xff] %v11710_v47  ;;  %12723 = vst [vmem:[#allocation45_spill] sm:$0xff] %v11716_v19  ;;  %v11718_v17 = vld [vmem:[#allocation9 + $0x8c] ss:$16 sps:$4 sm:$0xff]   ;;  %v11720_v35 = vld [vmem:[#allocation9 + $0x80] ss:$16 sps:$4 sm:$0xff]  }
 0x728   :  { %12724 = vst [vmem:[#allocation46_spill] sm:$0xff] %v11718_v17  ;;  %12725 = vst [vmem:[#allocation47_spill] sm:$0xff] %v11720_v35 }
 0x72a   :  { %6017 = vmatpush1.bf16.msra.mxu0 %v11416_v63  ;;  %6058 = vmatpush1.bf16.msra.mxu1 %v12710_v11  ;;  %v11574_v63 = vld [vmem:[#allocation6 + $0xec] ss:$16 sps:$4 sm:$0xff]   ;;  %v11728_v11 = vld [vmem:[#allocation9 + $0x64] ss:$16 sps:$4 sm:$0xff]  }
 0x72b   :  { %6018 = vmatprep.subr.bf16.mxu0 %v12711_v52  ;;  %6059 = vmatprep.subr.bf16.mxu1 %v12712_v46  ;;  %12727 = vst [vmem:[#allocation49_spill] sm:$0xff] %v11728_v11  ;;  %v11730_v52 = vld [vmem:[#allocation9 + $0x6c] ss:$16 sps:$4 sm:$0xff]   ;;  %v11732_v46 = vld [vmem:[#allocation9 + $0x60] ss:$16 sps:$4 sm:$0xff]  }
 0x72c   :  { %12728 = vst [vmem:[#allocation50_spill] sm:$0xff] %v11730_v52  ;;  %12729 = vst [vmem:[#allocation51_spill] sm:$0xff] %v11732_v46 }
 0x72e   :  { %v9852_v55 = vpop.eup %9851  ;;  %6019 = vmatpush1.bf16.msra.mxu0 %v11428_v40  ;;  %6060 = vmatpush1.bf16.msra.mxu1 %v11430_v6  ;;  %v11582_v40 = vld [vmem:[#allocation6 + $0xe8] ss:$16 sps:$4 sm:$0xff]   ;;  %v11586_v6 = vld [vmem:[#allocation6 + $0xc4] ss:$16 sps:$4 sm:$0xff]  }
 0x72f   :  { %6020 = vmatprep.subr.bf16.mxu0 %v11434_v58  ;;  %6061 = vmatprep.subr.bf16.mxu1 %v11436_v28  ;;  %v5537_v29 = vmul.f32 %v9852_v55, %v5531_v61  ;;  %v11588_v58 = vld [vmem:[#allocation6 + $0xcc] ss:$16 sps:$4 sm:$0xff]   ;;  %v11594_v28 = vld [vmem:[#allocation6 + $0xc0] ss:$16 sps:$4 sm:$0xff]   ;;  %v11734_v61 = vld [vmem:[#allocation9 + $0x68] ss:$16 sps:$4 sm:$0xff]  }
 0x730   :  { %12730 = vst [vmem:[#allocation81_spill] sm:$0xff] %v11734_v61  ;;  %v11740_v55 = vld [vmem:[#allocation9 + $0x44] ss:$16 sps:$4 sm:$0xff]  }
 0x731   :  { %v11576_v48 = vpack.c.bf16 %v5537_v29, %v5537_v29  ;;  %12731 = vst [vmem:[#allocation83_spill] sm:$0xff] %v11740_v55  ;;  %v11742_v29 = vld [vmem:[#allocation9 + $0x4c] ss:$16 sps:$4 sm:$0xff]  }
 0x732   :  { %6021 = vmatpush1.bf16.msra.mxu0 %v11440_v60  ;;  %6062 = vmatpush1.bf16.msra.mxu1 %v11442_v18  ;;  %v11596_v18 = vld [vmem:[#allocation6 + $0xc8] ss:$16 sps:$4 sm:$0xff]   ;;  %v11600_v60 = vld [vmem:[#allocation6 + $0xa4] ss:$16 sps:$4 sm:$0xff]   ;;  %12732 = vst [vmem:[#allocation84_spill] sm:$0xff] %v11742_v29 }
 0x733   :  { %6329 = vmatprep.subr.bf16.mxu0 %v11572_v1  ;;  %6370 = vmatprep.subr.bf16.mxu1 %v11574_v63 }
 0x735   :  { %6039 = vmatmul.mubr.bf16.vlgmr.msra.gmra.mxu0 %v11576_v48  ;;  %6080 = vmatmul.mubr.bf16.vlgmr.msra.gmra.mxu1 %v11576_v48 }
 0x736   :  { %6330 = vmatpush1.bf16.msra.mxu0 %v11580_v22  ;;  %6371 = vmatpush1.bf16.msra.mxu1 %v11582_v40 }
 0x737   :  { %6331 = vmatprep.subr.bf16.mxu0 %v11586_v6  ;;  %6372 = vmatprep.subr.bf16.mxu1 %v11588_v58 }
 0x738   :  { %6361 = vmatprep.mubr.bf16.mxu0 %v12399_v42  ;;  %6402 = vmatprep.mubr.bf16.mxu1 %v12399_v42 }
 0x73a   :  { %6332 = vmatpush1.bf16.msra.mxu0 %v11594_v28  ;;  %6373 = vmatpush1.bf16.msra.mxu1 %v11596_v18 }
 0x73b   :  { %6333 = vmatprep.subr.bf16.mxu0 %v11600_v60  ;;  %6374 = vmatprep.subr.bf16.mxu1 %v11602_v51 }
 0x73e   :  { %6334 = vmatpush1.bf16.msra.mxu0 %v11608_v5  ;;  %6375 = vmatpush1.bf16.msra.mxu1 %v11610_v50 }
 0x73f   :  { %6335 = vmatprep.subr.bf16.mxu0 %v11614_v34  ;;  %6376 = vmatprep.subr.bf16.mxu1 %v11616_v2 }
 0x742   :  { %6336 = vmatpush1.bf16.msra.mxu0 %v11620_v3  ;;  %6377 = vmatpush1.bf16.msra.mxu1 %v11622_v4 }
 0x743   :  { %6337 = vmatprep.subr.bf16.mxu0 %v11626_v7  ;;  %6378 = vmatprep.subr.bf16.mxu1 %v11628_v8 }
 0x746   :  { %6338 = vmatpush1.bf16.msra.mxu0 %v11632_v53  ;;  %6379 = vmatpush1.bf16.msra.mxu1 %v11634_v10 }
 0x747   :  { %6339 = vmatprep.subr.bf16.mxu0 %v11638_v13  ;;  %6380 = vmatprep.subr.bf16.mxu1 %v11640_v36 }
 0x74a   :  { %6340 = vmatpush1.bf16.msra.mxu0 %v11644_v23  ;;  %6381 = vmatpush1.bf16.msra.mxu1 %v11646_v56 }
 0x74b   :  { %6341 = vmatprep.subr.bf16.mxu0 %v11650_v21  ;;  %6382 = vmatprep.subr.bf16.mxu1 %v11652_v32 }
 0x74e   :  { %6342 = vmatpush1.bf16.msra.mxu0 %v11656_v9  ;;  %6383 = vmatpush1.bf16.msra.mxu1 %v11658_v27 }
 0x74f   :  { %6343 = vmatprep.subr.bf16.mxu0 %v11662_v26  ;;  %6384 = vmatprep.subr.bf16.mxu1 %v11664_v16 }
 0x752   :  { %6344 = vmatpush1.bf16.msra.mxu0 %v11668_v45  ;;  %6385 = vmatpush1.bf16.msra.mxu1 %v11670_v43 }
 0x753   :  { %6659 = vmatprep.subr.bf16.mxu0 %v11680_v14  ;;  %6700 = vmatprep.subr.bf16.mxu1 %v11682_v25 }
 0x755   :  { %6362 = vmatmul.mubr.bf16.vlgmr.msra.gmra.mxu0 %v11576_v48  ;;  %6403 = vmatmul.mubr.bf16.vlgmr.msra.gmra.mxu1 %v11576_v48  ;;  %v11744_v48 = vld [vmem:[#allocation9 + $0x40] ss:$16 sps:$4 sm:$0xff]  }
 0x756   :  { %6691 = vmatprep.mubr.bf16.mxu0 %v12399_v42  ;;  %6732 = vmatprep.mubr.bf16.mxu1 %v12399_v42  ;;  %12733 = vst [vmem:[#allocation82_spill] sm:$0xff] %v11744_v48 }
 0x757   :  { %6660 = vmatpush1.bf16.msra.mxu0 %v11684_v15  ;;  %6701 = vmatpush1.bf16.msra.mxu1 %v11686_v0 }
 0x758   :  { %6661 = vmatprep.subr.bf16.mxu0 %v11692_v33  ;;  %6702 = vmatprep.subr.bf16.mxu1 %v11694_v38 }
 0x75b   :  { %6662 = vmatpush1.bf16.msra.mxu0 %v11696_v31  ;;  %6703 = vmatpush1.bf16.msra.mxu1 %v11698_v57 }
 0x75c   :  { %6663 = vmatprep.subr.bf16.mxu0 %v11704_v20  ;;  %6704 = vmatprep.subr.bf16.mxu1 %v11706_v54 }
 0x75f   :  { %6664 = vmatpush1.bf16.msra.mxu0 %v11708_v37  ;;  %6705 = vmatpush1.bf16.msra.mxu1 %v11710_v47 }
 0x760   :  { %6665 = vmatprep.subr.bf16.mxu0 %v11716_v19  ;;  %6706 = vmatprep.subr.bf16.mxu1 %v11718_v17 }
 0x763   :  { %6666 = vmatpush1.bf16.msra.mxu0 %v11720_v35  ;;  %6707 = vmatpush1.bf16.msra.mxu1 %v11722_v59 }
 0x764   :  { %6667 = vmatprep.subr.bf16.mxu0 %v11728_v11  ;;  %6708 = vmatprep.subr.bf16.mxu1 %v11730_v52  ;;  %v11758_v52 = vld [vmem:[#allocation9 + $0x28] ss:$16 sps:$4 sm:$0xff]  }
 0x765   :  { %12738 = vst [vmem:[#allocation57_spill] sm:$0xff] %v11758_v52 }
 0x767   :  { %6668 = vmatpush1.bf16.msra.mxu0 %v11732_v46  ;;  %6709 = vmatpush1.bf16.msra.mxu1 %v11734_v61  ;;  %v11754_v46 = vld [vmem:[#allocation9 + $0x2c] ss:$16 sps:$4 sm:$0xff]   ;;  %v11756_v61 = vld [vmem:[#allocation9 + $0x20] ss:$16 sps:$4 sm:$0xff]  }
 0x768   :  { %6669 = vmatprep.subr.bf16.mxu0 %v11740_v55  ;;  %6710 = vmatprep.subr.bf16.mxu1 %v11742_v29  ;;  %12736 = vst [vmem:[#allocation55_spill] sm:$0xff] %v11754_v46  ;;  %12737 = vst [vmem:[#allocation56_spill] sm:$0xff] %v11756_v61  ;;  %v11764_v29 = vld [vmem:[#allocation9 + $0x4] ss:$16 sps:$4 sm:$0xff]   ;;  %v11770_v55 = vld [vmem:[#allocation9 + $0x8] ss:$16 sps:$4 sm:$0xff]  }
 0x769   :  { %12739 = vst [vmem:[#allocation58_spill] sm:$0xff] %v11764_v29  ;;  %12742 = vst [vmem:[#allocation61_spill] sm:$0xff] %v11770_v55 }
 0x76b   :  { %6670 = vmatpush1.bf16.msra.mxu0 %v11744_v48  ;;  %6711 = vmatpush1.bf16.msra.mxu1 %v11746_v24  ;;  %v11766_v48 = vld [vmem:[#allocation9 + $0xc] ss:$16 sps:$4 sm:$0xff]   ;;  %v11768_v24 = vld [vmem:[#allocation9] ss:$16 sps:$4 sm:$0xff]  }
 0x76c   :  { %6671 = vmatprep.subr.bf16.mxu0 %v11752_v44  ;;  %6712 = vmatprep.subr.bf16.mxu1 %v11754_v46  ;;  %12740 = vst [vmem:[#allocation59_spill] sm:$0xff] %v11766_v48  ;;  %12741 = vst [vmem:[#allocation60_spill] sm:$0xff] %v11768_v24  ;;  %v11776_v46 = vld [vmem:[#allocation8 + $0xe4] ss:$16 sps:$4 sm:$0xff]  }
 0x76d   :  { %12743 = vst [vmem:[#allocation62_spill] sm:$0xff] %v11776_v46 }
 0x76f   :  { %6672 = vmatpush1.bf16.msra.mxu0 %v11756_v61  ;;  %6713 = vmatpush1.bf16.msra.mxu1 %v11758_v52  ;;  %v11778_v61 = vld [vmem:[#allocation8 + $0xec] ss:$16 sps:$4 sm:$0xff]  }
 0x770   :  { %6673 = vmatprep.subr.bf16.mxu0 %v11764_v29  ;;  %6714 = vmatprep.subr.bf16.mxu1 %v11766_v48  ;;  %12744 = vst [vmem:[#allocation63_spill] sm:$0xff] %v11778_v61 }
 0x773   :  { %6674 = vmatpush1.bf16.msra.mxu0 %v11768_v24  ;;  %6715 = vmatpush1.bf16.msra.mxu1 %v11770_v55  ;;  %v6088_v55 = vld [vmem:[%s12160_s8] sm:$0xf] }
 0x774   :  { %6901 = vmatprep.subr.bf16.mxu0 %v11776_v46  ;;  %6942 = vmatprep.subr.bf16.mxu1 %v11778_v61  ;;  %v6093_v24 = vrot.slane %v6088_v55, %v12695_v62  ;;  %v6097_v46 = vrot.slane %v6088_v55, %v12696_v41  ;;  %v6105_v38 = vrot.slane %v6088_v55, %v12482_v30 }
 0x7d5   :  { %v5798_v52 = vpop.f32.mrf.mxu0  ;;  %v5839_v44 = vpop.f32.mrf.mxu1 }
 0x7d7   :  { %v5800_v11 = vpop.f32.mrf.mxu0  ;;  %v5841_v59 = vpop.f32.mrf.mxu1 }
 0x7d9   :  { %v5802_v35 = vpop.f32.mrf.mxu0  ;;  %v5843_v29 = vpop.f32.mrf.mxu1 }
 0x7db   :  { %v5803_v17 = vpop.f32.mrf.mxu0  ;;  %v5844_v48 = vpop.f32.mrf.mxu1 }
 0x7f5   :  { %v6040_v19 = vpop.f32.mrf.mxu0  ;;  %v6081_v47 = vpop.f32.mrf.mxu1 }
 0x7f6   :  { %v6041_v37 = vadd.f32 %v6040_v19, %v5798_v52  ;;  %v6082_v19 = vadd.f32 %v6081_v47, %v5839_v44  ;;  %v6101_v52 = vrot.slane %v6088_v55, %v12483_v12  ;;  %v12746_v55 = vld [vmem:[#allocation91_spill] sm:$0xff] }
 0x7f7   :  { %v6042_v61 = vpop.f32.mrf.mxu0  ;;  %v6083_v54 = vpop.f32.mrf.mxu1 }
 0x7f8   :  { %v6110_v20 = vadd.f32 %v6093_v24, %v6041_v37  ;;  %v6043_v57 = vadd.f32 %v6042_v61, %v5800_v11  ;;  %v6084_v48 = vadd.f32 %v6083_v54, %v5841_v59  ;;  %v6112_v41 = vadd.f32 %v6101_v52, %v6082_v19 }
 0x7f9   :  { %v6044_v31 = vpop.f32.mrf.mxu0  ;;  %v6085_v35 = vpop.f32.mrf.mxu1 }
 0x7fa   :  { %v6114_v29 = vmul.f32 0.5, %v6110_v20  ;;  %v6111_v17 = vadd.f32 %v6097_v46, %v6043_v57  ;;  %v6113_v15 = vadd.f32 %v6105_v38, %v6084_v48  ;;  %v6116_v24 = vmul.f32 0.5, %v6112_v41 }
 0x7fb   :  { %v6045_v33 = vpop.f32.mrf.mxu0  ;;  %v6086_v0 = vpop.f32.mrf.mxu1 }
 0x7fc   :  { %9853 = vtanh.f32 %v6114_v29  ;;  %v6115_v62 = vmul.f32 0.5, %v6111_v17 }
 0x7fe   :  { %9855 = vtanh.f32 %v6115_v62 }
 0x7ff   :  { %9857 = vtanh.f32 %v6113_v15  ;;  %v12745_v15 = vld [vmem:[#allocation89_spill] sm:$0xff] }
 0x800   :  { %9859 = vtanh.f32 %v6116_v24 }
 0x809   :  { %v9854_v37 = vpop.eup %9853 }
 0x80a   :  { %v6120_v31 = vmul.f32 0.5, %v9854_v37 }
 0x80b   :  { %v9856_v11 = vpop.eup %9855 }
 0x80c   :  { %v6123_v20 = vadd.f32 0.5, %v6120_v31  ;;  %v6121_v57 = vmul.f32 0.5, %v9856_v11  ;;  %v9858_v59 = vpop.eup %9857 }
 0x80d   :  { %v9860_v29 = vpop.eup %9859 }
 0x80e   :  { %v6124_v54 = vadd.f32 0.5, %v6121_v57  ;;  %v6128_v33 = vmul.f32 %v9858_v59, %v6123_v20  ;;  %v6122_v31 = vmul.f32 0.5, %v9860_v29  ;;  %v12748_v57 = vld [vmem:[#allocation90_spill] sm:$0xff]  ;;  %v11819_v29 = vld [vmem:[#allocation8 + $0xac] ss:$16 sps:$4 sm:$0xff]  }
 0x810   :  { %v6127_v0 = vmul.f32 %v6124_v54, %v11526_v49  ;;  %v12747_v49 = vld [vmem:[#allocation92_spill] sm:$0xff]  ;;  %v6125_v11 = vadd.f32 0.5, %v6122_v31 }
 0x812   :  { %v11790_v46 = vadd.f32 %v6128_v33, %v6127_v0  ;;  %v11799_v0 = vld [vmem:[#allocation8 + $0xe0] ss:$16 sps:$4 sm:$0xff]   ;;  %v11801_v33 = vld [vmem:[#allocation8 + $0xe8] ss:$16 sps:$4 sm:$0xff]  }
 0x814   :  { %9861 = vtanh.f32 %v11790_v46 }
 0x815   :  { %v6363_v62 = vpop.f32.mrf.mxu0  ;;  %v6404_v44 = vpop.f32.mrf.mxu1 }
 0x816   :  { %v6411_v38 = vadd.f32 %v6363_v62, %v12745_v15  ;;  %v6413_v54 = vadd.f32 %v6404_v44, %v12748_v57  ;;  %v11805_v15 = vld [vmem:[#allocation8 + $0xc4] ss:$16 sps:$4 sm:$0xff]   ;;  %v11811_v44 = vld [vmem:[#allocation8 + $0xc0] ss:$16 sps:$4 sm:$0xff]  }
 0x817   :  { %v6365_v41 = vpop.f32.mrf.mxu0  ;;  %v6406_v47 = vpop.f32.mrf.mxu1 }
 0x818   :  { %v6415_v61 = vmul.f32 0.5, %v6411_v38  ;;  %v6412_v35 = vadd.f32 %v6365_v41, %v12746_v55  ;;  %v6414_v52 = vadd.f32 %v6406_v47, %v12747_v49  ;;  %v11807_v38 = vld [vmem:[#allocation8 + $0xcc] ss:$16 sps:$4 sm:$0xff]   ;;  %v6417_v41 = vmul.f32 0.5, %v6413_v54  ;;  %v11838_v54 = vld [vmem:[#allocation8 + $0x80] ss:$16 sps:$4 sm:$0xff]  }
 0x819   :  { %v6367_v17 = vpop.f32.mrf.mxu0  ;;  %v6408_v48 = vpop.f32.mrf.mxu1 }
 0x81a   :  { %9863 = vtanh.f32 %v6415_v61  ;;  %v6416_v19 = vmul.f32 0.5, %v6412_v35  ;;  %v11813_v61 = vld [vmem:[#allocation8 + $0xc8] ss:$16 sps:$4 sm:$0xff]   ;;  %v11817_v35 = vld [vmem:[#allocation8 + $0xa4] ss:$16 sps:$4 sm:$0xff]  }
 0x81b   :  { %v6368_v24 = vpop.f32.mrf.mxu0  ;;  %v6409_v37 = vpop.f32.mrf.mxu1 }
 0x81c   :  { %9865 = vtanh.f32 %v6416_v19  ;;  %v11827_v24 = vld [vmem:[#allocation8 + $0xa8] ss:$16 sps:$4 sm:$0xff]  }
 0x81d   :  { %9867 = vtanh.f32 %v6414_v52  ;;  %v11825_v52 = vld [vmem:[#allocation8 + $0xa0] ss:$16 sps:$4 sm:$0xff]  }
 0x81e   :  { %9869 = vtanh.f32 %v6417_v41 }
 0x821   :  { %v9862_v20 = vpop.eup %9861 }
 0x822   :  { %v11797_v59 = vmul.f32 %v9862_v20, %v6125_v11  ;;  %v11831_v11 = vld [vmem:[#allocation8 + $0x84] ss:$16 sps:$4 sm:$0xff]   ;;  %v11833_v20 = vld [vmem:[#allocation8 + $0x8c] ss:$16 sps:$4 sm:$0xff]  }
 0x824   :  { %12749 = vst [vmem:[#allocation73_spill] sm:$0xff] %v11797_v59  ;;  %v6466_v62 = vpack.c.bf16 %v11797_v59, %v11797_v59  ;;  %v11873_v59 = vld [vmem:[#allocation8 + $0x2c] ss:$16 sps:$4 sm:$0xff]  }
 0x825   :  { %12759 = vst [vmem:[#allocation25_spill] sm:$0xff] %v11873_v59 }
 0x826   :  { %6692 = vmatmul.mubr.bf16.vlgmr.msra.gmra.mxu0 %v6466_v62  ;;  %6733 = vmatmul.mubr.bf16.vlgmr.msra.gmra.mxu1 %v6466_v62  ;;  %v11840_v62 = vld [vmem:[#allocation8 + $0x88] ss:$16 sps:$4 sm:$0xff]  }
 0x827   :  { %v9864_v47 = vpop.eup %9863  ;;  %6902 = vmatpush1.bf16.msra.mxu0 %v11799_v0  ;;  %6943 = vmatpush1.bf16.msra.mxu1 %v11801_v33  ;;  %12750 = vst [vmem:[#allocation75_spill] sm:$0xff] %v11840_v62 }
 0x828   :  { %v6421_v55 = vmul.f32 0.5, %v9864_v47  ;;  %6903 = vmatprep.subr.bf16.mxu0 %v11805_v15  ;;  %6944 = vmatprep.subr.bf16.mxu1 %v11807_v38  ;;  %v11846_v47 = vld [vmem:[#allocation8 + $0x64] ss:$16 sps:$4 sm:$0xff]  }
 0x829   :  { %v9866_v17 = vpop.eup %9865  ;;  %6933 = vmatprep.mubr.bf16.mxu0 %v12399_v42  ;;  %6974 = vmatprep.mubr.bf16.mxu1 %v12399_v42  ;;  %12751 = vst [vmem:[#allocation76_spill] sm:$0xff] %v11846_v47 }
 0x82a   :  { %v6424_v48 = vadd.f32 0.5, %v6421_v55  ;;  %v6422_v19 = vmul.f32 0.5, %v9866_v17  ;;  %v9868_v49 = vpop.eup %9867  ;;  %v11848_v55 = vld [vmem:[#allocation8 + $0x6c] ss:$16 sps:$4 sm:$0xff]   ;;  %v11855_v17 = vld [vmem:[#allocation8 + $0x68] ss:$16 sps:$4 sm:$0xff]  }
 0x82b   :  { %6904 = vmatpush1.bf16.msra.mxu0 %v11811_v44  ;;  %6945 = vmatpush1.bf16.msra.mxu1 %v11813_v61  ;;  %12752 = vst [vmem:[#allocation74_spill] sm:$0xff] %v11848_v55  ;;  %12754 = vst [vmem:[#allocation15_spill] sm:$0xff] %v11855_v17 }
 0x82c   :  { %v6425_v37 = vadd.f32 0.5, %v6422_v19  ;;  %v6429_v31 = vmul.f32 %v9868_v49, %v6424_v48  ;;  %6905 = vmatprep.subr.bf16.mxu0 %v11817_v35  ;;  %6946 = vmatprep.subr.bf16.mxu1 %v11819_v29  ;;  %v11859_v48 = vld [vmem:[#allocation8 + $0x44] ss:$16 sps:$4 sm:$0xff]   ;;  %v11861_v19 = vld [vmem:[#allocation8 + $0x4c] ss:$16 sps:$4 sm:$0xff]   ;;  %v9870_v49 = vpop.eup %9869 }
 0x82d   :  { %12755 = vst [vmem:[#allocation19_spill] sm:$0xff] %v11859_v48  ;;  %12756 = vst [vmem:[#allocation16_spill] sm:$0xff] %v11861_v19 }
 0x82e   :  { %v6428_v57 = vmul.f32 %v6425_v37, %v11551_v39  ;;  %v11853_v39 = vld [vmem:[#allocation8 + $0x60] ss:$16 sps:$4 sm:$0xff]  }
 0x82f   :  { %6906 = vmatpush1.bf16.msra.mxu0 %v11825_v52  ;;  %6947 = vmatpush1.bf16.msra.mxu1 %v11827_v24  ;;  %12753 = vst [vmem:[#allocation17_spill] sm:$0xff] %v11853_v39  ;;  %v11865_v37 = vld [vmem:[#allocation8 + $0x40] ss:$16 sps:$4 sm:$0xff]  }
 0x830   :  { %v11842_v41 = vadd.f32 %v6429_v31, %v6428_v57  ;;  %6907 = vmatprep.subr.bf16.mxu0 %v11831_v11  ;;  %6948 = vmatprep.subr.bf16.mxu1 %v11833_v20  ;;  %v11867_v31 = vld [vmem:[#allocation8 + $0x48] ss:$16 sps:$4 sm:$0xff]   ;;  %v11871_v57 = vld [vmem:[#allocation8 + $0x24] ss:$16 sps:$4 sm:$0xff]  }
 0x831   :  { %12757 = vst [vmem:[#allocation21_spill] sm:$0xff] %v11867_v31  ;;  %12758 = vst [vmem:[#allocation18_spill] sm:$0xff] %v11871_v57 }
 0x832   :  { %9871 = vtanh.f32 %v11842_v41 }
 0x833   :  { %6908 = vmatpush1.bf16.msra.mxu0 %v11838_v54  ;;  %6949 = vmatpush1.bf16.msra.mxu1 %v11840_v62 }
 0x834   :  { %6909 = vmatprep.subr.bf16.mxu0 %v11846_v47  ;;  %6950 = vmatprep.subr.bf16.mxu1 %v11848_v55  ;;  %v6423_v55 = vmul.f32 0.5, %v9870_v49  ;;  %v11889_v49 = vld [vmem:[#allocation8] ss:$16 sps:$4 sm:$0xff]  }
 0x836   :  { %v6426_v47 = vadd.f32 0.5, %v6423_v55 }
 0x837   :  { %6910 = vmatpush1.bf16.msra.mxu0 %v11853_v39  ;;  %6951 = vmatpush1.bf16.msra.mxu1 %v11855_v17  ;;  %v11877_v39 = vld [vmem:[#allocation8 + $0x20] ss:$16 sps:$4 sm:$0xff]   ;;  %v11879_v17 = vld [vmem:[#allocation8 + $0x28] ss:$16 sps:$4 sm:$0xff]  }
 0x838   :  { %6911 = vmatprep.subr.bf16.mxu0 %v11859_v48  ;;  %6952 = vmatprep.subr.bf16.mxu1 %v11861_v19  ;;  %v11883_v48 = vld [vmem:[#allocation8 + $0x4] ss:$16 sps:$4 sm:$0xff]   ;;  %v11885_v19 = vld [vmem:[#allocation8 + $0xc] ss:$16 sps:$4 sm:$0xff]  }
 0x83b   :  { %6912 = vmatpush1.bf16.msra.mxu0 %v11865_v37  ;;  %6953 = vmatpush1.bf16.msra.mxu1 %v11867_v31  ;;  %v11891_v31 = vld [vmem:[#allocation8 + $0x8] ss:$16 sps:$4 sm:$0xff]  }
 0x83c   :  { %6913 = vmatprep.subr.bf16.mxu0 %v11871_v57  ;;  %6954 = vmatprep.subr.bf16.mxu1 %v11873_v59 }
 0x83f   :  { %v9872_v62 = vpop.eup %9871  ;;  %6914 = vmatpush1.bf16.msra.mxu0 %v11877_v39  ;;  %6955 = vmatpush1.bf16.msra.mxu1 %v11879_v17 }
 0x840   :  { %6915 = vmatprep.subr.bf16.mxu0 %v11883_v48  ;;  %6956 = vmatprep.subr.bf16.mxu1 %v11885_v19  ;;  %v6432_v57 = vmul.f32 %v9872_v62, %v6426_v47 }
 0x842   :  { %v6433_v59 = vpack.c.bf16 %v6432_v57, %v6432_v57 }
 0x843   :  { %6916 = vmatpush1.bf16.msra.mxu0 %v11889_v49  ;;  %6957 = vmatpush1.bf16.msra.mxu1 %v11891_v31 }
 0x844   :  { %7224 = vmatprep.subr.bf16.mxu0 %v11572_v1  ;;  %7265 = vmatprep.subr.bf16.mxu1 %v11574_v63  ;;  %v12760_v1 = vld [vmem:[#allocation38_spill] sm:$0xff]  ;;  %v12761_v63 = vld [vmem:[#allocation39_spill] sm:$0xff] }
 0x846   :  { %6934 = vmatmul.mubr.bf16.vlgmr.msra.gmra.mxu0 %v6433_v59  ;;  %6975 = vmatmul.mubr.bf16.vlgmr.msra.gmra.mxu1 %v6433_v59 }
 0x847   :  { %7225 = vmatpush1.bf16.msra.mxu0 %v11580_v22  ;;  %7266 = vmatpush1.bf16.msra.mxu1 %v11582_v40  ;;  %v12762_v22 = vld [vmem:[#allocation40_spill] sm:$0xff]  ;;  %v12763_v40 = vld [vmem:[#allocation79_spill] sm:$0xff] }
 0x848   :  { %7226 = vmatprep.subr.bf16.mxu0 %v11586_v6  ;;  %7267 = vmatprep.subr.bf16.mxu1 %v11588_v58  ;;  %v12764_v6 = vld [vmem:[#allocation77_spill] sm:$0xff]  ;;  %v12765_v58 = vld [vmem:[#allocation80_spill] sm:$0xff] }
 0x849   :  { %7256 = vmatprep.mubr.bf16.mxu0 %v12399_v42  ;;  %7297 = vmatprep.mubr.bf16.mxu1 %v12399_v42 }
 0x84b   :  { %7227 = vmatpush1.bf16.msra.mxu0 %v11594_v28  ;;  %7268 = vmatpush1.bf16.msra.mxu1 %v11596_v18  ;;  %v12766_v28 = vld [vmem:[#allocation78_spill] sm:$0xff] }
 0x84c   :  { %7228 = vmatprep.subr.bf16.mxu0 %v11600_v60  ;;  %7269 = vmatprep.subr.bf16.mxu1 %v11602_v51  ;;  %v12767_v18 = vld [vmem:[#allocation42_spill] sm:$0xff]  ;;  %v12768_v60 = vld [vmem:[#allocation43_spill] sm:$0xff]  ;;  %v12769_v51 = vld [vmem:[#allocation44_spill] sm:$0xff] }
 0x84f   :  { %7229 = vmatpush1.bf16.msra.mxu0 %v11608_v5  ;;  %7270 = vmatpush1.bf16.msra.mxu1 %v11610_v50  ;;  %v12770_v5 = vld [vmem:[#allocation45_spill] sm:$0xff]  ;;  %v12771_v50 = vld [vmem:[#allocation46_spill] sm:$0xff] }
 0x850   :  { %7230 = vmatprep.subr.bf16.mxu0 %v11614_v34  ;;  %7271 = vmatprep.subr.bf16.mxu1 %v11616_v2  ;;  %v12772_v34 = vld [vmem:[#allocation47_spill] sm:$0xff]  ;;  %v12773_v2 = vld [vmem:[#allocation48_spill] sm:$0xff] }
 0x853   :  { %7231 = vmatpush1.bf16.msra.mxu0 %v11620_v3  ;;  %7272 = vmatpush1.bf16.msra.mxu1 %v11622_v4  ;;  %v12774_v3 = vld [vmem:[#allocation49_spill] sm:$0xff]  ;;  %v12775_v4 = vld [vmem:[#allocation50_spill] sm:$0xff] }
 0x854   :  { %7232 = vmatprep.subr.bf16.mxu0 %v11626_v7  ;;  %7273 = vmatprep.subr.bf16.mxu1 %v11628_v8  ;;  %v12776_v7 = vld [vmem:[#allocation51_spill] sm:$0xff]  ;;  %v12777_v8 = vld [vmem:[#allocation81_spill] sm:$0xff] }
 0x857   :  { %7233 = vmatpush1.bf16.msra.mxu0 %v11632_v53  ;;  %7274 = vmatpush1.bf16.msra.mxu1 %v11634_v10  ;;  %v12778_v53 = vld [vmem:[#allocation83_spill] sm:$0xff]  ;;  %v12779_v10 = vld [vmem:[#allocation84_spill] sm:$0xff] }
 0x858   :  { %7234 = vmatprep.subr.bf16.mxu0 %v11638_v13  ;;  %7275 = vmatprep.subr.bf16.mxu1 %v11640_v36  ;;  %v12780_v13 = vld [vmem:[#allocation82_spill] sm:$0xff]  ;;  %v12781_v36 = vld [vmem:[#allocation53_spill] sm:$0xff] }
 0x85b   :  { %7235 = vmatpush1.bf16.msra.mxu0 %v11644_v23  ;;  %7276 = vmatpush1.bf16.msra.mxu1 %v11646_v56  ;;  %v12782_v23 = vld [vmem:[#allocation54_spill] sm:$0xff]  ;;  %v12783_v56 = vld [vmem:[#allocation55_spill] sm:$0xff] }
 0x85c   :  { %7236 = vmatprep.subr.bf16.mxu0 %v11650_v21  ;;  %7277 = vmatprep.subr.bf16.mxu1 %v11652_v32  ;;  %v12784_v21 = vld [vmem:[#allocation56_spill] sm:$0xff]  ;;  %v12785_v32 = vld [vmem:[#allocation57_spill] sm:$0xff] }
 0x85f   :  { %7237 = vmatpush1.bf16.msra.mxu0 %v11656_v9  ;;  %7278 = vmatpush1.bf16.msra.mxu1 %v11658_v27  ;;  %v12786_v9 = vld [vmem:[#allocation58_spill] sm:$0xff]  ;;  %v12787_v27 = vld [vmem:[#allocation59_spill] sm:$0xff] }
 0x860   :  { %7238 = vmatprep.subr.bf16.mxu0 %v11662_v26  ;;  %7279 = vmatprep.subr.bf16.mxu1 %v11664_v16  ;;  %v12788_v26 = vld [vmem:[#allocation60_spill] sm:$0xff]  ;;  %v12789_v16 = vld [vmem:[#allocation61_spill] sm:$0xff] }
 0x863   :  { %7239 = vmatpush1.bf16.msra.mxu0 %v11668_v45  ;;  %7280 = vmatpush1.bf16.msra.mxu1 %v11670_v43  ;;  %v12790_v45 = vld [vmem:[#allocation62_spill] sm:$0xff]  ;;  %v12791_v43 = vld [vmem:[#allocation63_spill] sm:$0xff] }
 0x864   :  { %7554 = vmatprep.subr.bf16.mxu0 %v11680_v14  ;;  %7595 = vmatprep.subr.bf16.mxu1 %v11682_v25 }
 0x866   :  { %7257 = vmatmul.mubr.bf16.vlgmr.msra.gmra.mxu0 %v6433_v59  ;;  %7298 = vmatmul.mubr.bf16.vlgmr.msra.gmra.mxu1 %v6433_v59 }
 0x867   :  { %7555 = vmatpush1.bf16.msra.mxu0 %v12760_v1  ;;  %7596 = vmatpush1.bf16.msra.mxu1 %v12761_v63  ;;  %v6983_v63 = vld [vmem:[%s12160_s8] sm:$0xf] }
 0x868   :  { %7556 = vmatprep.subr.bf16.mxu0 %v12762_v22  ;;  %7597 = vmatprep.subr.bf16.mxu1 %v12763_v40  ;;  %v12792_v22 = vld [vmem:[#allocation64_spill] sm:$0xff] }
 0x869   :  { %7586 = vmatprep.mubr.bf16.mxu0 %v12399_v42  ;;  %7627 = vmatprep.mubr.bf16.mxu1 %v12399_v42  ;;  %v6988_v40 = vrot.slane %v6983_v63, %v12792_v22 }
 0x86b   :  { %7557 = vmatpush1.bf16.msra.mxu0 %v12764_v6  ;;  %7598 = vmatpush1.bf16.msra.mxu1 %v12765_v58 }
 0x86c   :  { %7558 = vmatprep.subr.bf16.mxu0 %v12766_v28  ;;  %7599 = vmatprep.subr.bf16.mxu1 %v12767_v18  ;;  %v12793_v18 = vld [vmem:[#allocation66_spill] sm:$0xff] }
 0x86f   :  { %7559 = vmatpush1.bf16.msra.mxu0 %v12768_v60  ;;  %7600 = vmatpush1.bf16.msra.mxu1 %v12769_v51  ;;  %v6992_v60 = vrot.slane %v6983_v63, %v12793_v18 }
 0x870   :  { %7560 = vmatprep.subr.bf16.mxu0 %v12770_v5  ;;  %7601 = vmatprep.subr.bf16.mxu1 %v12771_v50 }
 0x873   :  { %7561 = vmatpush1.bf16.msra.mxu0 %v12772_v34  ;;  %7602 = vmatpush1.bf16.msra.mxu1 %v12773_v2 }
 0x874   :  { %7562 = vmatprep.subr.bf16.mxu0 %v12774_v3  ;;  %7603 = vmatprep.subr.bf16.mxu1 %v12775_v4 }
 0x877   :  { %7563 = vmatpush1.bf16.msra.mxu0 %v12776_v7  ;;  %7604 = vmatpush1.bf16.msra.mxu1 %v12777_v8 }
 0x878   :  { %7564 = vmatprep.subr.bf16.mxu0 %v12778_v53  ;;  %7605 = vmatprep.subr.bf16.mxu1 %v12779_v10  ;;  %v7000_v53 = vrot.slane %v6983_v63, %v12482_v30 }
 0x87b   :  { %7565 = vmatpush1.bf16.msra.mxu0 %v12780_v13  ;;  %7606 = vmatpush1.bf16.msra.mxu1 %v12781_v36 }
 0x87c   :  { %7566 = vmatprep.subr.bf16.mxu0 %v12782_v23  ;;  %7607 = vmatprep.subr.bf16.mxu1 %v12783_v56 }
 0x87f   :  { %7567 = vmatpush1.bf16.msra.mxu0 %v12784_v21  ;;  %7608 = vmatpush1.bf16.msra.mxu1 %v12785_v32  ;;  %v6996_v21 = vrot.slane %v6983_v63, %v12483_v12  ;;  %v12795_v63 = vld [vmem:[#allocation96_spill] sm:$0xff] }
 0x880   :  { %7568 = vmatprep.subr.bf16.mxu0 %v12786_v9  ;;  %7609 = vmatprep.subr.bf16.mxu1 %v12787_v27 }
 0x883   :  { %7569 = vmatpush1.bf16.msra.mxu0 %v12788_v26  ;;  %7610 = vmatpush1.bf16.msra.mxu1 %v12789_v16 }
 0x884   :  { %7796 = vmatprep.subr.bf16.mxu0 %v12790_v45  ;;  %7837 = vmatprep.subr.bf16.mxu1 %v12791_v43 }
 0x8e6   :  { %v6693_v14 = vpop.f32.mrf.mxu0  ;;  %v6734_v25 = vpop.f32.mrf.mxu1 }
 0x8e8   :  { %v6695_v59 = vpop.f32.mrf.mxu0  ;;  %v6736_v62 = vpop.f32.mrf.mxu1 }
 0x8ea   :  { %v6697_v47 = vpop.f32.mrf.mxu0  ;;  %v6738_v55 = vpop.f32.mrf.mxu1 }
 0x8ec   :  { %v6698_v57 = vpop.f32.mrf.mxu0  ;;  %v6739_v1 = vpop.f32.mrf.mxu1 }
 0x8ed   :  { %v12794_v1 = vld [vmem:[#allocation72_spill] sm:$0xff] }
 0x906   :  { %v6935_v6 = vpop.f32.mrf.mxu0  ;;  %v6976_v58 = vpop.f32.mrf.mxu1 }
 0x907   :  { %v6936_v28 = vadd.f32 %v6935_v6, %v6693_v14  ;;  %v6977_v56 = vadd.f32 %v6976_v58, %v6734_v25  ;;  %v12796_v6 = vld [vmem:[#allocation93_spill] sm:$0xff] }
 0x908   :  { %v6937_v51 = vpop.f32.mrf.mxu0  ;;  %v6978_v5 = vpop.f32.mrf.mxu1 }
 0x909   :  { %v7005_v50 = vadd.f32 %v6988_v40, %v6936_v28  ;;  %v6938_v34 = vadd.f32 %v6937_v51, %v6695_v59  ;;  %v6979_v8 = vadd.f32 %v6978_v5, %v6736_v62  ;;  %v7007_v32 = vadd.f32 %v6996_v21, %v6977_v56 }
 0x90a   :  { %v6939_v2 = vpop.f32.mrf.mxu0  ;;  %v6980_v3 = vpop.f32.mrf.mxu1  ;;  %v649_v40 = vadd.f32 %v12795_v63, %v12794_v1  ;;  %v9728_v1 = vld [vmem:[%s12161_s9 + $0x40] ss:$8 sps:$4 sm:$0xff]   ;;  %v9733_v63 = vld [vmem:[%s12161_s9 + $0x34] ss:$8 sps:$4 sm:$0xff]  }
 0x90b   :  { %v7009_v4 = vmul.f32 0.5, %v7005_v50  ;;  %v7006_v7 = vadd.f32 %v6992_v60, %v6938_v34  ;;  %v7008_v23 = vadd.f32 %v7000_v53, %v6979_v8  ;;  %v7011_v9 = vmul.f32 0.5, %v7007_v32  ;;  %v12797_v3 = vld [vmem:[#allocation95_spill] sm:$0xff] }
 0x90c   :  { %v6940_v10 = vpop.f32.mrf.mxu0  ;;  %v6981_v13 = vpop.f32.mrf.mxu1 }
 0x90d   :  { %9873 = vtanh.f32 %v7009_v4  ;;  %v7010_v36 = vmul.f32 0.5, %v7006_v7 }
 0x90f   :  { %9875 = vtanh.f32 %v7010_v36  ;;  %v12798_v36 = vld [vmem:[#allocation94_spill] sm:$0xff] }
 0x910   :  { %9877 = vtanh.f32 %v7008_v23 }
 0x911   :  { %9879 = vtanh.f32 %v7011_v9 }
 0x91a   :  { %v9874_v27 = vpop.eup %9873 }
 0x91b   :  { %v7015_v26 = vmul.f32 0.5, %v9874_v27 }
 0x91c   :  { %v9876_v16 = vpop.eup %9875 }
 0x91d   :  { %v7018_v45 = vadd.f32 0.5, %v7015_v26  ;;  %v7016_v43 = vmul.f32 0.5, %v9876_v16  ;;  %v9878_v59 = vpop.eup %9877 }
 0x91e   :  { %v9880_v50 = vpop.eup %9879 }
 0x91f   :  { %v7019_v14 = vadd.f32 0.5, %v7016_v43  ;;  %v7023_v47 = vmul.f32 %v9878_v59, %v7018_v45  ;;  %v7017_v53 = vmul.f32 0.5, %v9880_v50  ;;  %v12808_v59 = vld [vmem:[#allocation25_spill] sm:$0xff]  ;;  %v12809_v50 = vld [vmem:[#allocation14_spill] sm:$0xff] }
 0x921   :  { %v7022_v62 = vmul.f32 %v7019_v14, %v11790_v46  ;;  %v7020_v10 = vadd.f32 0.5, %v7017_v53  ;;  %v12806_v14 = vld [vmem:[#allocation21_spill] sm:$0xff] }
 0x923   :  { %v11975_v55 = vadd.f32 %v7023_v47, %v7022_v62 }
 0x925   :  { %9881 = vtanh.f32 %v11975_v55 }
 0x926   :  { %v7258_v25 = vpop.f32.mrf.mxu0  ;;  %v7299_v57 = vpop.f32.mrf.mxu1 }
 0x927   :  { %v7306_v58 = vadd.f32 %v7258_v25, %v12796_v6  ;;  %v7308_v23 = vadd.f32 %v7299_v57, %v12798_v36  ;;  %v9736_v6 = vld [vmem:[%s12161_s9 + $0x24] ss:$8 sps:$4 sm:$0xff]  }
 0x928   :  { %v7260_v28 = vpop.f32.mrf.mxu0  ;;  %v7301_v60 = vpop.f32.mrf.mxu1 }
 0x929   :  { %v7310_v51 = vmul.f32 0.5, %v7306_v58  ;;  %v7307_v5 = vadd.f32 %v7260_v28, %v649_v40  ;;  %v7309_v4 = vadd.f32 %v7301_v60, %v12797_v3  ;;  %v7312_v32 = vmul.f32 0.5, %v7308_v23  ;;  %v9731_v40 = vld [vmem:[%s12161_s9 + $0x30] ss:$8 sps:$4 sm:$0xff]   ;;  %v9734_v58 = vld [vmem:[%s12161_s9 + $0x20] ss:$8 sps:$4 sm:$0xff]  }
 0x92a   :  { %v7262_v34 = vpop.f32.mrf.mxu0  ;;  %v7303_v2 = vpop.f32.mrf.mxu1  ;;  %v9739_v28 = vld [vmem:[%s12161_s9 + $0x14] ss:$8 sps:$4 sm:$0xff]   ;;  %v9737_v60 = vld [vmem:[%s12161_s9 + $0x10] ss:$8 sps:$4 sm:$0xff]  }
 0x92b   :  { %9883 = vtanh.f32 %v7310_v51  ;;  %v7311_v46 = vmul.f32 0.5, %v7307_v5  ;;  %v9742_v51 = vld [vmem:[%s12161_s9 + $0x4] ss:$8 sps:$4 sm:$0xff]   ;;  %v9740_v5 = vld [vmem:[%s12161_s9] ss:$8 sps:$4 sm:$0xff]   ;;  %v12810_v34 = vld [vmem:[#allocation41_spill] sm:$0xff] }
 0x92c   :  { %v7263_v7 = vpop.f32.mrf.mxu0  ;;  %v7304_v8 = vpop.f32.mrf.mxu1  ;;  %v7931_v2 = vpack.c.bf16 %v12810_v34, %v12809_v50  ;;  %v12812_v3 = vld [vmem:[#allocation32_spill] sm:$0xff] }
 0x92d   :  { %9885 = vtanh.f32 %v7311_v46  ;;  %v12811_v46 = vld [vmem:[#allocation52_spill] sm:$0xff]  ;;  %v12813_v7 = vld [vmem:[#allocation37_spill] sm:$0xff] }
 0x92e   :  { %9887 = vtanh.f32 %v7309_v4  ;;  %v7932_v4 = vpack.c.bf16 %v12812_v3, %v12811_v46  ;;  %v12814_v8 = vld [vmem:[#allocation73_spill] sm:$0xff] }
 0x92f   :  { %9889 = vtanh.f32 %v7312_v32  ;;  %v7933_v53 = vpack.c.bf16 %v12814_v8, %v12813_v7 }
 0x932   :  { %v9882_v13 = vpop.eup %9881 }
 0x933   :  { %v11983_v56 = vmul.f32 %v9882_v13, %v7020_v10 }
 0x935   :  { %v7361_v21 = vpack.c.bf16 %v11983_v56, %v11983_v56 }
 0x937   :  { %7587 = vmatmul.mubr.bf16.vlgmr.msra.gmra.mxu0 %v7361_v21  ;;  %7628 = vmatmul.mubr.bf16.vlgmr.msra.gmra.mxu1 %v7361_v21 }
 0x938   :  { %v9884_v9 = vpop.eup %9883  ;;  %7797 = vmatpush1.bf16.msra.mxu0 %v11799_v0  ;;  %7838 = vmatpush1.bf16.msra.mxu1 %v11801_v33 }
 0x939   :  { %v7316_v27 = vmul.f32 0.5, %v9884_v9  ;;  %7798 = vmatprep.subr.bf16.mxu0 %v11805_v15  ;;  %7839 = vmatprep.subr.bf16.mxu1 %v11807_v38 }
 0x93a   :  { %v9886_v26 = vpop.eup %9885  ;;  %7828 = vmatprep.mubr.bf16.mxu0 %v12399_v42  ;;  %7869 = vmatprep.mubr.bf16.mxu1 %v12399_v42 }
 0x93b   :  { %v7319_v16 = vadd.f32 0.5, %v7316_v27  ;;  %v7317_v45 = vmul.f32 0.5, %v9886_v26  ;;  %v9888_v43 = vpop.eup %9887  ;;  %v7878_v26 = vld [vmem:[%s12160_s8] sm:$0xf] }
 0x93c   :  { %7799 = vmatpush1.bf16.msra.mxu0 %v11811_v44  ;;  %7840 = vmatpush1.bf16.msra.mxu1 %v11813_v61  ;;  %v12799_v44 = vld [vmem:[#allocation75_spill] sm:$0xff]  ;;  %v12800_v61 = vld [vmem:[#allocation76_spill] sm:$0xff] }
 0x93d   :  { %v7320_v0 = vadd.f32 0.5, %v7317_v45  ;;  %v7324_v33 = vmul.f32 %v9888_v43, %v7319_v16  ;;  %7800 = vmatprep.subr.bf16.mxu0 %v11817_v35  ;;  %7841 = vmatprep.subr.bf16.mxu1 %v11819_v29  ;;  %v12801_v35 = vld [vmem:[#allocation74_spill] sm:$0xff]  ;;  %v9890_v29 = vpop.eup %9889  ;;  %v7883_v16 = vrot.slane %v7878_v26, %v12792_v22 }
 0x93f   :  { %v7323_v15 = vmul.f32 %v7320_v0, %v11842_v41  ;;  %v7318_v41 = vmul.f32 0.5, %v9890_v29 }
 0x940   :  { %7801 = vmatpush1.bf16.msra.mxu0 %v11825_v52  ;;  %7842 = vmatpush1.bf16.msra.mxu1 %v11827_v24  ;;  %v12802_v52 = vld [vmem:[#allocation17_spill] sm:$0xff]  ;;  %v12803_v24 = vld [vmem:[#allocation15_spill] sm:$0xff] }
 0x941   :  { %v7325_v38 = vadd.f32 %v7324_v33, %v7323_v15  ;;  %7802 = vmatprep.subr.bf16.mxu0 %v11831_v11  ;;  %7843 = vmatprep.subr.bf16.mxu1 %v11833_v20  ;;  %v12804_v11 = vld [vmem:[#allocation19_spill] sm:$0xff]  ;;  %v12805_v20 = vld [vmem:[#allocation16_spill] sm:$0xff]  ;;  %v7321_v62 = vadd.f32 0.5, %v7318_v41  ;;  %v7887_v33 = vrot.slane %v7878_v26, %v12793_v18 }
 0x943   :  { %9891 = vtanh.f32 %v7325_v38  ;;  %8133 = vst [vmem:[%s12165_s13] sm:$0xff] %v7325_v38 }
 0x944   :  { %7803 = vmatpush1.bf16.msra.mxu0 %v11838_v54  ;;  %7844 = vmatpush1.bf16.msra.mxu1 %v12799_v44  ;;  %v12807_v54 = vld [vmem:[#allocation18_spill] sm:$0xff] }
 0x945   :  { %7804 = vmatprep.subr.bf16.mxu0 %v12800_v61  ;;  %7845 = vmatprep.subr.bf16.mxu1 %v12801_v35 }
 0x948   :  { %7805 = vmatpush1.bf16.msra.mxu0 %v12802_v52  ;;  %7846 = vmatpush1.bf16.msra.mxu1 %v12803_v24 }
 0x949   :  { %7806 = vmatprep.subr.bf16.mxu0 %v12804_v11  ;;  %7847 = vmatprep.subr.bf16.mxu1 %v12805_v20  ;;  %v7895_v11 = vrot.slane %v7878_v26, %v12482_v30 }
 0x94c   :  { %7807 = vmatpush1.bf16.msra.mxu0 %v11865_v37  ;;  %7848 = vmatpush1.bf16.msra.mxu1 %v12806_v14  ;;  %v9721_v37 = vld [vmem:[%s12161_s9 + $0x74] ss:$8 sps:$4 sm:$0xff]  }
 0x94d   :  { %7808 = vmatprep.subr.bf16.mxu0 %v12807_v54  ;;  %7849 = vmatprep.subr.bf16.mxu1 %v12808_v59 }
 0x950   :  { %v9892_v47 = vpop.eup %9891  ;;  %7809 = vmatpush1.bf16.msra.mxu0 %v11877_v39  ;;  %7850 = vmatpush1.bf16.msra.mxu1 %v11879_v17  ;;  %v9719_v39 = vld [vmem:[%s12161_s9 + $0x70] ss:$8 sps:$4 sm:$0xff]   ;;  %v9724_v17 = vld [vmem:[%s12161_s9 + $0x64] ss:$8 sps:$4 sm:$0xff]  }
 0x951   :  { %7810 = vmatprep.subr.bf16.mxu0 %v11883_v48  ;;  %7851 = vmatprep.subr.bf16.mxu1 %v11885_v19  ;;  %v7327_v25 = vmul.f32 %v9892_v47, %v7321_v62  ;;  %v9722_v48 = vld [vmem:[%s12161_s9 + $0x60] ss:$8 sps:$4 sm:$0xff]   ;;  %v9727_v19 = vld [vmem:[%s12161_s9 + $0x54] ss:$8 sps:$4 sm:$0xff]   ;;  %v7891_v62 = vrot.slane %v7878_v26, %v12483_v12 }
 0x953   :  { %v7328_v57 = vpack.c.bf16 %v7327_v25, %v7327_v25  ;;  %8132 = vst [vmem:[%s12164_s12] sm:$0xff] %v7327_v25 }
 0x954   :  { %7811 = vmatpush1.bf16.msra.mxu0 %v11889_v49  ;;  %7852 = vmatpush1.bf16.msra.mxu1 %v11891_v31  ;;  %v9725_v31 = vld [vmem:[%s12161_s9 + $0x50] ss:$8 sps:$4 sm:$0xff]   ;;  %v9730_v49 = vld [vmem:[%s12161_s9 + $0x44] ss:$8 sps:$4 sm:$0xff]  }
 0x955   :  { %8043 = vmatprep.subr.bf16.mxu0 %v9721_v37 }
 0x957   :  { %7829 = vmatmul.mubr.bf16.vlgmr.msra.gmra.mxu0 %v7328_v57  ;;  %7870 = vmatmul.mubr.bf16.vlgmr.msra.gmra.mxu1 %v7328_v57 }
 0x958   :  { %8044 = vmatpush1.bf16.msra.mxu0 %v9719_v39  ;;  %8075 = vmatprep.mubr.bf16.mxu0 %v12399_v42 }
 0x959   :  { %8045 = vmatprep.subr.bf16.mxu0 %v9724_v17 }
 0x95c   :  { %8046 = vmatpush1.bf16.msra.mxu0 %v9722_v48 }
 0x95d   :  { %8047 = vmatprep.subr.bf16.mxu0 %v9727_v19 }
 0x960   :  { %8048 = vmatpush1.bf16.msra.mxu0 %v9725_v31  ;;  %v7951_v31 = vld [vmem:[%s12162_s10] sm:$0x3] }
 0x961   :  { %8049 = vmatprep.subr.bf16.mxu0 %v9730_v49  ;;  %v7956_v12 = vrot.slane %v7951_v31, %v12792_v22 }
 0x964   :  { %8050 = vmatpush1.bf16.msra.mxu0 %v9728_v1 }
 0x965   :  { %8051 = vmatprep.subr.bf16.mxu0 %v9733_v63 }
 0x968   :  { %8052 = vmatpush1.bf16.msra.mxu0 %v9731_v40  ;;  %v7960_v40 = vrot.slane %v7951_v31, %v12793_v18 }
 0x969   :  { %8053 = vmatprep.subr.bf16.mxu0 %v9736_v6 }
 0x96c   :  { %8054 = vmatpush1.bf16.msra.mxu0 %v9734_v58 }
 0x96d   :  { %8055 = vmatprep.subr.bf16.mxu0 %v9739_v28 }
 0x970   :  { %8056 = vmatpush1.bf16.msra.mxu0 %v9737_v60 }
 0x971   :  { %8057 = vmatprep.subr.bf16.mxu0 %v9742_v51 }
 0x974   :  { %8058 = vmatpush1.bf16.msra.mxu0 %v9740_v5 }
 0x977   :  { %8076 = vmatmul.mubr.bf16.vlgmr.msra.gmra.mxu0 %v7931_v2 }
 0x978   :  { %8085 = vmatprep.mubr.bf16.mxu0 %v12399_v42 }
 0x97f   :  { %8086 = vmatmul.mubr.bf16.gmra.mxu0 %v7932_v4 }
 0x980   :  { %8095 = vmatprep.mubr.bf16.mxu0 %v12399_v42 }
 0x987   :  { %8096 = vmatmul.mubr.bf16.gmra.mxu0 %v7933_v53 }
 0x988   :  { %8105 = vmatprep.mubr.bf16.mxu0 %v12399_v42 }
 0x9f7   :  { %v7588_v10 = vpop.f32.mrf.mxu0  ;;  %v7629_v13 = vpop.f32.mrf.mxu1 }
 0x9f9   :  { %v7590_v36 = vpop.f32.mrf.mxu0  ;;  %v7631_v23 = vpop.f32.mrf.mxu1 }
 0x9fb   :  { %v7592_v21 = vpop.f32.mrf.mxu0  ;;  %v7633_v32 = vpop.f32.mrf.mxu1 }
 0x9fd   :  { %v7593_v9 = vpop.f32.mrf.mxu0  ;;  %v7634_v27 = vpop.f32.mrf.mxu1 }
 0xa17   :  { %v7830_v45 = vpop.f32.mrf.mxu0  ;;  %v7871_v43 = vpop.f32.mrf.mxu1 }
 0xa18   :  { %v7831_v0 = vadd.f32 %v7830_v45, %v7588_v10  ;;  %v7872_v59 = vadd.f32 %v7871_v43, %v7629_v13 }
 0xa19   :  { %v7832_v42 = vpop.f32.mrf.mxu0  ;;  %v7873_v15 = vpop.f32.mrf.mxu1 }
 0xa1a   :  { %v7900_v38 = vadd.f32 %v7883_v16, %v7831_v0  ;;  %v7833_v44 = vadd.f32 %v7832_v42, %v7590_v36  ;;  %v7874_v24 = vadd.f32 %v7873_v15, %v7631_v23  ;;  %v7902_v47 = vadd.f32 %v7891_v62, %v7872_v59 }
 0xa1b   :  { %v7834_v61 = vpop.f32.mrf.mxu0  ;;  %v7875_v35 = vpop.f32.mrf.mxu1 }
 0xa1c   :  { %v7904_v29 = vmul.f32 0.5, %v7900_v38  ;;  %v7901_v52 = vadd.f32 %v7887_v33, %v7833_v44  ;;  %v7903_v54 = vadd.f32 %v7895_v11, %v7874_v24  ;;  %v7906_v25 = vmul.f32 0.5, %v7902_v47 }
 0xa1d   :  { %v7835_v20 = vpop.f32.mrf.mxu0  ;;  %v7876_v41 = vpop.f32.mrf.mxu1 }
 0xa1e   :  { %9893 = vtanh.f32 %v7904_v29  ;;  %v7905_v14 = vmul.f32 0.5, %v7901_v52 }
 0xa20   :  { %9895 = vtanh.f32 %v7905_v14 }
 0xa21   :  { %9897 = vtanh.f32 %v7903_v54 }
 0xa22   :  { %9899 = vtanh.f32 %v7906_v25 }
 0xa2b   :  { %v9894_v37 = vpop.eup %9893 }
 0xa2c   :  { %v7910_v57 = vmul.f32 0.5, %v9894_v37 }
 0xa2d   :  { %v9896_v39 = vpop.eup %9895 }
 0xa2e   :  { %v7913_v17 = vadd.f32 0.5, %v7910_v57  ;;  %v7911_v48 = vmul.f32 0.5, %v9896_v39  ;;  %v9898_v30 = vpop.eup %9897 }
 0xa30   :  { %v7914_v19 = vadd.f32 0.5, %v7911_v48  ;;  %v7918_v1 = vmul.f32 %v9898_v30, %v7913_v17 }
 0xa32   :  { %v7917_v49 = vmul.f32 %v7914_v19, %v11975_v55  ;;  %v9900_v55 = vpop.eup %9899 }
 0xa33   :  { %v7912_v50 = vmul.f32 0.5, %v9900_v55 }
 0xa34   :  { %v7919_v63 = vadd.f32 %v7918_v1, %v7917_v49 }
 0xa35   :  { %v7915_v3 = vadd.f32 0.5, %v7912_v50 }
 0xa36   :  { %9901 = vtanh.f32 %v7919_v63  ;;  %9036 = vst [vmem:[%s12165_s13 + $0x8] sm:$0xff] %v7919_v63 }
 0xa37   :  { %v8077_v6 = vpop.f32.mrf.mxu0 }
 0xa38   :  { %v8078_v58 = vadd.f32 %v8077_v6, %v7956_v12 }
 0xa39   :  { %v8079_v28 = vpop.f32.mrf.mxu0 }
 0xa3a   :  { %8116 = vst [vmem:[%s12163_s11] sm:$0xff] %v8078_v58  ;;  %v8080_v60 = vadd.f32 %v8079_v28, %v7960_v40 }
 0xa3b   :  { %v8081_v51 = vpop.f32.mrf.mxu0 }
 0xa3c   :  { %8117 = vst [vmem:[%s12163_s11 + $0x8] sm:$0xff] %v8080_v60  ;;  %v8082_v22 = vadd.f32 %v8081_v51, %v7956_v12 }
 0xa3d   :  { %v8083_v5 = vpop.f32.mrf.mxu0 }
 0xa3e   :  { %8118 = vst [vmem:[%s12163_s11 + $0x10] sm:$0xff] %v8082_v22  ;;  %v8084_v18 = vadd.f32 %v8083_v5, %v7960_v40 }
 0xa3f   :  { %v8087_v34 = vpop.f32.mrf.mxu0 }
 0xa40   :  { %8119 = vst [vmem:[%s12163_s11 + $0x18] sm:$0xff] %v8084_v18  ;;  %v8088_v2 = vadd.f32 %v8087_v34, %v7956_v12 }
 0xa41   :  { %v8089_v46 = vpop.f32.mrf.mxu0 }
 0xa42   :  { %8120 = vst [vmem:[%s12163_s11 + $0x20] sm:$0xff] %v8088_v2  ;;  %v8090_v4 = vadd.f32 %v8089_v46, %v7960_v40 }
 0xa43   :  { %v9902_v7 = vpop.eup %9901  ;;  %v8091_v8 = vpop.f32.mrf.mxu0 }
 0xa44   :  { %8121 = vst [vmem:[%s12163_s11 + $0x28] sm:$0xff] %v8090_v4  ;;  %v8092_v53 = vadd.f32 %v8091_v8, %v7956_v12  ;;  %v7921_v10 = vmul.f32 %v9902_v7, %v7915_v3 }
 0xa45   :  { %v8093_v13 = vpop.f32.mrf.mxu0 }
 0xa46   :  { %8122 = vst [vmem:[%s12163_s11 + $0x30] sm:$0xff] %v8092_v53  ;;  %v8094_v36 = vadd.f32 %v8093_v13, %v7960_v40  ;;  %v7934_v23 = vpack.c.bf16 %v7921_v10, %v11983_v56  ;;  %9035 = vst [vmem:[%s12164_s12 + $0x8] sm:$0xff] %v7921_v10 }
 0xa47   :  { %v8097_v21 = vpop.f32.mrf.mxu0 }
 0xa48   :  { %8123 = vst [vmem:[%s12163_s11 + $0x38] sm:$0xff] %v8094_v36  ;;  %v8098_v32 = vadd.f32 %v8097_v21, %v7956_v12  ;;  %8106 = vmatmul.mubr.bf16.gmra.mxu0 %v7934_v23 }
 0xa49   :  { %v8099_v9 = vpop.f32.mrf.mxu0 }
 0xa4a   :  { %8124 = vst [vmem:[%s12163_s11 + $0x40] sm:$0xff] %v8098_v32  ;;  %v8100_v27 = vadd.f32 %v8099_v9, %v7960_v40 }
 0xa4b   :  { %v8101_v26 = vpop.f32.mrf.mxu0 }
 0xa4c   :  { %8125 = vst [vmem:[%s12163_s11 + $0x48] sm:$0xff] %v8100_v27  ;;  %v8102_v56 = vadd.f32 %v8101_v26, %v7956_v12 }
 0xa4d   :  { %v8103_v16 = vpop.f32.mrf.mxu0 }
 0xa4e   :  { %8126 = vst [vmem:[%s12163_s11 + $0x50] sm:$0xff] %v8102_v56  ;;  %v8104_v45 = vadd.f32 %v8103_v16, %v7960_v40 }
 0xa50   :  { %8127 = vst [vmem:[%s12163_s11 + $0x58] sm:$0xff] %v8104_v45 }
 0xb08   :  { %v8107_v43 = vpop.f32.mrf.mxu0 }
 0xb09   :  { %v8108_v0 = vadd.f32 %v8107_v43, %v7956_v12 }
 0xb0a   :  { %v8109_v33 = vpop.f32.mrf.mxu0 }
 0xb0b   :  { %8128 = vst [vmem:[%s12163_s11 + $0x60] sm:$0xff] %v8108_v0  ;;  %v8110_v42 = vadd.f32 %v8109_v33, %v7960_v40 }
 0xb0c   :  { %v8111_v15 = vpop.f32.mrf.mxu0 }
 0xb0d   :  { %8129 = vst [vmem:[%s12163_s11 + $0x68] sm:$0xff] %v8110_v42  ;;  %v8112_v38 = vadd.f32 %v8111_v15, %v7956_v12 }
 0xb0e   :  { %v8113_v44 = vpop.f32.mrf.mxu0 }
 0xb0f   :  { %8130 = vst [vmem:[%s12163_s11 + $0x70] sm:$0xff] %v8112_v38  ;;  %v8114_v61 = vadd.f32 %v8113_v44, %v7960_v40 }
 0xb11   :  { %8131 = vst [vmem:[%s12163_s11 + $0x78] sm:$0xff] %v8114_v61 }
 0xb12   :  { %8150 = vsyncpa [#allocation5], 1 }
 0xb13   :  { %8151 = vsyncpa [#allocation7], 1 }
 0xb14   :  { %8152 = vsyncpa [#allocation10], 1 }

</bundles_post_ra>
